<compile_context>
chip_gen: v7x
topology: tpu7x:2x2x1
jax: 0.10.0
libtpu: 0.0.40
codegen_flags: <defaults>
</compile_context>

<pallas_src>
import jax
import jax.numpy as jnp
from jax.experimental import pallas as pl
from jax.experimental.pallas import tpu as pltpu

K = 7          # fused (cross) kernel size
P = 3          # symmetric padding that keeps H, W unchanged
LANES = 128    # TPU lane width

# Only the centre row and centre column of the fused 7x7 kernel are non-zero.
_CROSS_TAPS = tuple([(P, kx) for kx in range(K)] +
                    [(ky, P) for ky in range(K) if ky != P])
N_TAPS = len(_CROSS_TAPS)   # 13


def _rup(x, m):
    return ((x + m - 1) // m) * m


def _inception_kernel(xpad_ref, w_ref, b_ref, o_ref, patch_ref):
    """One grid step = (batch b, H-tile h).

    xpad_ref : (1, H+2P, W+2P, Cin_p)  padded input slab (resident per batch)
    w_ref    : (Kpad, Cp)              packed cross-kernel weights
    b_ref    : (1, Cp)                 fused bias (f32)
    o_ref    : (1, TH, W, Cp)          output tile
    patch_ref: (TH, W, Kpad) VMEM      im2col scratch (3-D: no per-tap reshape)
    """
    _, TH, W, Cp = o_ref.shape
    Cin_p = xpad_ref.shape[-1]
    Kpad = patch_ref.shape[-1]
    h0 = pl.multiple_of(pl.program_id(1) * TH, TH)

    # Build the im2col patch once per step: each shifted window is stored
    # UNRESHAPED into its tap slot along the contraction (last) axis.
    for t, (ky, kx) in enumerate(_CROSS_TAPS):
        patch_ref[:, :, t * Cin_p:(t + 1) * Cin_p] = (
            xpad_ref[0, pl.ds(h0 + ky, TH), pl.ds(kx, W), :])
    pad_k = Kpad - N_TAPS * Cin_p
    if pad_k:
        # Zero the contraction-padding tail.  The matching weight rows are also
        # zero, but uninitialised VMEM could hold NaNs and 0*NaN = NaN.
        patch_ref[:, :, N_TAPS * Cin_p:] = jnp.zeros((TH, W, pad_k),
                                                     patch_ref.dtype)

    # Single MXU matmul with contraction depth Kpad (multiple of 128), f32 acc.
    patch = patch_ref[...].reshape(TH * W, Kpad)   # free when W % 8 == 0
    acc = jnp.dot(patch, w_ref[...], preferred_element_type=jnp.float32)
    acc = acc + b_ref[...]                         # bias / epilogue in f32
    o_ref[...] = acc.reshape(1, TH, W, Cp).astype(o_ref.dtype)


def inception_block_v2(x_nchw, w_fused, b_fused, *, compute_dtype=jnp.bfloat16):
    """x_nchw: (B, Cin, H, W) -> (B, Cout, H, W).

    w_fused: (K, K, Cin, Cout) fused cross kernel (already contains the 1/7
    mean); b_fused: (Cout,).  compute_dtype=bfloat16 by default (f32 matmul
    accumulation is kept); pass jnp.float32 for bit-tight results."""
    B, Cin, H, W = x_nchw.shape
    Cout = w_fused.shape[-1]
    cb = jnp.dtype(compute_dtype).itemsize

    # ---- channel / contraction padding ------------------------------------
    if Cin >= 64:
        Cin_p = _rup(Cin, LANES)
    else:
        Cin_p = _rup(Cin, 32 // cb)          # 8 for f32, 16 for bf16
    Kraw = N_TAPS * Cin_p
    Kpad = _rup(Kraw, LANES)                 # free extra MXU depth
    # Small Cout: keep the true channel count (masked stores beat 4-16x padded
    # HBM writeback).  Larger Cout: lane-dense multiple of 128 (round to 256
    # instead if Cout > 128 and you only target v6e/v7x).
    Cp = Cout if Cout <= 32 else _rup(Cout, LANES)

    # ---- spatial tiling: divisor search under a per-row VMEM budget --------
    Hp, Wp = H + 2 * P, W + 2 * P
    row_bytes = (max(Kpad, LANES) * cb            # patch row
                 + 3 * max(Cp, LANES) * 4)        # f32 acc + 2 out buffers
    max_rows = max(8, min(4096, (12 << 20) // row_bytes))
    cands = [th for th in range(1, H + 1) if H % th == 0 and th * W <= max_rows]
    TH = max(cands) if cands else 1
    n_h = H // TH

    # ---- operand packing ----------------------------------------------------
    x_nhwc = jnp.transpose(x_nchw, (0, 2, 3, 1))
    xpad = jnp.pad(x_nhwc, ((0, 0), (P, P), (P, P), (0, Cin_p - Cin)))
    xpad = xpad.astype(compute_dtype)

    taps = []
    for (ky, kx) in _CROSS_TAPS:
        taps.append(jnp.pad(w_fused[ky, kx],
                            ((0, Cin_p - Cin), (0, Cp - Cout))))
    w_packed = jnp.concatenate(taps, axis=0)                     # (Kraw, Cp)
    w_packed = jnp.pad(w_packed, ((0, Kpad - Kraw), (0, 0))).astype(compute_dtype)
    b_packed = jnp.pad(b_fused, (0, Cp - Cout)).reshape(1, Cp).astype(jnp.float32)

    # ---- VMEM budget (lane/sublane-padded, double-buffered) ----------------
    vmem_est = (2 * Hp * _rup(Wp, 8) * max(Cin_p, LANES) * cb       # slab
                + 2 * _rup(Kpad, 8) * max(Cp, LANES) * cb           # weights
                + 2 * 8 * max(Cp, LANES) * 4                        # bias
                + 2 * TH * _rup(W, 8) * max(Cp, LANES) * 4          # out tile
                + 2 * TH * _rup(W, 8) * max(Kpad, LANES) * cb)      # patch+acc
    vmem_limit = int(min(max(2 * vmem_est, 32 << 20), 64 << 20))

    out_nhwc = pl.pallas_call(
        _inception_kernel,
        out_shape=jax.ShapeDtypeStruct((B, H, W, Cp), x_nchw.dtype),
        grid_spec=pltpu.PrefetchScalarGridSpec(
            num_scalar_prefetch=0,
            grid=(B, n_h),
            in_specs=[
                # Full padded slab per batch; block index constant in h so it
                # is DMA'd once per batch and reused across H tiles.
                pl.BlockSpec((1, Hp, Wp, Cin_p), lambda b, h: (b, 0, 0, 0)),
                pl.BlockSpec((Kpad, Cp), lambda b, h: (0, 0)),
                pl.BlockSpec((1, Cp), lambda b, h: (0, 0)),
            ],
            out_specs=pl.BlockSpec((1, TH, W, Cp), lambda b, h: (b, h, 0, 0)),
            scratch_shapes=[pltpu.VMEM((TH, W, Kpad), compute_dtype)],
        ),
        compiler_params=pltpu.CompilerParams(
            dimension_semantics=("parallel", "parallel"),
            vmem_limit_bytes=vmem_limit),
    )(xpad, w_packed, b_packed)

    out_nhwc = out_nhwc[..., :Cout]              # no-op when Cout <= 32
    # TODO(synk): keep the surrounding model NHWC end-to-end to drop this
    # transpose (and the NCHW->NHWC one above); they are wrapper-contract only.
    return jnp.transpose(out_nhwc, (0, 3, 1, 2))


def make_params(key, in_channels, out_channels, num_kernels=6):
    """Deterministic Kaiming-normal (fan_out, relu) init of the 7 convs.
    Returns (individual kernel list for the reference path,
             fused weight (K, K, Cin, Cout), fused bias (Cout,))."""
    keys = jax.random.split(key, num_kernels + 1)
    w_fused = jnp.zeros((out_channels, in_channels, K, K), jnp.float32)
    kernel_list = []   # (weight OIHW, (pad_h, pad_w)) for the reference path
    idx = 0
    for i in range(num_kernels // 2):
        # [1, 2i+3] kernel, padding [0, i+1]
        kh, kw = 1, 2 * i + 3
        std = (2.0 / (out_channels * kh * kw)) ** 0.5
        wk = std * jax.random.normal(keys[idx], (out_channels, in_channels, kh, kw),
                                     jnp.float32)
        idx += 1
        kernel_list.append((wk, (0, i + 1)))
        w_fused = w_fused.at[:, :, P:P + 1, P - (i + 1):P + (i + 2)].add(wk)
        # [2i+3, 1] kernel, padding [i+1, 0]
        kh, kw = 2 * i + 3, 1
        std = (2.0 / (out_channels * kh * kw)) ** 0.5
        wk = std * jax.random.normal(keys[idx], (out_channels, in_channels, kh, kw),
                                     jnp.float32)
        idx += 1
        kernel_list.append((wk, (i + 1, 0)))
        w_fused = w_fused.at[:, :, P - (i + 1):P + (i + 2), P:P + 1].add(wk)
    # 1x1 kernel, padding 0
    std = (2.0 / (out_channels * 1 * 1)) ** 0.5
    wk = std * jax.random.normal(keys[idx], (out_channels, in_channels, 1, 1),
                                 jnp.float32)
    kernel_list.append((wk, (0, 0)))
    w_fused = w_fused.at[:, :, P:P + 1, P:P + 1].add(wk)

    n_total = num_kernels + 1
    w_fused = w_fused / n_total                      # folds the mean
    # PyTorch init sets every conv bias to 0 -> fused bias is 0.
    b_fused = jnp.zeros((out_channels,), jnp.float32)
    # OIHW -> (KH, KW, Cin, Cout) for the Pallas kernel
    return kernel_list, jnp.transpose(w_fused, (2, 3, 1, 0)), b_fused


def reference_forward(x_nchw, kernel_list):
    """Pure-JAX reference: mean of the 7 separate convolutions (bias = 0)."""
    outs = []
    for w, (ph, pw) in kernel_list:
        o = jax.lax.conv_general_dilated(
            x_nchw, w, window_strides=(1, 1),
            padding=((ph, ph), (pw, pw)),
            dimension_numbers=("NCHW", "OIHW", "NCHW"))
        outs.append(o)
    return jnp.mean(jnp.stack(outs, axis=-1), axis=-1)


if __name__ == "__main__":
    B, C_IN, C_OUT, H, W = 2, 4, 8, 16, 16
    key = jax.random.PRNGKey(0)
    k_x, k_w = jax.random.split(key)

    x = jax.random.normal(k_x, (B, C_IN, H, W), jnp.float32)
    kernel_list, w_fused, b_fused = make_params(k_w, C_IN, C_OUT, num_kernels=6)

    ref = reference_forward(x, kernel_list)

    # Exactness check with f32 compute.
    out_f32 = jax.block_until_ready(
        inception_block_v2(x, w_fused, b_fused, compute_dtype=jnp.float32))
    assert out_f32.shape == (B, C_OUT, H, W), out_f32.shape
    assert jnp.allclose(out_f32, ref, atol=1e-4, rtol=1e-4), (
        float(jnp.max(jnp.abs(out_f32 - ref))))

    # Default path: bf16 operands, f32 accumulation.
    out_bf16 = jax.block_until_ready(inception_block_v2(x, w_fused, b_fused))
    assert out_bf16.shape == (B, C_OUT, H, W), out_bf16.shape
    bf16_err = float(jnp.max(jnp.abs(out_bf16 - ref)))
    assert bf16_err < 1e-1, bf16_err

    print("KERNEL_OK")
</pallas_src>

<mosaic_0001>
module attributes {stable_mosaic.version = 11 : i64} {
  func.func @_inception_kernel(%arg0: i32, %arg1: i32, %arg2: memref<1x22x22x8xf32, #tpu.memory_space<vmem>>, %arg3: memref<128x8xf32, #tpu.memory_space<vmem>>, %arg4: memref<1x8xf32, #tpu.memory_space<vmem>>, %arg5: memref<1x16x16x8xf32, #tpu.memory_space<vmem>>, %arg6: memref<16x16x128xf32, #tpu.memory_space<vmem>>) attributes {dimension_semantics = [#tpu.dimension_semantics<parallel>, #tpu.dimension_semantics<parallel>], iteration_bounds = array<i64: 2, 1>, scalar_prefetch = 0 : i64, scratch_operands = 1 : i64, tpu.core_type = #tpu.core_type<tc>, window_params = [{transform_indices = @transform_0, window_bounds = array<i64: 1, 22, 22, 8>}, {pipeline_mode = #tpu.pipeline_mode<synchronous>, transform_indices = @transform_1, window_bounds = array<i64: 128, 8>}, {pipeline_mode = #tpu.pipeline_mode<synchronous>, transform_indices = @transform_2, window_bounds = array<i64: 1, 8>}, {transform_indices = @transform_3, window_bounds = array<i64: 1, 16, 16, 8>}]} {
    %c16_i32 = arith.constant 16 : i32
    %0 = arith.muli %arg1, %c16_i32 : i32
    %1 = tpu.assume_multiple %0, 16 : i32
    %c3_i32 = arith.constant 3 : i32
    %2 = arith.addi %1, %c3_i32 : i32
    %c0 = arith.constant 0 : index
    %3 = arith.index_cast %2 : i32 to index
    %c0_0 = arith.constant 0 : index
    %c0_1 = arith.constant 0 : index
    %4 = vector.load %arg2[%c0, %3, %c0_0, %c0_1] : memref<1x22x22x8xf32, #tpu.memory_space<vmem>>, vector<1x16x16x8xf32>
    %5 = vector.shape_cast %4 : vector<1x16x16x8xf32> to vector<16x16x8xf32>
    %c0_2 = arith.constant 0 : index
    %c0_3 = arith.constant 0 : index
    %c0_4 = arith.constant 0 : index
    %6 = vector.load %arg6[%c0_2, %c0_3, %c0_4] : memref<16x16x128xf32, #tpu.memory_space<vmem>>, vector<16x16x8xf32>
    tpu.vector_store %arg6[%c0_2, %c0_3, %c0_4], %5 {strides = array<i32>} : memref<16x16x128xf32, #tpu.memory_space<vmem>>, vector<16x16x8xf32>,
    %c3_i32_5 = arith.constant 3 : i32
    %7 = arith.addi %1, %c3_i32_5 : i32
    %c0_6 = arith.constant 0 : index
    %8 = arith.index_cast %7 : i32 to index
    %c1 = arith.constant 1 : index
    %c0_7 = arith.constant 0 : index
    %9 = vector.load %arg2[%c0_6, %8, %c1, %c0_7] : memref<1x22x22x8xf32, #tpu.memory_space<vmem>>, vector<1x16x16x8xf32>
    %10 = vector.shape_cast %9 : vector<1x16x16x8xf32> to vector<16x16x8xf32>
    %c0_8 = arith.constant 0 : index
    %c0_9 = arith.constant 0 : index
    %c8 = arith.constant 8 : index
    %11 = vector.load %arg6[%c0_8, %c0_9, %c8] : memref<16x16x128xf32, #tpu.memory_space<vmem>>, vector<16x16x8xf32>
    tpu.vector_store %arg6[%c0_8, %c0_9, %c8], %10 {strides = array<i32>} : memref<16x16x128xf32, #tpu.memory_space<vmem>>, vector<16x16x8xf32>,
    %c3_i32_10 = arith.constant 3 : i32
    %12 = arith.addi %1, %c3_i32_10 : i32
    %c0_11 = arith.constant 0 : index
    %13 = arith.index_cast %12 : i32 to index
    %c2 = arith.constant 2 : index
    %c0_12 = arith.constant 0 : index
    %14 = vector.load %arg2[%c0_11, %13, %c2, %c0_12] : memref<1x22x22x8xf32, #tpu.memory_space<vmem>>, vector<1x16x16x8xf32>
    %15 = vector.shape_cast %14 : vector<1x16x16x8xf32> to vector<16x16x8xf32>
    %c0_13 = arith.constant 0 : index
    %c0_14 = arith.constant 0 : index
    %c16 = arith.constant 16 : index
    %16 = vector.load %arg6[%c0_13, %c0_14, %c16] : memref<16x16x128xf32, #tpu.memory_space<vmem>>, vector<16x16x8xf32>
    tpu.vector_store %arg6[%c0_13, %c0_14, %c16], %15 {strides = array<i32>} : memref<16x16x128xf32, #tpu.memory_space<vmem>>, vector<16x16x8xf32>,
    %c3_i32_15 = arith.constant 3 : i32
    %17 = arith.addi %1, %c3_i32_15 : i32
    %c0_16 = arith.constant 0 : index
    %18 = arith.index_cast %17 : i32 to index
    %c3 = arith.constant 3 : index
    %c0_17 = arith.constant 0 : index
    %19 = vector.load %arg2[%c0_16, %18, %c3, %c0_17] : memref<1x22x22x8xf32, #tpu.memory_space<vmem>>, vector<1x16x16x8xf32>
    %20 = vector.shape_cast %19 : vector<1x16x16x8xf32> to vector<16x16x8xf32>
    %c0_18 = arith.constant 0 : index
    %c0_19 = arith.constant 0 : index
    %c24 = arith.constant 24 : index
    %21 = vector.load %arg6[%c0_18, %c0_19, %c24] : memref<16x16x128xf32, #tpu.memory_space<vmem>>, vector<16x16x8xf32>
    tpu.vector_store %arg6[%c0_18, %c0_19, %c24], %20 {strides = array<i32>} : memref<16x16x128xf32, #tpu.memory_space<vmem>>, vector<16x16x8xf32>,
    %c3_i32_20 = arith.constant 3 : i32
    %22 = arith.addi %1, %c3_i32_20 : i32
    %c0_21 = arith.constant 0 : index
    %23 = arith.index_cast %22 : i32 to index
    %c4 = arith.constant 4 : index
    %c0_22 = arith.constant 0 : index
    %24 = vector.load %arg2[%c0_21, %23, %c4, %c0_22] : memref<1x22x22x8xf32, #tpu.memory_space<vmem>>, vector<1x16x16x8xf32>
    %25 = vector.shape_cast %24 : vector<1x16x16x8xf32> to vector<16x16x8xf32>
    %c0_23 = arith.constant 0 : index
    %c0_24 = arith.constant 0 : index
    %c32 = arith.constant 32 : index
    %26 = vector.load %arg6[%c0_23, %c0_24, %c32] : memref<16x16x128xf32, #tpu.memory_space<vmem>>, vector<16x16x8xf32>
    tpu.vector_store %arg6[%c0_23, %c0_24, %c32], %25 {strides = array<i32>} : memref<16x16x128xf32, #tpu.memory_space<vmem>>, vector<16x16x8xf32>,
    %c3_i32_25 = arith.constant 3 : i32
    %27 = arith.addi %1, %c3_i32_25 : i32
    %c0_26 = arith.constant 0 : index
    %28 = arith.index_cast %27 : i32 to index
    %c5 = arith.constant 5 : index
    %c0_27 = arith.constant 0 : index
    %29 = vector.load %arg2[%c0_26, %28, %c5, %c0_27] : memref<1x22x22x8xf32, #tpu.memory_space<vmem>>, vector<1x16x16x8xf32>
    %30 = vector.shape_cast %29 : vector<1x16x16x8xf32> to vector<16x16x8xf32>
    %c0_28 = arith.constant 0 : index
    %c0_29 = arith.constant 0 : index
    %c40 = arith.constant 40 : index
    %31 = vector.load %arg6[%c0_28, %c0_29, %c40] : memref<16x16x128xf32, #tpu.memory_space<vmem>>, vector<16x16x8xf32>
    tpu.vector_store %arg6[%c0_28, %c0_29, %c40], %30 {strides = array<i32>} : memref<16x16x128xf32, #tpu.memory_space<vmem>>, vector<16x16x8xf32>,
    %c3_i32_30 = arith.constant 3 : i32
    %32 = arith.addi %1, %c3_i32_30 : i32
    %c0_31 = arith.constant 0 : index
    %33 = arith.index_cast %32 : i32 to index
    %c6 = arith.constant 6 : index
    %c0_32 = arith.constant 0 : index
    %34 = vector.load %arg2[%c0_31, %33, %c6, %c0_32] : memref<1x22x22x8xf32, #tpu.memory_space<vmem>>, vector<1x16x16x8xf32>
    %35 = vector.shape_cast %34 : vector<1x16x16x8xf32> to vector<16x16x8xf32>
    %c0_33 = arith.constant 0 : index
    %c0_34 = arith.constant 0 : index
    %c48 = arith.constant 48 : index
    %36 = vector.load %arg6[%c0_33, %c0_34, %c48] : memref<16x16x128xf32, #tpu.memory_space<vmem>>, vector<16x16x8xf32>
    tpu.vector_store %arg6[%c0_33, %c0_34, %c48], %35 {strides = array<i32>} : memref<16x16x128xf32, #tpu.memory_space<vmem>>, vector<16x16x8xf32>,
    %c0_i32 = arith.constant 0 : i32
    %37 = arith.addi %1, %c0_i32 : i32
    %c0_35 = arith.constant 0 : index
    %38 = arith.index_cast %37 : i32 to index
    %c3_36 = arith.constant 3 : index
    %c0_37 = arith.constant 0 : index
    %39 = vector.load %arg2[%c0_35, %38, %c3_36, %c0_37] : memref<1x22x22x8xf32, #tpu.memory_space<vmem>>, vector<1x16x16x8xf32>
    %40 = vector.shape_cast %39 : vector<1x16x16x8xf32> to vector<16x16x8xf32>
    %c0_38 = arith.constant 0 : index
    %c0_39 = arith.constant 0 : index
    %c56 = arith.constant 56 : index
    %41 = vector.load %arg6[%c0_38, %c0_39, %c56] : memref<16x16x128xf32, #tpu.memory_space<vmem>>, vector<16x16x8xf32>
    tpu.vector_store %arg6[%c0_38, %c0_39, %c56], %40 {strides = array<i32>} : memref<16x16x128xf32, #tpu.memory_space<vmem>>, vector<16x16x8xf32>,
    %c1_i32 = arith.constant 1 : i32
    %42 = arith.addi %1, %c1_i32 : i32
    %c0_40 = arith.constant 0 : index
    %43 = arith.index_cast %42 : i32 to index
    %c3_41 = arith.constant 3 : index
    %c0_42 = arith.constant 0 : index
    %44 = vector.load %arg2[%c0_40, %43, %c3_41, %c0_42] : memref<1x22x22x8xf32, #tpu.memory_space<vmem>>, vector<1x16x16x8xf32>
    %45 = vector.shape_cast %44 : vector<1x16x16x8xf32> to vector<16x16x8xf32>
    %c0_43 = arith.constant 0 : index
    %c0_44 = arith.constant 0 : index
    %c64 = arith.constant 64 : index
    %46 = vector.load %arg6[%c0_43, %c0_44, %c64] : memref<16x16x128xf32, #tpu.memory_space<vmem>>, vector<16x16x8xf32>
    tpu.vector_store %arg6[%c0_43, %c0_44, %c64], %45 {strides = array<i32>} : memref<16x16x128xf32, #tpu.memory_space<vmem>>, vector<16x16x8xf32>,
    %c2_i32 = arith.constant 2 : i32
    %47 = arith.addi %1, %c2_i32 : i32
    %c0_45 = arith.constant 0 : index
    %48 = arith.index_cast %47 : i32 to index
    %c3_46 = arith.constant 3 : index
    %c0_47 = arith.constant 0 : index
    %49 = vector.load %arg2[%c0_45, %48, %c3_46, %c0_47] : memref<1x22x22x8xf32, #tpu.memory_space<vmem>>, vector<1x16x16x8xf32>
    %50 = vector.shape_cast %49 : vector<1x16x16x8xf32> to vector<16x16x8xf32>
    %c0_48 = arith.constant 0 : index
    %c0_49 = arith.constant 0 : index
    %c72 = arith.constant 72 : index
    %51 = vector.load %arg6[%c0_48, %c0_49, %c72] : memref<16x16x128xf32, #tpu.memory_space<vmem>>, vector<16x16x8xf32>
    tpu.vector_store %arg6[%c0_48, %c0_49, %c72], %50 {strides = array<i32>} : memref<16x16x128xf32, #tpu.memory_space<vmem>>, vector<16x16x8xf32>,
    %c4_i32 = arith.constant 4 : i32
    %52 = arith.addi %1, %c4_i32 : i32
    %c0_50 = arith.constant 0 : index
    %53 = arith.index_cast %52 : i32 to index
    %c3_51 = arith.constant 3 : index
    %c0_52 = arith.constant 0 : index
    %54 = vector.load %arg2[%c0_50, %53, %c3_51, %c0_52] : memref<1x22x22x8xf32, #tpu.memory_space<vmem>>, vector<1x16x16x8xf32>
    %55 = vector.shape_cast %54 : vector<1x16x16x8xf32> to vector<16x16x8xf32>
    %c0_53 = arith.constant 0 : index
    %c0_54 = arith.constant 0 : index
    %c80 = arith.constant 80 : index
    %56 = vector.load %arg6[%c0_53, %c0_54, %c80] : memref<16x16x128xf32, #tpu.memory_space<vmem>>, vector<16x16x8xf32>
    tpu.vector_store %arg6[%c0_53, %c0_54, %c80], %55 {strides = array<i32>} : memref<16x16x128xf32, #tpu.memory_space<vmem>>, vector<16x16x8xf32>,
    %c5_i32 = arith.constant 5 : i32
    %57 = arith.addi %1, %c5_i32 : i32
    %c0_55 = arith.constant 0 : index
    %58 = arith.index_cast %57 : i32 to index
    %c3_56 = arith.constant 3 : index
    %c0_57 = arith.constant 0 : index
    %59 = vector.load %arg2[%c0_55, %58, %c3_56, %c0_57] : memref<1x22x22x8xf32, #tpu.memory_space<vmem>>, vector<1x16x16x8xf32>
    %60 = vector.shape_cast %59 : vector<1x16x16x8xf32> to vector<16x16x8xf32>
    %c0_58 = arith.constant 0 : index
    %c0_59 = arith.constant 0 : index
    %c88 = arith.constant 88 : index
    %61 = vector.load %arg6[%c0_58, %c0_59, %c88] : memref<16x16x128xf32, #tpu.memory_space<vmem>>, vector<16x16x8xf32>
    tpu.vector_store %arg6[%c0_58, %c0_59, %c88], %60 {strides = array<i32>} : memref<16x16x128xf32, #tpu.memory_space<vmem>>, vector<16x16x8xf32>,
    %c6_i32 = arith.constant 6 : i32
    %62 = arith.addi %1, %c6_i32 : i32
    %c0_60 = arith.constant 0 : index
    %63 = arith.index_cast %62 : i32 to index
    %c3_61 = arith.constant 3 : index
    %c0_62 = arith.constant 0 : index
    %64 = vector.load %arg2[%c0_60, %63, %c3_61, %c0_62] : memref<1x22x22x8xf32, #tpu.memory_space<vmem>>, vector<1x16x16x8xf32>
    %65 = vector.shape_cast %64 : vector<1x16x16x8xf32> to vector<16x16x8xf32>
    %c0_63 = arith.constant 0 : index
    %c0_64 = arith.constant 0 : index
    %c96 = arith.constant 96 : index
    %66 = vector.load %arg6[%c0_63, %c0_64, %c96] : memref<16x16x128xf32, #tpu.memory_space<vmem>>, vector<16x16x8xf32>
    tpu.vector_store %arg6[%c0_63, %c0_64, %c96], %65 {strides = array<i32>} : memref<16x16x128xf32, #tpu.memory_space<vmem>>, vector<16x16x8xf32>,
    %cst = arith.constant 0.000000e+00 : f32
    %67 = vector.broadcast %cst : f32 to vector<16x16x24xf32>
    %c0_65 = arith.constant 0 : index
    %c0_66 = arith.constant 0 : index
    %c104 = arith.constant 104 : index
    %68 = vector.load %arg6[%c0_65, %c0_66, %c104] : memref<16x16x128xf32, #tpu.memory_space<vmem>>, vector<16x16x24xf32>
    tpu.vector_store %arg6[%c0_65, %c0_66, %c104], %67 {strides = array<i32>} : memref<16x16x128xf32, #tpu.memory_space<vmem>>, vector<16x16x24xf32>,
    %c0_67 = arith.constant 0 : index
    %c0_68 = arith.constant 0 : index
    %c0_69 = arith.constant 0 : index
    %69 = vector.load %arg6[%c0_67, %c0_68, %c0_69] : memref<16x16x128xf32, #tpu.memory_space<vmem>>, vector<16x16x128xf32>
    %70 = vector.shape_cast %69 : vector<16x16x128xf32> to vector<256x128xf32>
    %c0_70 = arith.constant 0 : index
    %c0_71 = arith.constant 0 : index
    %71 = vector.load %arg3[%c0_70, %c0_71] : memref<128x8xf32, #tpu.memory_space<vmem>>, vector<128x8xf32>
    %cst_72 = arith.constant dense<0.000000e+00> : vector<256x8xf32>
    %72 = tpu.matmul %70, %71, %cst_72 {dimension_numbers = #tpu.dot_dimension_numbers<[1], [0], [0], [1], [0, 0, 1, 1], [], []>} : vector<256x128xf32>, vector<128x8xf32>, vector<256x8xf32> -> vector<256x8xf32>
    %c0_73 = arith.constant 0 : index
    %c0_74 = arith.constant 0 : index
    %73 = vector.load %arg4[%c0_73, %c0_74] : memref<1x8xf32, #tpu.memory_space<vmem>>, vector<1x8xf32>
    %74 = vector.broadcast %73 : vector<1x8xf32> to vector<256x8xf32>
    %75 = arith.addf %72, %74 : vector<256x8xf32>
    %76 = vector.shape_cast %75 : vector<256x8xf32> to vector<1x16x16x8xf32>
    %c0_75 = arith.constant 0 : index
    %c0_76 = arith.constant 0 : index
    %c0_77 = arith.constant 0 : index
    %c0_78 = arith.constant 0 : index
    %77 = vector.load %arg5[%c0_75, %c0_76, %c0_77, %c0_78] : memref<1x16x16x8xf32, #tpu.memory_space<vmem>>, vector<1x16x16x8xf32>
    tpu.vector_store %arg5[%c0_75, %c0_76, %c0_77, %c0_78], %76 {strides = array<i32>} : memref<1x16x16x8xf32, #tpu.memory_space<vmem>>, vector<1x16x16x8xf32>,
    return
  }
  func.func @transform_0(%arg0: i32, %arg1: i32) -> (i32, i32, i32, i32) {
    %c0_i32 = arith.constant 0 : i32
    %c0_i32_0 = arith.constant 0 : i32
    %c0_i32_1 = arith.constant 0 : i32
    %c0_i32_2 = arith.constant 0 : i32
    return %arg0, %c0_i32, %c0_i32_0, %c0_i32_1 : i32, i32, i32, i32
  }
  func.func @transform_1(%arg0: i32, %arg1: i32) -> (i32, i32) {
    %c0_i32 = arith.constant 0 : i32
    %c0_i32_0 = arith.constant 0 : i32
    %c0_i32_1 = arith.constant 0 : i32
    return %c0_i32, %c0_i32_0 : i32, i32
  }
  func.func @transform_2(%arg0: i32, %arg1: i32) -> (i32, i32) {
    %c0_i32 = arith.constant 0 : i32
    %c0_i32_0 = arith.constant 0 : i32
    %c0_i32_1 = arith.constant 0 : i32
    return %c0_i32, %c0_i32_0 : i32, i32
  }
  func.func @transform_3(%arg0: i32, %arg1: i32) -> (i32, i32, i32, i32) {
    %c0_i32 = arith.constant 0 : i32
    %c0_i32_0 = arith.constant 0 : i32
    %c0_i32_1 = arith.constant 0 : i32
    return %arg0, %arg1, %c0_i32, %c0_i32_0 : i32, i32, i32, i32
  }
}

</mosaic_0001>

<bundles_post_ra>
// kernel: tpu_custom_call.1
= control target key start
LH: loop header
LB: loop body
LE: loop exit
PB: predicated region body
PF: predicated region fallthrough
CT: control target
= control target key end

     0   :  { %s3723_s12 = smov 0   ;;  %s3725_s13 = smov 0   ;;  %s5331_s0 = inlined_call_operand.vmem [shape: f32[2,22,22,8], index: 0, kind: input, shape index: {}]   ;;  %s5332_s1 = inlined_call_operand.vmem [shape: f32[128,8], index: 1, kind: input, shape index: {}]   ;;  %s5333_s2 = inlined_call_operand.vmem [shape: f32[1,8], index: 2, kind: input, shape index: {}]   ;;  %s5334_s3 = inlined_call_operand.vmem [shape: f32[2,16,16,8], index: 3, kind: output, shape index: {}]  }
   0x1   :  { %s3727_s14 = smov 0  }
   0x2 LB: > { %s25_s15 = sadd.s32 1, %s3684_s13  ;;  %p3060_p0 = scmp.ge.s32.totalorder %s3688_s14, 1  ;;  %s3688_s14 = sphi %s3727_s14, %s13_s14   ;;  %s3684_s13 = sphi %s3725_s13, %s5336_s13   ;;  %s3680_s12 = sphi %s3723_s12, %s5335_s12  }
   0x3   : > { %p27_p1 = scmp.ge.s32.totalorder %s25_s15, 2  ;;  %p151_p2 = scmp.lt.s32.totalorder %s3688_s14, 3 }
   0x5   : > { %s5338_s15 = smov (%p27_p1, %s25_s15), 0  ;;  %p152_p3 = pnand %p3060_p0, %p151_p2 }
   0x6   : > { %p180_p4 = scmp.lt.s32.totalorder (!%p152_p3), %s3680_s12, 1  ;;  %s3690_s20 = smov (!%p152_p3), 8   ;;  %vm232_vm0 = vcmask (!%p152_p3), 64512   ;;  %vm425_vm1 = vcmask (!%p152_p3), 130112   ;;  %vm618_vm2 = vcmask (!%p152_p3), 195712   ;;  %vm811_vm3 = vcmask (!%p152_p3), 261312  }
   0x7   : > { %155 = sbr.rel (%p152_p3) target bundleno = 1124 (0x464), region = 32  ;;  %s3691_s21 = smov (!%p152_p3), 16   ;;  %vm1004_vm4 = vcmask (!%p152_p3), 326912   ;;  %vm1197_vm5 = vcmask (!%p152_p3), 392512   ;;  %vm1390_vm6 = vcmask (!%p152_p3), 458112   ;;  %vm1585_vm7 = vcmask (!%p152_p3), 523712  }
   0x8   : > { %s3692_s22 = smov (!%p152_p3), 24   ;;  %s3693_s23 = smov (!%p152_p3), 32   ;;  %vm1781_vm8 = vcmask (!%p152_p3), 589312   ;;  %vm1977_vm9 = vcmask (!%p152_p3), 654912   ;;  %vm2173_vm10 = vcmask (!%p152_p3), 720512   ;;  %vm2369_vm11 = vcmask (!%p152_p3), 786112  }
   0x9   : > { %s3694_s24 = smov (!%p152_p3), 40   ;;  %s3695_s25 = smov (!%p152_p3), 48   ;;  %vm2565_vm12 = vcmask (!%p152_p3), 851712   ;;  %vm2598_vm13 = vcmask (!%p152_p3), 1048384  }
   0xa   : > { %s3696_s26 = smov (!%p152_p3), 56   ;;  %s3697_s27 = smov (!%p152_p3), 64  }
   0xb   : > { %s3698_s28 = smov (!%p152_p3), 72   ;;  %s3699_s29 = smov (!%p152_p3), 80  }
   0xc   : > { %s3700_s30 = smov (!%p152_p3), 88   ;;  %s3701_s4 = smov (!%p152_p3), 96  }
   0xe   : > { %s5340_s12 = smov (!%p180_p4, %s3680_s12), 1 }
   0xf   : > { %s3628_s16 = smul.u32 528, %s5340_s12 }
  0x11   : > { %s3747_s19 = scalar_lea.vmem %s5331_s0, %s3628_s16 }
  0x12   : > { %v3098_v0 = vld [vmem:[%s3747_s19 + $0x61] sm:$0xff]  ;;  %v3096_v1 = vld [vmem:[%s3747_s19 + $0x49] sm:$0xff]  ;;  %v3097_v3 = vld [vmem:[%s3747_s19 + $0x51] sm:$0xff] }
  0x13   : > { %333 = vrot.lane.b32.xlu1 %v3098_v0, %s3690_s20  ;;  %329 = vrot.lane.b32.xlu0 %v3096_v1, %s3690_s20  ;;  %v3099_v2 = vld [vmem:[%s3747_s19 + $0x69] sm:$0xff]  ;;  %v3101_v4 = vld [vmem:[%s3747_s19 + $0x81] sm:$0xff] }
  0x14   : > { %v3100_v5 = vld [vmem:[%s3747_s19 + $0x79] sm:$0xff]  ;;  %v3102_v7 = vld [vmem:[%s3747_s19 + $0x91] sm:$0xff]  ;;  %v3104_v9 = vld [vmem:[%s3747_s19 + $0xa9] sm:$0xff] }
  0x15   : > { %v3103_v6 = vld [vmem:[%s3747_s19 + $0x99] sm:$0xff]  ;;  %v3105_v8 = vld [vmem:[%s3747_s19 + $0xb1] sm:$0xff]  ;;  %v3107_v10 = vld [vmem:[%s3747_s19 + $0xc9] sm:$0xff] }
  0x16   : > { %v3106_v11 = vld [vmem:[%s3747_s19 + $0xc1] sm:$0xff]  ;;  %v3108_v15 = vld [vmem:[%s3747_s19 + $0xd9] sm:$0xff]  ;;  %v3065_v17 = vld [vmem:[%s3747_s19 + $0x50] sm:$0xff] }
  0x17   : > { %335 = vrot.lane.b32.xlu1 %v3099_v2, %s3690_s20  ;;  %331 = vrot.lane.b32.xlu0 %v3097_v3, %s3690_s20  ;;  %v3066_v12 = vld [vmem:[%s3747_s19 + $0x60] sm:$0xff]  ;;  %v3064_v13 = vld [vmem:[%s3747_s19 + $0x48] sm:$0xff]  ;;  %234 = vst.msk [vmem:[#allocation2 + $0x8] sm:$0xff] %vm232_vm0, %v3065_v17 }
  0x18   : > { %v3109_v14 = vld [vmem:[%s3747_s19 + $0xe1] sm:$0xff]  ;;  %235 = vst.msk [vmem:[#allocation2 + $0x10] sm:$0xff] %vm232_vm0, %v3066_v12  ;;  %233 = vst.msk [vmem:[#allocation2] sm:$0xff] %vm232_vm0, %v3064_v13  ;;  %v3068_v19 = vld [vmem:[%s3747_s19 + $0x78] sm:$0xff] }
  0x19   : > { %v3067_v16 = vld [vmem:[%s3747_s19 + $0x68] sm:$0xff]  ;;  %v3069_v18 = vld [vmem:[%s3747_s19 + $0x80] sm:$0xff]  ;;  %237 = vst.msk [vmem:[#allocation2 + $0x20] sm:$0xff] %vm232_vm0, %v3068_v19  ;;  %v3071_v20 = vld [vmem:[%s3747_s19 + $0x98] sm:$0xff] }
  0x1a   : > { %236 = vst.msk [vmem:[#allocation2 + $0x18] sm:$0xff] %vm232_vm0, %v3067_v16  ;;  %238 = vst.msk [vmem:[#allocation2 + $0x28] sm:$0xff] %vm232_vm0, %v3069_v18  ;;  %v3111_v21 = vld [vmem:[%s3747_s19 + $0xf9] sm:$0xff]  ;;  %v3110_v22 = vld [vmem:[%s3747_s19 + $0xf1] sm:$0xff] }
  0x1b   : > { %339 = vrot.lane.b32.xlu1 %v3101_v4, %s3690_s20  ;;  %337 = vrot.lane.b32.xlu0 %v3100_v5, %s3690_s20  ;;  %240 = vst.msk [vmem:[#allocation2 + $0x38] sm:$0xff] %vm232_vm0, %v3071_v20  ;;  %v3070_v23 = vld [vmem:[%s3747_s19 + $0x90] sm:$0xff]  ;;  %v3072_v25 = vld [vmem:[%s3747_s19 + $0xa8] sm:$0xff] }
  0x1c   : > { %239 = vst.msk [vmem:[#allocation2 + $0x30] sm:$0xff] %vm232_vm0, %v3070_v23  ;;  %v3073_v24 = vld [vmem:[%s3747_s19 + $0xb0] sm:$0xff]  ;;  %241 = vst.msk [vmem:[#allocation2 + $0x40] sm:$0xff] %vm232_vm0, %v3072_v25  ;;  %v3075_v26 = vld [vmem:[%s3747_s19 + $0xc8] sm:$0xff] }
  0x1d   : > { %242 = vst.msk [vmem:[#allocation2 + $0x48] sm:$0xff] %vm232_vm0, %v3073_v24  ;;  %v3074_v27 = vld [vmem:[%s3747_s19 + $0xc0] sm:$0xff]  ;;  %v3113_v28 = vld [vmem:[%s3747_s19 + $0x111] sm:$0xff]  ;;  %244 = vst.msk [vmem:[#allocation2 + $0x58] sm:$0xff] %vm232_vm0, %v3075_v26 }
  0x1e   : > { %243 = vst.msk [vmem:[#allocation2 + $0x50] sm:$0xff] %vm232_vm0, %v3074_v27  ;;  %v3112_v29 = vld [vmem:[%s3747_s19 + $0x109] sm:$0xff]  ;;  %v3077_v30 = vld [vmem:[%s3747_s19 + $0xe0] sm:$0xff]  ;;  %v3076_v31 = vld [vmem:[%s3747_s19 + $0xd8] sm:$0xff] }
  0x1f   : > { %343 = vrot.lane.b32.xlu1 %v3103_v6, %s3690_s20  ;;  %341 = vrot.lane.b32.xlu0 %v3102_v7, %s3690_s20  ;;  %246 = vst.msk [vmem:[#allocation2 + $0x68] sm:$0xff] %vm232_vm0, %v3077_v30  ;;  %245 = vst.msk [vmem:[#allocation2 + $0x60] sm:$0xff] %vm232_vm0, %v3076_v31  ;;  %v3079_v32 = vld [vmem:[%s3747_s19 + $0xf8] sm:$0xff]  ;;  %v3078_v33 = vld [vmem:[%s3747_s19 + $0xf0] sm:$0xff] }
  0x20   : > { %248 = vst.msk [vmem:[#allocation2 + $0x78] sm:$0xff] %vm232_vm0, %v3079_v32  ;;  %247 = vst.msk [vmem:[#allocation2 + $0x70] sm:$0xff] %vm232_vm0, %v3078_v33  ;;  %v3081_v34 = vld [vmem:[%s3747_s19 + $0x110] sm:$0xff]  ;;  %v3080_v36 = vld [vmem:[%s3747_s19 + $0x108] sm:$0xff] }
  0x21   : > { %v3115_v35 = vld [vmem:[%s3747_s19 + $0x129] sm:$0xff]  ;;  %250 = vst.msk [vmem:[#allocation2 + $0x88] sm:$0xff] %vm232_vm0, %v3081_v34  ;;  %v3114_v37 = vld [vmem:[%s3747_s19 + $0x121] sm:$0xff]  ;;  %249 = vst.msk [vmem:[#allocation2 + $0x80] sm:$0xff] %vm232_vm0, %v3080_v36 }
  0x22   : > { %v3083_v38 = vld [vmem:[%s3747_s19 + $0x128] sm:$0xff]  ;;  %v3082_v39 = vld [vmem:[%s3747_s19 + $0x120] sm:$0xff]  ;;  %v3084_v41 = vld [vmem:[%s3747_s19 + $0x138] sm:$0xff] }
  0x23   : > { %347 = vrot.lane.b32.xlu1 %v3105_v8, %s3690_s20  ;;  %345 = vrot.lane.b32.xlu0 %v3104_v9, %s3690_s20  ;;  %252 = vst.msk [vmem:[#allocation2 + $0x98] sm:$0xff] %vm232_vm0, %v3083_v38  ;;  %251 = vst.msk [vmem:[#allocation2 + $0x90] sm:$0xff] %vm232_vm0, %v3082_v39  ;;  %v3085_v40 = vld [vmem:[%s3747_s19 + $0x140] sm:$0xff]  ;;  %v3087_v42 = vld [vmem:[%s3747_s19 + $0x158] sm:$0xff] }
  0x24   : > { %254 = vst.msk [vmem:[#allocation2 + $0xa8] sm:$0xff] %vm232_vm0, %v3085_v40  ;;  %253 = vst.msk [vmem:[#allocation2 + $0xa0] sm:$0xff] %vm232_vm0, %v3084_v41  ;;  %v3086_v43 = vld [vmem:[%s3747_s19 + $0x150] sm:$0xff]  ;;  %v3117_v44 = vld [vmem:[%s3747_s19 + $0x141] sm:$0xff] }
  0x25   : > { %v3116_v45 = vld [vmem:[%s3747_s19 + $0x139] sm:$0xff]  ;;  %256 = vst.msk [vmem:[#allocation2 + $0xb8] sm:$0xff] %vm232_vm0, %v3087_v42  ;;  %255 = vst.msk [vmem:[#allocation2 + $0xb0] sm:$0xff] %vm232_vm0, %v3086_v43  ;;  %v3089_v46 = vld [vmem:[%s3747_s19 + $0x170] sm:$0xff] }
  0x26   : > { %258 = vst.msk [vmem:[#allocation2 + $0xc8] sm:$0xff] %vm232_vm0, %v3089_v46  ;;  %v3088_v47 = vld [vmem:[%s3747_s19 + $0x168] sm:$0xff]  ;;  %v3090_v49 = vld [vmem:[%s3747_s19 + $0x180] sm:$0xff]  ;;  %v3118_v51 = vld [vmem:[%s3747_s19 + $0x151] sm:$0xff] }
  0x27   : > { %351 = vrot.lane.b32.xlu1 %v3107_v10, %s3690_s20  ;;  %349 = vrot.lane.b32.xlu0 %v3106_v11, %s3690_s20  ;;  %257 = vst.msk [vmem:[#allocation2 + $0xc0] sm:$0xff] %vm232_vm0, %v3088_v47  ;;  %v3091_v48 = vld [vmem:[%s3747_s19 + $0x188] sm:$0xff]  ;;  %v3119_v50 = vld [vmem:[%s3747_s19 + $0x159] sm:$0xff]  ;;  %259 = vst.msk [vmem:[#allocation2 + $0xd0] sm:$0xff] %vm232_vm0, %v3090_v49 }
  0x28   : > { %260 = vst.msk [vmem:[#allocation2 + $0xd8] sm:$0xff] %vm232_vm0, %v3091_v48  ;;  %v3093_v52 = vld [vmem:[%s3747_s19 + $0x1a0] sm:$0xff]  ;;  %v3092_v53 = vld [vmem:[%s3747_s19 + $0x198] sm:$0xff]  ;;  %v3120_v55 = vld [vmem:[%s3747_s19 + $0x169] sm:$0xff] }
  0x29   : > { %262 = vst.msk [vmem:[#allocation2 + $0xe8] sm:$0xff] %vm232_vm0, %v3093_v52  ;;  %261 = vst.msk [vmem:[#allocation2 + $0xe0] sm:$0xff] %vm232_vm0, %v3092_v53  ;;  %v3121_v54 = vld [vmem:[%s3747_s19 + $0x171] sm:$0xff]  ;;  %v3123_v58 = vld [vmem:[%s3747_s19 + $0x189] sm:$0xff] }
  0x2a   : > { %v3095_v56 = vld [vmem:[%s3747_s19 + $0x1b8] sm:$0xff]  ;;  %v3094_v57 = vld [vmem:[%s3747_s19 + $0x1b0] sm:$0xff]  ;;  %v3122_v59 = vld [vmem:[%s3747_s19 + $0x181] sm:$0xff] }
  0x2b   : > { %355 = vrot.lane.b32.xlu1 %v3109_v14, %s3690_s20  ;;  %353 = vrot.lane.b32.xlu0 %v3108_v15, %s3690_s20  ;;  %264 = vst.msk [vmem:[#allocation2 + $0xf8] sm:$0xff] %vm232_vm0, %v3095_v56  ;;  %263 = vst.msk [vmem:[#allocation2 + $0xf0] sm:$0xff] %vm232_vm0, %v3094_v57  ;;  %v3125_v60 = vld [vmem:[%s3747_s19 + $0x1a1] sm:$0xff]  ;;  %v3124_v61 = vld [vmem:[%s3747_s19 + $0x199] sm:$0xff] }
  0x2c   : > { %v3127_v62 = vld [vmem:[%s3747_s19 + $0x1b9] sm:$0xff]  ;;  %v3126_v63 = vld [vmem:[%s3747_s19 + $0x1b1] sm:$0xff]  ;;  %v3130_v3 = vld [vmem:[%s3747_s19 + $0x62] sm:$0xff] }
  0x2d   : > { %v3129_v0 = vld [vmem:[%s3747_s19 + $0x52] sm:$0xff]  ;;  %v3128_v1 = vld [vmem:[%s3747_s19 + $0x4a] sm:$0xff]  ;;  %v3133_v4 = vld [vmem:[%s3747_s19 + $0x82] sm:$0xff] }
  0x2e   : > { %v3131_v2 = vld [vmem:[%s3747_s19 + $0x6a] sm:$0xff]  ;;  %v3132_v5 = vld [vmem:[%s3747_s19 + $0x7a] sm:$0xff]  ;;  %v3134_v7 = vld [vmem:[%s3747_s19 + $0x92] sm:$0xff] }
  0x2f   : > { %359 = vrot.lane.b32.xlu1 %v3111_v21, %s3690_s20  ;;  %357 = vrot.lane.b32.xlu0 %v3110_v22, %s3690_s20  ;;  %v3135_v6 = vld [vmem:[%s3747_s19 + $0x9a] sm:$0xff]  ;;  %v3137_v8 = vld [vmem:[%s3747_s19 + $0xb2] sm:$0xff] }
  0x30   : > { %v3136_v9 = vld [vmem:[%s3747_s19 + $0xaa] sm:$0xff]  ;;  %v3138_v11 = vld [vmem:[%s3747_s19 + $0xc2] sm:$0xff]  ;;  %v3140_v13 = vld [vmem:[%s3747_s19 + $0xda] sm:$0xff] }
  0x31   : > { %v3139_v10 = vld [vmem:[%s3747_s19 + $0xca] sm:$0xff]  ;;  %v3141_v12 = vld [vmem:[%s3747_s19 + $0xe2] sm:$0xff]  ;;  %v3143_v14 = vld [vmem:[%s3747_s19 + $0xfa] sm:$0xff] }
  0x32   : > { %v3142_v15 = vld [vmem:[%s3747_s19 + $0xf2] sm:$0xff]  ;;  %v3144_v17 = vld [vmem:[%s3747_s19 + $0x10a] sm:$0xff]  ;;  %v3146_v19 = vld [vmem:[%s3747_s19 + $0x122] sm:$0xff] }
  0x33   : > { %363 = vrot.lane.b32.xlu1 %v3113_v28, %s3690_s20  ;;  %361 = vrot.lane.b32.xlu0 %v3112_v29, %s3690_s20  ;;  %v3145_v16 = vld [vmem:[%s3747_s19 + $0x112] sm:$0xff]  ;;  %v3147_v18 = vld [vmem:[%s3747_s19 + $0x12a] sm:$0xff] }
  0x34   : > { %v3149_v20 = vld [vmem:[%s3747_s19 + $0x142] sm:$0xff]  ;;  %v3148_v21 = vld [vmem:[%s3747_s19 + $0x13a] sm:$0xff]  ;;  %v3150_v23 = vld [vmem:[%s3747_s19 + $0x152] sm:$0xff] }
  0x35   : > { %v3151_v22 = vld [vmem:[%s3747_s19 + $0x15a] sm:$0xff]  ;;  %v3153_v24 = vld [vmem:[%s3747_s19 + $0x172] sm:$0xff]  ;;  %v3152_v25 = vld [vmem:[%s3747_s19 + $0x16a] sm:$0xff] }
  0x36   : > { %v3155_v26 = vld [vmem:[%s3747_s19 + $0x18a] sm:$0xff]  ;;  %v3154_v27 = vld [vmem:[%s3747_s19 + $0x182] sm:$0xff]  ;;  %v3156_v31 = vld [vmem:[%s3747_s19 + $0x19a] sm:$0xff] }
  0x37   : > { %367 = vrot.lane.b32.xlu1 %v3115_v35, %s3690_s20  ;;  %365 = vrot.lane.b32.xlu0 %v3114_v37, %s3690_s20  ;;  %v3157_v30 = vld [vmem:[%s3747_s19 + $0x1a2] sm:$0xff]  ;;  %v3159_v34 = vld [vmem:[%s3747_s19 + $0x1ba] sm:$0xff] }
  0x38   : > { %v3158_v35 = vld [vmem:[%s3747_s19 + $0x1b2] sm:$0xff]  ;;  %v3162_v43 = vld [vmem:[%s3747_s19 + $0x63] sm:$0xff]  ;;  %v3164_v47 = vld [vmem:[%s3747_s19 + $0x7b] sm:$0xff] }
  0x39   : > { %v3161_v38 = vld [vmem:[%s3747_s19 + $0x53] sm:$0xff]  ;;  %v3160_v39 = vld [vmem:[%s3747_s19 + $0x4b] sm:$0xff]  ;;  %v3165_v46 = vld [vmem:[%s3747_s19 + $0x83] sm:$0xff] }
  0x3a   : > { %v3163_v42 = vld [vmem:[%s3747_s19 + $0x6b] sm:$0xff] }
  0x3b   : > { %371 = vrot.lane.b32.xlu1 %v3117_v44, %s3690_s20  ;;  %369 = vrot.lane.b32.xlu0 %v3116_v45, %s3690_s20 }
  0x3f   : > { %375 = vrot.lane.b32.xlu1 %v3119_v50, %s3690_s20  ;;  %373 = vrot.lane.b32.xlu0 %v3118_v51, %s3690_s20  ;;  %v3167_v50 = vld [vmem:[%s3747_s19 + $0x9b] sm:$0xff]  ;;  %v3166_v51 = vld [vmem:[%s3747_s19 + $0x93] sm:$0xff] }
  0x43   : > { %379 = vrot.lane.b32.xlu1 %v3121_v54, %s3690_s20  ;;  %377 = vrot.lane.b32.xlu0 %v3120_v55, %s3690_s20  ;;  %v3169_v54 = vld [vmem:[%s3747_s19 + $0xb3] sm:$0xff]  ;;  %v3168_v55 = vld [vmem:[%s3747_s19 + $0xab] sm:$0xff] }
  0x47   : > { %383 = vrot.lane.b32.xlu1 %v3123_v58, %s3690_s20  ;;  %381 = vrot.lane.b32.xlu0 %v3122_v59, %s3690_s20  ;;  %v3171_v58 = vld [vmem:[%s3747_s19 + $0xcb] sm:$0xff]  ;;  %v3170_v59 = vld [vmem:[%s3747_s19 + $0xc3] sm:$0xff] }
  0x4b   : > { %387 = vrot.lane.b32.xlu1 %v3125_v60, %s3690_s20  ;;  %385 = vrot.lane.b32.xlu0 %v3124_v61, %s3690_s20 }
  0x4f   : > { %391 = vrot.lane.b32.xlu1 %v3127_v62, %s3690_s20  ;;  %389 = vrot.lane.b32.xlu0 %v3126_v63, %s3690_s20  ;;  %v3173_v62 = vld [vmem:[%s3747_s19 + $0xe3] sm:$0xff]  ;;  %v3172_v63 = vld [vmem:[%s3747_s19 + $0xdb] sm:$0xff] }
  0x53   : > { %524 = vrot.lane.b32.xlu1 %v3129_v0, %s3691_s21  ;;  %522 = vrot.lane.b32.xlu0 %v3128_v1, %s3691_s21 }
  0x57   : > { %528 = vrot.lane.b32.xlu1 %v3131_v2, %s3691_s21  ;;  %526 = vrot.lane.b32.xlu0 %v3130_v3, %s3691_s21  ;;  %v3175_v2 = vld [vmem:[%s3747_s19 + $0xfb] sm:$0xff]  ;;  %v3174_v3 = vld [vmem:[%s3747_s19 + $0xf3] sm:$0xff] }
  0x5b   : > { %532 = vrot.lane.b32.xlu1 %v3133_v4, %s3691_s21  ;;  %530 = vrot.lane.b32.xlu0 %v3132_v5, %s3691_s21 }
  0x5f   : > { %536 = vrot.lane.b32.xlu1 %v3135_v6, %s3691_s21  ;;  %534 = vrot.lane.b32.xlu0 %v3134_v7, %s3691_s21  ;;  %v3177_v6 = vld [vmem:[%s3747_s19 + $0x113] sm:$0xff]  ;;  %v3176_v7 = vld [vmem:[%s3747_s19 + $0x10b] sm:$0xff] }
  0x63   : > { %540 = vrot.lane.b32.xlu1 %v3137_v8, %s3691_s21  ;;  %538 = vrot.lane.b32.xlu0 %v3136_v9, %s3691_s21 }
  0x67   : > { %544 = vrot.lane.b32.xlu1 %v3139_v10, %s3691_s21  ;;  %542 = vrot.lane.b32.xlu0 %v3138_v11, %s3691_s21  ;;  %v3179_v10 = vld [vmem:[%s3747_s19 + $0x12b] sm:$0xff]  ;;  %v3178_v11 = vld [vmem:[%s3747_s19 + $0x123] sm:$0xff] }
  0x6b   : > { %548 = vrot.lane.b32.xlu1 %v3141_v12, %s3691_s21  ;;  %546 = vrot.lane.b32.xlu0 %v3140_v13, %s3691_s21 }
  0x6f   : > { %552 = vrot.lane.b32.xlu1 %v3143_v14, %s3691_s21  ;;  %550 = vrot.lane.b32.xlu0 %v3142_v15, %s3691_s21  ;;  %v3181_v14 = vld [vmem:[%s3747_s19 + $0x143] sm:$0xff]  ;;  %v3180_v15 = vld [vmem:[%s3747_s19 + $0x13b] sm:$0xff] }
  0x73   : > { %556 = vrot.lane.b32.xlu1 %v3145_v16, %s3691_s21  ;;  %554 = vrot.lane.b32.xlu0 %v3144_v17, %s3691_s21 }
  0x77   : > { %560 = vrot.lane.b32.xlu1 %v3147_v18, %s3691_s21  ;;  %558 = vrot.lane.b32.xlu0 %v3146_v19, %s3691_s21  ;;  %v3183_v18 = vld [vmem:[%s3747_s19 + $0x15b] sm:$0xff]  ;;  %v3182_v19 = vld [vmem:[%s3747_s19 + $0x153] sm:$0xff] }
  0x7b   : > { %564 = vrot.lane.b32.xlu1 %v3149_v20, %s3691_s21  ;;  %562 = vrot.lane.b32.xlu0 %v3148_v21, %s3691_s21 }
  0x7f   : > { %568 = vrot.lane.b32.xlu1 %v3151_v22, %s3691_s21  ;;  %566 = vrot.lane.b32.xlu0 %v3150_v23, %s3691_s21  ;;  %v3185_v22 = vld [vmem:[%s3747_s19 + $0x173] sm:$0xff]  ;;  %v3184_v23 = vld [vmem:[%s3747_s19 + $0x16b] sm:$0xff] }
  0x83   : > { %572 = vrot.lane.b32.xlu1 %v3153_v24, %s3691_s21  ;;  %570 = vrot.lane.b32.xlu0 %v3152_v25, %s3691_s21 }
  0x85   : > { %v334_v28 = vpop.permute.xlu1 %333  ;;  %v330_v29 = vpop.permute.xlu0 %329 }
  0x86   : > { %428 = vst.msk [vmem:[#allocation2 + $0x10] sm:$0xff] %vm425_vm1, %v334_v28  ;;  %426 = vst.msk [vmem:[#allocation2] sm:$0xff] %vm425_vm1, %v330_v29 }
  0x87   : > { %576 = vrot.lane.b32.xlu1 %v3155_v26, %s3691_s21  ;;  %574 = vrot.lane.b32.xlu0 %v3154_v27, %s3691_s21  ;;  %v3187_v26 = vld [vmem:[%s3747_s19 + $0x18b] sm:$0xff]  ;;  %v3186_v27 = vld [vmem:[%s3747_s19 + $0x183] sm:$0xff] }
  0x89   : > { %v336_v32 = vpop.permute.xlu1 %335  ;;  %v332_v33 = vpop.permute.xlu0 %331 }
  0x8a   : > { %429 = vst.msk [vmem:[#allocation2 + $0x18] sm:$0xff] %vm425_vm1, %v336_v32  ;;  %427 = vst.msk [vmem:[#allocation2 + $0x8] sm:$0xff] %vm425_vm1, %v332_v33 }
  0x8b   : > { %580 = vrot.lane.b32.xlu1 %v3157_v30, %s3691_s21  ;;  %578 = vrot.lane.b32.xlu0 %v3156_v31, %s3691_s21  ;;  %v3189_v30 = vld [vmem:[%s3747_s19 + $0x1a3] sm:$0xff]  ;;  %v3188_v31 = vld [vmem:[%s3747_s19 + $0x19b] sm:$0xff] }
  0x8d   : > { %v340_v36 = vpop.permute.xlu1 %339  ;;  %v338_v37 = vpop.permute.xlu0 %337 }
  0x8e   : > { %431 = vst.msk [vmem:[#allocation2 + $0x28] sm:$0xff] %vm425_vm1, %v340_v36  ;;  %430 = vst.msk [vmem:[#allocation2 + $0x20] sm:$0xff] %vm425_vm1, %v338_v37 }
  0x8f   : > { %584 = vrot.lane.b32.xlu1 %v3159_v34, %s3691_s21  ;;  %582 = vrot.lane.b32.xlu0 %v3158_v35, %s3691_s21  ;;  %v3191_v34 = vld [vmem:[%s3747_s19 + $0x1bb] sm:$0xff]  ;;  %v3190_v35 = vld [vmem:[%s3747_s19 + $0x1b3] sm:$0xff] }
  0x91   : > { %v344_v40 = vpop.permute.xlu1 %343  ;;  %v342_v41 = vpop.permute.xlu0 %341 }
  0x92   : > { %433 = vst.msk [vmem:[#allocation2 + $0x38] sm:$0xff] %vm425_vm1, %v344_v40  ;;  %432 = vst.msk [vmem:[#allocation2 + $0x30] sm:$0xff] %vm425_vm1, %v342_v41 }
  0x93   : > { %717 = vrot.lane.b32.xlu1 %v3161_v38, %s3692_s22  ;;  %715 = vrot.lane.b32.xlu0 %v3160_v39, %s3692_s22  ;;  %v3193_v38 = vld [vmem:[%s3747_s19 + $0x54] sm:$0xff]  ;;  %v3192_v39 = vld [vmem:[%s3747_s19 + $0x4c] sm:$0xff] }
  0x95   : > { %v348_v44 = vpop.permute.xlu1 %347  ;;  %v346_v45 = vpop.permute.xlu0 %345 }
  0x96   : > { %435 = vst.msk [vmem:[#allocation2 + $0x48] sm:$0xff] %vm425_vm1, %v348_v44  ;;  %434 = vst.msk [vmem:[#allocation2 + $0x40] sm:$0xff] %vm425_vm1, %v346_v45 }
  0x97   : > { %721 = vrot.lane.b32.xlu1 %v3163_v42, %s3692_s22  ;;  %719 = vrot.lane.b32.xlu0 %v3162_v43, %s3692_s22  ;;  %v3195_v42 = vld [vmem:[%s3747_s19 + $0x6c] sm:$0xff]  ;;  %v3194_v43 = vld [vmem:[%s3747_s19 + $0x64] sm:$0xff] }
  0x99   : > { %v352_v48 = vpop.permute.xlu1 %351  ;;  %v350_v49 = vpop.permute.xlu0 %349 }
  0x9a   : > { %437 = vst.msk [vmem:[#allocation2 + $0x58] sm:$0xff] %vm425_vm1, %v352_v48  ;;  %436 = vst.msk [vmem:[#allocation2 + $0x50] sm:$0xff] %vm425_vm1, %v350_v49 }
  0x9b   : > { %725 = vrot.lane.b32.xlu1 %v3165_v46, %s3692_s22  ;;  %723 = vrot.lane.b32.xlu0 %v3164_v47, %s3692_s22  ;;  %v3197_v46 = vld [vmem:[%s3747_s19 + $0x84] sm:$0xff]  ;;  %v3196_v47 = vld [vmem:[%s3747_s19 + $0x7c] sm:$0xff] }
  0x9d   : > { %v356_v52 = vpop.permute.xlu1 %355  ;;  %v354_v53 = vpop.permute.xlu0 %353 }
  0x9e   : > { %439 = vst.msk [vmem:[#allocation2 + $0x68] sm:$0xff] %vm425_vm1, %v356_v52  ;;  %438 = vst.msk [vmem:[#allocation2 + $0x60] sm:$0xff] %vm425_vm1, %v354_v53 }
  0x9f   : > { %729 = vrot.lane.b32.xlu1 %v3167_v50, %s3692_s22  ;;  %727 = vrot.lane.b32.xlu0 %v3166_v51, %s3692_s22  ;;  %v3199_v50 = vld [vmem:[%s3747_s19 + $0x9c] sm:$0xff]  ;;  %v3198_v51 = vld [vmem:[%s3747_s19 + $0x94] sm:$0xff] }
  0xa1   : > { %v360_v56 = vpop.permute.xlu1 %359  ;;  %v358_v57 = vpop.permute.xlu0 %357 }
  0xa2   : > { %441 = vst.msk [vmem:[#allocation2 + $0x78] sm:$0xff] %vm425_vm1, %v360_v56  ;;  %440 = vst.msk [vmem:[#allocation2 + $0x70] sm:$0xff] %vm425_vm1, %v358_v57 }
  0xa3   : > { %733 = vrot.lane.b32.xlu1 %v3169_v54, %s3692_s22  ;;  %731 = vrot.lane.b32.xlu0 %v3168_v55, %s3692_s22  ;;  %v3201_v54 = vld [vmem:[%s3747_s19 + $0xb4] sm:$0xff]  ;;  %v3200_v55 = vld [vmem:[%s3747_s19 + $0xac] sm:$0xff] }
  0xa5   : > { %v364_v60 = vpop.permute.xlu1 %363  ;;  %v362_v61 = vpop.permute.xlu0 %361 }
  0xa6   : > { %443 = vst.msk [vmem:[#allocation2 + $0x88] sm:$0xff] %vm425_vm1, %v364_v60  ;;  %442 = vst.msk [vmem:[#allocation2 + $0x80] sm:$0xff] %vm425_vm1, %v362_v61 }
  0xa7   : > { %737 = vrot.lane.b32.xlu1 %v3171_v58, %s3692_s22  ;;  %735 = vrot.lane.b32.xlu0 %v3170_v59, %s3692_s22  ;;  %v3203_v58 = vld [vmem:[%s3747_s19 + $0xcc] sm:$0xff]  ;;  %v3202_v59 = vld [vmem:[%s3747_s19 + $0xc4] sm:$0xff] }
  0xa9   : > { %v368_v0 = vpop.permute.xlu1 %367  ;;  %v366_v1 = vpop.permute.xlu0 %365 }
  0xaa   : > { %445 = vst.msk [vmem:[#allocation2 + $0x98] sm:$0xff] %vm425_vm1, %v368_v0  ;;  %444 = vst.msk [vmem:[#allocation2 + $0x90] sm:$0xff] %vm425_vm1, %v366_v1 }
  0xab   : > { %741 = vrot.lane.b32.xlu1 %v3173_v62, %s3692_s22  ;;  %739 = vrot.lane.b32.xlu0 %v3172_v63, %s3692_s22  ;;  %v3205_v62 = vld [vmem:[%s3747_s19 + $0xe4] sm:$0xff]  ;;  %v3204_v63 = vld [vmem:[%s3747_s19 + $0xdc] sm:$0xff] }
  0xad   : > { %v372_v4 = vpop.permute.xlu1 %371  ;;  %v370_v5 = vpop.permute.xlu0 %369 }
  0xae   : > { %447 = vst.msk [vmem:[#allocation2 + $0xa8] sm:$0xff] %vm425_vm1, %v372_v4  ;;  %446 = vst.msk [vmem:[#allocation2 + $0xa0] sm:$0xff] %vm425_vm1, %v370_v5 }
  0xaf   : > { %745 = vrot.lane.b32.xlu1 %v3175_v2, %s3692_s22  ;;  %743 = vrot.lane.b32.xlu0 %v3174_v3, %s3692_s22  ;;  %v3207_v2 = vld [vmem:[%s3747_s19 + $0xfc] sm:$0xff]  ;;  %v3206_v3 = vld [vmem:[%s3747_s19 + $0xf4] sm:$0xff] }
  0xb1   : > { %v376_v8 = vpop.permute.xlu1 %375  ;;  %v374_v9 = vpop.permute.xlu0 %373 }
  0xb2   : > { %449 = vst.msk [vmem:[#allocation2 + $0xb8] sm:$0xff] %vm425_vm1, %v376_v8  ;;  %448 = vst.msk [vmem:[#allocation2 + $0xb0] sm:$0xff] %vm425_vm1, %v374_v9 }
  0xb3   : > { %749 = vrot.lane.b32.xlu1 %v3177_v6, %s3692_s22  ;;  %747 = vrot.lane.b32.xlu0 %v3176_v7, %s3692_s22  ;;  %v3209_v6 = vld [vmem:[%s3747_s19 + $0x114] sm:$0xff]  ;;  %v3208_v7 = vld [vmem:[%s3747_s19 + $0x10c] sm:$0xff] }
  0xb5   : > { %v380_v12 = vpop.permute.xlu1 %379  ;;  %v378_v13 = vpop.permute.xlu0 %377 }
  0xb6   : > { %451 = vst.msk [vmem:[#allocation2 + $0xc8] sm:$0xff] %vm425_vm1, %v380_v12  ;;  %450 = vst.msk [vmem:[#allocation2 + $0xc0] sm:$0xff] %vm425_vm1, %v378_v13 }
  0xb7   : > { %753 = vrot.lane.b32.xlu1 %v3179_v10, %s3692_s22  ;;  %751 = vrot.lane.b32.xlu0 %v3178_v11, %s3692_s22  ;;  %v3211_v10 = vld [vmem:[%s3747_s19 + $0x12c] sm:$0xff]  ;;  %v3210_v11 = vld [vmem:[%s3747_s19 + $0x124] sm:$0xff] }
  0xb9   : > { %v384_v16 = vpop.permute.xlu1 %383  ;;  %v382_v17 = vpop.permute.xlu0 %381 }
  0xba   : > { %453 = vst.msk [vmem:[#allocation2 + $0xd8] sm:$0xff] %vm425_vm1, %v384_v16  ;;  %452 = vst.msk [vmem:[#allocation2 + $0xd0] sm:$0xff] %vm425_vm1, %v382_v17 }
  0xbb   : > { %757 = vrot.lane.b32.xlu1 %v3181_v14, %s3692_s22  ;;  %755 = vrot.lane.b32.xlu0 %v3180_v15, %s3692_s22  ;;  %v3213_v14 = vld [vmem:[%s3747_s19 + $0x144] sm:$0xff]  ;;  %v3212_v15 = vld [vmem:[%s3747_s19 + $0x13c] sm:$0xff] }
  0xbd   : > { %v388_v20 = vpop.permute.xlu1 %387  ;;  %v386_v21 = vpop.permute.xlu0 %385 }
  0xbe   : > { %455 = vst.msk [vmem:[#allocation2 + $0xe8] sm:$0xff] %vm425_vm1, %v388_v20  ;;  %454 = vst.msk [vmem:[#allocation2 + $0xe0] sm:$0xff] %vm425_vm1, %v386_v21 }
  0xbf   : > { %761 = vrot.lane.b32.xlu1 %v3183_v18, %s3692_s22  ;;  %759 = vrot.lane.b32.xlu0 %v3182_v19, %s3692_s22  ;;  %v3215_v18 = vld [vmem:[%s3747_s19 + $0x15c] sm:$0xff]  ;;  %v3214_v19 = vld [vmem:[%s3747_s19 + $0x154] sm:$0xff] }
  0xc1   : > { %v392_v24 = vpop.permute.xlu1 %391  ;;  %v390_v25 = vpop.permute.xlu0 %389 }
  0xc2   : > { %457 = vst.msk [vmem:[#allocation2 + $0xf8] sm:$0xff] %vm425_vm1, %v392_v24  ;;  %456 = vst.msk [vmem:[#allocation2 + $0xf0] sm:$0xff] %vm425_vm1, %v390_v25 }
  0xc3   : > { %765 = vrot.lane.b32.xlu1 %v3185_v22, %s3692_s22  ;;  %763 = vrot.lane.b32.xlu0 %v3184_v23, %s3692_s22  ;;  %v3217_v22 = vld [vmem:[%s3747_s19 + $0x174] sm:$0xff]  ;;  %v3216_v23 = vld [vmem:[%s3747_s19 + $0x16c] sm:$0xff] }
  0xc5   : > { %v525_v28 = vpop.permute.xlu1 %524  ;;  %v523_v29 = vpop.permute.xlu0 %522 }
  0xc6   : > { %620 = vst.msk [vmem:[#allocation2 + $0x8] sm:$0xff] %vm618_vm2, %v525_v28  ;;  %619 = vst.msk [vmem:[#allocation2] sm:$0xff] %vm618_vm2, %v523_v29 }
  0xc7   : > { %769 = vrot.lane.b32.xlu1 %v3187_v26, %s3692_s22  ;;  %767 = vrot.lane.b32.xlu0 %v3186_v27, %s3692_s22  ;;  %v3219_v26 = vld [vmem:[%s3747_s19 + $0x18c] sm:$0xff]  ;;  %v3218_v27 = vld [vmem:[%s3747_s19 + $0x184] sm:$0xff] }
  0xc9   : > { %v529_v32 = vpop.permute.xlu1 %528  ;;  %v527_v33 = vpop.permute.xlu0 %526 }
  0xca   : > { %622 = vst.msk [vmem:[#allocation2 + $0x18] sm:$0xff] %vm618_vm2, %v529_v32  ;;  %621 = vst.msk [vmem:[#allocation2 + $0x10] sm:$0xff] %vm618_vm2, %v527_v33 }
  0xcb   : > { %773 = vrot.lane.b32.xlu1 %v3189_v30, %s3692_s22  ;;  %771 = vrot.lane.b32.xlu0 %v3188_v31, %s3692_s22  ;;  %v3221_v30 = vld [vmem:[%s3747_s19 + $0x1a4] sm:$0xff]  ;;  %v3220_v31 = vld [vmem:[%s3747_s19 + $0x19c] sm:$0xff] }
  0xcd   : > { %v533_v36 = vpop.permute.xlu1 %532  ;;  %v531_v37 = vpop.permute.xlu0 %530 }
  0xce   : > { %624 = vst.msk [vmem:[#allocation2 + $0x28] sm:$0xff] %vm618_vm2, %v533_v36  ;;  %623 = vst.msk [vmem:[#allocation2 + $0x20] sm:$0xff] %vm618_vm2, %v531_v37 }
  0xcf   : > { %777 = vrot.lane.b32.xlu1 %v3191_v34, %s3692_s22  ;;  %775 = vrot.lane.b32.xlu0 %v3190_v35, %s3692_s22  ;;  %v3223_v34 = vld [vmem:[%s3747_s19 + $0x1bc] sm:$0xff]  ;;  %v3222_v35 = vld [vmem:[%s3747_s19 + $0x1b4] sm:$0xff] }
  0xd1   : > { %v537_v40 = vpop.permute.xlu1 %536  ;;  %v535_v41 = vpop.permute.xlu0 %534 }
  0xd2   : > { %626 = vst.msk [vmem:[#allocation2 + $0x38] sm:$0xff] %vm618_vm2, %v537_v40  ;;  %625 = vst.msk [vmem:[#allocation2 + $0x30] sm:$0xff] %vm618_vm2, %v535_v41 }
  0xd3   : > { %910 = vrot.lane.b32.xlu1 %v3193_v38, %s3693_s23  ;;  %908 = vrot.lane.b32.xlu0 %v3192_v39, %s3693_s23  ;;  %v3225_v38 = vld [vmem:[%s3747_s19 + $0x55] sm:$0xff]  ;;  %v3224_v39 = vld [vmem:[%s3747_s19 + $0x4d] sm:$0xff] }
  0xd5   : > { %v541_v44 = vpop.permute.xlu1 %540  ;;  %v539_v45 = vpop.permute.xlu0 %538 }
  0xd6   : > { %628 = vst.msk [vmem:[#allocation2 + $0x48] sm:$0xff] %vm618_vm2, %v541_v44  ;;  %627 = vst.msk [vmem:[#allocation2 + $0x40] sm:$0xff] %vm618_vm2, %v539_v45 }
  0xd7   : > { %914 = vrot.lane.b32.xlu1 %v3195_v42, %s3693_s23  ;;  %912 = vrot.lane.b32.xlu0 %v3194_v43, %s3693_s23  ;;  %v3227_v42 = vld [vmem:[%s3747_s19 + $0x6d] sm:$0xff]  ;;  %v3226_v43 = vld [vmem:[%s3747_s19 + $0x65] sm:$0xff] }
  0xd9   : > { %v545_v48 = vpop.permute.xlu1 %544  ;;  %v543_v49 = vpop.permute.xlu0 %542 }
  0xda   : > { %630 = vst.msk [vmem:[#allocation2 + $0x58] sm:$0xff] %vm618_vm2, %v545_v48  ;;  %629 = vst.msk [vmem:[#allocation2 + $0x50] sm:$0xff] %vm618_vm2, %v543_v49 }
  0xdb   : > { %918 = vrot.lane.b32.xlu1 %v3197_v46, %s3693_s23  ;;  %916 = vrot.lane.b32.xlu0 %v3196_v47, %s3693_s23  ;;  %v3229_v46 = vld [vmem:[%s3747_s19 + $0x85] sm:$0xff]  ;;  %v3228_v47 = vld [vmem:[%s3747_s19 + $0x7d] sm:$0xff] }
  0xdd   : > { %v549_v52 = vpop.permute.xlu1 %548  ;;  %v547_v53 = vpop.permute.xlu0 %546 }
  0xde   : > { %632 = vst.msk [vmem:[#allocation2 + $0x68] sm:$0xff] %vm618_vm2, %v549_v52  ;;  %631 = vst.msk [vmem:[#allocation2 + $0x60] sm:$0xff] %vm618_vm2, %v547_v53 }
  0xdf   : > { %922 = vrot.lane.b32.xlu1 %v3199_v50, %s3693_s23  ;;  %920 = vrot.lane.b32.xlu0 %v3198_v51, %s3693_s23  ;;  %v3231_v50 = vld [vmem:[%s3747_s19 + $0x9d] sm:$0xff]  ;;  %v3230_v51 = vld [vmem:[%s3747_s19 + $0x95] sm:$0xff] }
  0xe1   : > { %v553_v56 = vpop.permute.xlu1 %552  ;;  %v551_v57 = vpop.permute.xlu0 %550 }
  0xe2   : > { %634 = vst.msk [vmem:[#allocation2 + $0x78] sm:$0xff] %vm618_vm2, %v553_v56  ;;  %633 = vst.msk [vmem:[#allocation2 + $0x70] sm:$0xff] %vm618_vm2, %v551_v57 }
  0xe3   : > { %926 = vrot.lane.b32.xlu1 %v3201_v54, %s3693_s23  ;;  %924 = vrot.lane.b32.xlu0 %v3200_v55, %s3693_s23  ;;  %v3233_v54 = vld [vmem:[%s3747_s19 + $0xb5] sm:$0xff]  ;;  %v3232_v55 = vld [vmem:[%s3747_s19 + $0xad] sm:$0xff] }
  0xe5   : > { %v557_v60 = vpop.permute.xlu1 %556  ;;  %v555_v61 = vpop.permute.xlu0 %554 }
  0xe6   : > { %636 = vst.msk [vmem:[#allocation2 + $0x88] sm:$0xff] %vm618_vm2, %v557_v60  ;;  %635 = vst.msk [vmem:[#allocation2 + $0x80] sm:$0xff] %vm618_vm2, %v555_v61 }
  0xe7   : > { %930 = vrot.lane.b32.xlu1 %v3203_v58, %s3693_s23  ;;  %928 = vrot.lane.b32.xlu0 %v3202_v59, %s3693_s23  ;;  %v3235_v58 = vld [vmem:[%s3747_s19 + $0xcd] sm:$0xff]  ;;  %v3234_v59 = vld [vmem:[%s3747_s19 + $0xc5] sm:$0xff] }
  0xe9   : > { %v561_v0 = vpop.permute.xlu1 %560  ;;  %v559_v1 = vpop.permute.xlu0 %558 }
  0xea   : > { %638 = vst.msk [vmem:[#allocation2 + $0x98] sm:$0xff] %vm618_vm2, %v561_v0  ;;  %637 = vst.msk [vmem:[#allocation2 + $0x90] sm:$0xff] %vm618_vm2, %v559_v1 }
  0xeb   : > { %934 = vrot.lane.b32.xlu1 %v3205_v62, %s3693_s23  ;;  %932 = vrot.lane.b32.xlu0 %v3204_v63, %s3693_s23  ;;  %v3237_v62 = vld [vmem:[%s3747_s19 + $0xe5] sm:$0xff]  ;;  %v3236_v63 = vld [vmem:[%s3747_s19 + $0xdd] sm:$0xff] }
  0xed   : > { %v565_v4 = vpop.permute.xlu1 %564  ;;  %v563_v5 = vpop.permute.xlu0 %562 }
  0xee   : > { %640 = vst.msk [vmem:[#allocation2 + $0xa8] sm:$0xff] %vm618_vm2, %v565_v4  ;;  %639 = vst.msk [vmem:[#allocation2 + $0xa0] sm:$0xff] %vm618_vm2, %v563_v5 }
  0xef   : > { %938 = vrot.lane.b32.xlu1 %v3207_v2, %s3693_s23  ;;  %936 = vrot.lane.b32.xlu0 %v3206_v3, %s3693_s23  ;;  %v3239_v2 = vld [vmem:[%s3747_s19 + $0xfd] sm:$0xff]  ;;  %v3238_v3 = vld [vmem:[%s3747_s19 + $0xf5] sm:$0xff] }
  0xf1   : > { %v569_v8 = vpop.permute.xlu1 %568  ;;  %v567_v9 = vpop.permute.xlu0 %566 }
  0xf2   : > { %642 = vst.msk [vmem:[#allocation2 + $0xb8] sm:$0xff] %vm618_vm2, %v569_v8  ;;  %641 = vst.msk [vmem:[#allocation2 + $0xb0] sm:$0xff] %vm618_vm2, %v567_v9 }
  0xf3   : > { %942 = vrot.lane.b32.xlu1 %v3209_v6, %s3693_s23  ;;  %940 = vrot.lane.b32.xlu0 %v3208_v7, %s3693_s23  ;;  %v3241_v6 = vld [vmem:[%s3747_s19 + $0x115] sm:$0xff]  ;;  %v3240_v7 = vld [vmem:[%s3747_s19 + $0x10d] sm:$0xff] }
  0xf5   : > { %v573_v12 = vpop.permute.xlu1 %572  ;;  %v571_v13 = vpop.permute.xlu0 %570 }
  0xf6   : > { %644 = vst.msk [vmem:[#allocation2 + $0xc8] sm:$0xff] %vm618_vm2, %v573_v12  ;;  %643 = vst.msk [vmem:[#allocation2 + $0xc0] sm:$0xff] %vm618_vm2, %v571_v13 }
  0xf7   : > { %946 = vrot.lane.b32.xlu1 %v3211_v10, %s3693_s23  ;;  %944 = vrot.lane.b32.xlu0 %v3210_v11, %s3693_s23  ;;  %v3243_v10 = vld [vmem:[%s3747_s19 + $0x12d] sm:$0xff]  ;;  %v3242_v11 = vld [vmem:[%s3747_s19 + $0x125] sm:$0xff] }
  0xf9   : > { %v577_v16 = vpop.permute.xlu1 %576  ;;  %v575_v17 = vpop.permute.xlu0 %574 }
  0xfa   : > { %646 = vst.msk [vmem:[#allocation2 + $0xd8] sm:$0xff] %vm618_vm2, %v577_v16  ;;  %645 = vst.msk [vmem:[#allocation2 + $0xd0] sm:$0xff] %vm618_vm2, %v575_v17 }
  0xfb   : > { %950 = vrot.lane.b32.xlu1 %v3213_v14, %s3693_s23  ;;  %948 = vrot.lane.b32.xlu0 %v3212_v15, %s3693_s23  ;;  %v3245_v14 = vld [vmem:[%s3747_s19 + $0x145] sm:$0xff]  ;;  %v3244_v15 = vld [vmem:[%s3747_s19 + $0x13d] sm:$0xff] }
  0xfd   : > { %v581_v20 = vpop.permute.xlu1 %580  ;;  %v579_v21 = vpop.permute.xlu0 %578 }
  0xfe   : > { %648 = vst.msk [vmem:[#allocation2 + $0xe8] sm:$0xff] %vm618_vm2, %v581_v20  ;;  %647 = vst.msk [vmem:[#allocation2 + $0xe0] sm:$0xff] %vm618_vm2, %v579_v21 }
  0xff   : > { %954 = vrot.lane.b32.xlu1 %v3215_v18, %s3693_s23  ;;  %952 = vrot.lane.b32.xlu0 %v3214_v19, %s3693_s23  ;;  %v3247_v18 = vld [vmem:[%s3747_s19 + $0x15d] sm:$0xff]  ;;  %v3246_v19 = vld [vmem:[%s3747_s19 + $0x155] sm:$0xff] }
 0x101   : > { %v585_v24 = vpop.permute.xlu1 %584  ;;  %v583_v25 = vpop.permute.xlu0 %582 }
 0x102   : > { %650 = vst.msk [vmem:[#allocation2 + $0xf8] sm:$0xff] %vm618_vm2, %v585_v24  ;;  %649 = vst.msk [vmem:[#allocation2 + $0xf0] sm:$0xff] %vm618_vm2, %v583_v25 }
 0x103   : > { %958 = vrot.lane.b32.xlu1 %v3217_v22, %s3693_s23  ;;  %956 = vrot.lane.b32.xlu0 %v3216_v23, %s3693_s23  ;;  %v3249_v22 = vld [vmem:[%s3747_s19 + $0x175] sm:$0xff]  ;;  %v3248_v23 = vld [vmem:[%s3747_s19 + $0x16d] sm:$0xff] }
 0x105   : > { %v718_v28 = vpop.permute.xlu1 %717  ;;  %v716_v29 = vpop.permute.xlu0 %715 }
 0x106   : > { %813 = vst.msk [vmem:[#allocation2 + $0x8] sm:$0xff] %vm811_vm3, %v718_v28  ;;  %812 = vst.msk [vmem:[#allocation2] sm:$0xff] %vm811_vm3, %v716_v29 }
 0x107   : > { %962 = vrot.lane.b32.xlu1 %v3219_v26, %s3693_s23  ;;  %960 = vrot.lane.b32.xlu0 %v3218_v27, %s3693_s23  ;;  %v3251_v26 = vld [vmem:[%s3747_s19 + $0x18d] sm:$0xff]  ;;  %v3250_v27 = vld [vmem:[%s3747_s19 + $0x185] sm:$0xff] }
 0x109   : > { %v722_v32 = vpop.permute.xlu1 %721  ;;  %v720_v33 = vpop.permute.xlu0 %719 }
 0x10a   : > { %815 = vst.msk [vmem:[#allocation2 + $0x18] sm:$0xff] %vm811_vm3, %v722_v32  ;;  %814 = vst.msk [vmem:[#allocation2 + $0x10] sm:$0xff] %vm811_vm3, %v720_v33 }
 0x10b   : > { %966 = vrot.lane.b32.xlu1 %v3221_v30, %s3693_s23  ;;  %964 = vrot.lane.b32.xlu0 %v3220_v31, %s3693_s23  ;;  %v3253_v30 = vld [vmem:[%s3747_s19 + $0x1a5] sm:$0xff]  ;;  %v3252_v31 = vld [vmem:[%s3747_s19 + $0x19d] sm:$0xff] }
 0x10d   : > { %v726_v36 = vpop.permute.xlu1 %725  ;;  %v724_v37 = vpop.permute.xlu0 %723 }
 0x10e   : > { %817 = vst.msk [vmem:[#allocation2 + $0x28] sm:$0xff] %vm811_vm3, %v726_v36  ;;  %816 = vst.msk [vmem:[#allocation2 + $0x20] sm:$0xff] %vm811_vm3, %v724_v37 }
 0x10f   : > { %970 = vrot.lane.b32.xlu1 %v3223_v34, %s3693_s23  ;;  %968 = vrot.lane.b32.xlu0 %v3222_v35, %s3693_s23  ;;  %v3255_v34 = vld [vmem:[%s3747_s19 + $0x1bd] sm:$0xff]  ;;  %v3254_v35 = vld [vmem:[%s3747_s19 + $0x1b5] sm:$0xff] }
 0x111   : > { %v730_v40 = vpop.permute.xlu1 %729  ;;  %v728_v41 = vpop.permute.xlu0 %727 }
 0x112   : > { %819 = vst.msk [vmem:[#allocation2 + $0x38] sm:$0xff] %vm811_vm3, %v730_v40  ;;  %818 = vst.msk [vmem:[#allocation2 + $0x30] sm:$0xff] %vm811_vm3, %v728_v41 }
 0x113   : > { %1103 = vrot.lane.b32.xlu1 %v3225_v38, %s3694_s24  ;;  %1101 = vrot.lane.b32.xlu0 %v3224_v39, %s3694_s24  ;;  %v3257_v38 = vld [vmem:[%s3747_s19 + $0x56] sm:$0xff]  ;;  %v3256_v39 = vld [vmem:[%s3747_s19 + $0x4e] sm:$0xff] }
 0x115   : > { %v734_v44 = vpop.permute.xlu1 %733  ;;  %v732_v45 = vpop.permute.xlu0 %731 }
 0x116   : > { %821 = vst.msk [vmem:[#allocation2 + $0x48] sm:$0xff] %vm811_vm3, %v734_v44  ;;  %820 = vst.msk [vmem:[#allocation2 + $0x40] sm:$0xff] %vm811_vm3, %v732_v45 }
 0x117   : > { %1107 = vrot.lane.b32.xlu1 %v3227_v42, %s3694_s24  ;;  %1105 = vrot.lane.b32.xlu0 %v3226_v43, %s3694_s24  ;;  %v3259_v42 = vld [vmem:[%s3747_s19 + $0x6e] sm:$0xff]  ;;  %v3258_v43 = vld [vmem:[%s3747_s19 + $0x66] sm:$0xff] }
 0x119   : > { %v738_v48 = vpop.permute.xlu1 %737  ;;  %v736_v49 = vpop.permute.xlu0 %735 }
 0x11a   : > { %823 = vst.msk [vmem:[#allocation2 + $0x58] sm:$0xff] %vm811_vm3, %v738_v48  ;;  %822 = vst.msk [vmem:[#allocation2 + $0x50] sm:$0xff] %vm811_vm3, %v736_v49 }
 0x11b   : > { %1111 = vrot.lane.b32.xlu1 %v3229_v46, %s3694_s24  ;;  %1109 = vrot.lane.b32.xlu0 %v3228_v47, %s3694_s24  ;;  %v3261_v46 = vld [vmem:[%s3747_s19 + $0x86] sm:$0xff]  ;;  %v3260_v47 = vld [vmem:[%s3747_s19 + $0x7e] sm:$0xff] }
 0x11d   : > { %v742_v52 = vpop.permute.xlu1 %741  ;;  %v740_v53 = vpop.permute.xlu0 %739 }
 0x11e   : > { %825 = vst.msk [vmem:[#allocation2 + $0x68] sm:$0xff] %vm811_vm3, %v742_v52  ;;  %824 = vst.msk [vmem:[#allocation2 + $0x60] sm:$0xff] %vm811_vm3, %v740_v53 }
 0x11f   : > { %1115 = vrot.lane.b32.xlu1 %v3231_v50, %s3694_s24  ;;  %1113 = vrot.lane.b32.xlu0 %v3230_v51, %s3694_s24  ;;  %v3263_v50 = vld [vmem:[%s3747_s19 + $0x9e] sm:$0xff]  ;;  %v3262_v51 = vld [vmem:[%s3747_s19 + $0x96] sm:$0xff] }
 0x121   : > { %v746_v56 = vpop.permute.xlu1 %745  ;;  %v744_v57 = vpop.permute.xlu0 %743 }
 0x122   : > { %827 = vst.msk [vmem:[#allocation2 + $0x78] sm:$0xff] %vm811_vm3, %v746_v56  ;;  %826 = vst.msk [vmem:[#allocation2 + $0x70] sm:$0xff] %vm811_vm3, %v744_v57 }
 0x123   : > { %1119 = vrot.lane.b32.xlu1 %v3233_v54, %s3694_s24  ;;  %1117 = vrot.lane.b32.xlu0 %v3232_v55, %s3694_s24  ;;  %v3265_v54 = vld [vmem:[%s3747_s19 + $0xb6] sm:$0xff]  ;;  %v3264_v55 = vld [vmem:[%s3747_s19 + $0xae] sm:$0xff] }
 0x125   : > { %v750_v60 = vpop.permute.xlu1 %749  ;;  %v748_v61 = vpop.permute.xlu0 %747 }
 0x126   : > { %829 = vst.msk [vmem:[#allocation2 + $0x88] sm:$0xff] %vm811_vm3, %v750_v60  ;;  %828 = vst.msk [vmem:[#allocation2 + $0x80] sm:$0xff] %vm811_vm3, %v748_v61 }
 0x127   : > { %1123 = vrot.lane.b32.xlu1 %v3235_v58, %s3694_s24  ;;  %1121 = vrot.lane.b32.xlu0 %v3234_v59, %s3694_s24  ;;  %v3267_v58 = vld [vmem:[%s3747_s19 + $0xce] sm:$0xff]  ;;  %v3266_v59 = vld [vmem:[%s3747_s19 + $0xc6] sm:$0xff] }
 0x129   : > { %v754_v0 = vpop.permute.xlu1 %753  ;;  %v752_v1 = vpop.permute.xlu0 %751 }
 0x12a   : > { %831 = vst.msk [vmem:[#allocation2 + $0x98] sm:$0xff] %vm811_vm3, %v754_v0  ;;  %830 = vst.msk [vmem:[#allocation2 + $0x90] sm:$0xff] %vm811_vm3, %v752_v1 }
 0x12b   : > { %1127 = vrot.lane.b32.xlu1 %v3237_v62, %s3694_s24  ;;  %1125 = vrot.lane.b32.xlu0 %v3236_v63, %s3694_s24  ;;  %v3269_v62 = vld [vmem:[%s3747_s19 + $0xe6] sm:$0xff]  ;;  %v3268_v63 = vld [vmem:[%s3747_s19 + $0xde] sm:$0xff] }
 0x12d   : > { %v758_v4 = vpop.permute.xlu1 %757  ;;  %v756_v5 = vpop.permute.xlu0 %755 }
 0x12e   : > { %833 = vst.msk [vmem:[#allocation2 + $0xa8] sm:$0xff] %vm811_vm3, %v758_v4  ;;  %832 = vst.msk [vmem:[#allocation2 + $0xa0] sm:$0xff] %vm811_vm3, %v756_v5 }
 0x12f   : > { %1131 = vrot.lane.b32.xlu1 %v3239_v2, %s3694_s24  ;;  %1129 = vrot.lane.b32.xlu0 %v3238_v3, %s3694_s24  ;;  %v3271_v2 = vld [vmem:[%s3747_s19 + $0xfe] sm:$0xff]  ;;  %v3270_v3 = vld [vmem:[%s3747_s19 + $0xf6] sm:$0xff] }
 0x131   : > { %v762_v8 = vpop.permute.xlu1 %761  ;;  %v760_v9 = vpop.permute.xlu0 %759 }
 0x132   : > { %835 = vst.msk [vmem:[#allocation2 + $0xb8] sm:$0xff] %vm811_vm3, %v762_v8  ;;  %834 = vst.msk [vmem:[#allocation2 + $0xb0] sm:$0xff] %vm811_vm3, %v760_v9 }
 0x133   : > { %1135 = vrot.lane.b32.xlu1 %v3241_v6, %s3694_s24  ;;  %1133 = vrot.lane.b32.xlu0 %v3240_v7, %s3694_s24  ;;  %v3273_v6 = vld [vmem:[%s3747_s19 + $0x116] sm:$0xff]  ;;  %v3272_v7 = vld [vmem:[%s3747_s19 + $0x10e] sm:$0xff] }
 0x135   : > { %v766_v12 = vpop.permute.xlu1 %765  ;;  %v764_v13 = vpop.permute.xlu0 %763 }
 0x136   : > { %837 = vst.msk [vmem:[#allocation2 + $0xc8] sm:$0xff] %vm811_vm3, %v766_v12  ;;  %836 = vst.msk [vmem:[#allocation2 + $0xc0] sm:$0xff] %vm811_vm3, %v764_v13 }
 0x137   : > { %1139 = vrot.lane.b32.xlu1 %v3243_v10, %s3694_s24  ;;  %1137 = vrot.lane.b32.xlu0 %v3242_v11, %s3694_s24  ;;  %v3275_v10 = vld [vmem:[%s3747_s19 + $0x12e] sm:$0xff]  ;;  %v3274_v11 = vld [vmem:[%s3747_s19 + $0x126] sm:$0xff] }
 0x139   : > { %v770_v16 = vpop.permute.xlu1 %769  ;;  %v768_v17 = vpop.permute.xlu0 %767 }
 0x13a   : > { %839 = vst.msk [vmem:[#allocation2 + $0xd8] sm:$0xff] %vm811_vm3, %v770_v16  ;;  %838 = vst.msk [vmem:[#allocation2 + $0xd0] sm:$0xff] %vm811_vm3, %v768_v17 }
 0x13b   : > { %1143 = vrot.lane.b32.xlu1 %v3245_v14, %s3694_s24  ;;  %1141 = vrot.lane.b32.xlu0 %v3244_v15, %s3694_s24  ;;  %v3277_v14 = vld [vmem:[%s3747_s19 + $0x146] sm:$0xff]  ;;  %v3276_v15 = vld [vmem:[%s3747_s19 + $0x13e] sm:$0xff] }
 0x13d   : > { %v774_v20 = vpop.permute.xlu1 %773  ;;  %v772_v21 = vpop.permute.xlu0 %771 }
 0x13e   : > { %841 = vst.msk [vmem:[#allocation2 + $0xe8] sm:$0xff] %vm811_vm3, %v774_v20  ;;  %840 = vst.msk [vmem:[#allocation2 + $0xe0] sm:$0xff] %vm811_vm3, %v772_v21 }
 0x13f   : > { %1147 = vrot.lane.b32.xlu1 %v3247_v18, %s3694_s24  ;;  %1145 = vrot.lane.b32.xlu0 %v3246_v19, %s3694_s24  ;;  %v3279_v18 = vld [vmem:[%s3747_s19 + $0x15e] sm:$0xff]  ;;  %v3278_v19 = vld [vmem:[%s3747_s19 + $0x156] sm:$0xff] }
 0x141   : > { %v778_v24 = vpop.permute.xlu1 %777  ;;  %v776_v25 = vpop.permute.xlu0 %775 }
 0x142   : > { %843 = vst.msk [vmem:[#allocation2 + $0xf8] sm:$0xff] %vm811_vm3, %v778_v24  ;;  %842 = vst.msk [vmem:[#allocation2 + $0xf0] sm:$0xff] %vm811_vm3, %v776_v25 }
 0x143   : > { %1151 = vrot.lane.b32.xlu1 %v3249_v22, %s3694_s24  ;;  %1149 = vrot.lane.b32.xlu0 %v3248_v23, %s3694_s24  ;;  %v3281_v22 = vld [vmem:[%s3747_s19 + $0x176] sm:$0xff]  ;;  %v3280_v23 = vld [vmem:[%s3747_s19 + $0x16e] sm:$0xff] }
 0x145   : > { %v911_v28 = vpop.permute.xlu1 %910  ;;  %v909_v29 = vpop.permute.xlu0 %908 }
 0x146   : > { %1006 = vst.msk [vmem:[#allocation2 + $0x8] sm:$0xff] %vm1004_vm4, %v911_v28  ;;  %1005 = vst.msk [vmem:[#allocation2] sm:$0xff] %vm1004_vm4, %v909_v29 }
 0x147   : > { %1155 = vrot.lane.b32.xlu1 %v3251_v26, %s3694_s24  ;;  %1153 = vrot.lane.b32.xlu0 %v3250_v27, %s3694_s24  ;;  %v3283_v26 = vld [vmem:[%s3747_s19 + $0x18e] sm:$0xff]  ;;  %v3282_v27 = vld [vmem:[%s3747_s19 + $0x186] sm:$0xff] }
 0x149   : > { %v915_v32 = vpop.permute.xlu1 %914  ;;  %v913_v33 = vpop.permute.xlu0 %912 }
 0x14a   : > { %1008 = vst.msk [vmem:[#allocation2 + $0x18] sm:$0xff] %vm1004_vm4, %v915_v32  ;;  %1007 = vst.msk [vmem:[#allocation2 + $0x10] sm:$0xff] %vm1004_vm4, %v913_v33 }
 0x14b   : > { %1159 = vrot.lane.b32.xlu1 %v3253_v30, %s3694_s24  ;;  %1157 = vrot.lane.b32.xlu0 %v3252_v31, %s3694_s24  ;;  %v3285_v30 = vld [vmem:[%s3747_s19 + $0x1a6] sm:$0xff]  ;;  %v3284_v31 = vld [vmem:[%s3747_s19 + $0x19e] sm:$0xff] }
 0x14d   : > { %v919_v36 = vpop.permute.xlu1 %918  ;;  %v917_v37 = vpop.permute.xlu0 %916 }
 0x14e   : > { %1010 = vst.msk [vmem:[#allocation2 + $0x28] sm:$0xff] %vm1004_vm4, %v919_v36  ;;  %1009 = vst.msk [vmem:[#allocation2 + $0x20] sm:$0xff] %vm1004_vm4, %v917_v37 }
 0x14f   : > { %1163 = vrot.lane.b32.xlu1 %v3255_v34, %s3694_s24  ;;  %1161 = vrot.lane.b32.xlu0 %v3254_v35, %s3694_s24  ;;  %v3287_v34 = vld [vmem:[%s3747_s19 + $0x1be] sm:$0xff]  ;;  %v3286_v35 = vld [vmem:[%s3747_s19 + $0x1b6] sm:$0xff] }
 0x151   : > { %v923_v40 = vpop.permute.xlu1 %922  ;;  %v921_v41 = vpop.permute.xlu0 %920 }
 0x152   : > { %1012 = vst.msk [vmem:[#allocation2 + $0x38] sm:$0xff] %vm1004_vm4, %v923_v40  ;;  %1011 = vst.msk [vmem:[#allocation2 + $0x30] sm:$0xff] %vm1004_vm4, %v921_v41 }
 0x153   : > { %1296 = vrot.lane.b32.xlu1 %v3257_v38, %s3695_s25  ;;  %1294 = vrot.lane.b32.xlu0 %v3256_v39, %s3695_s25  ;;  %v1426_v38 = vld [vmem:[%s3747_s19 + $0xb] sm:$0xff]  ;;  %v1425_v39 = vld [vmem:[%s3747_s19 + $0x3] sm:$0xff] }
 0x155   : > { %v927_v44 = vpop.permute.xlu1 %926  ;;  %v925_v45 = vpop.permute.xlu0 %924 }
 0x156   : > { %1014 = vst.msk [vmem:[#allocation2 + $0x48] sm:$0xff] %vm1004_vm4, %v927_v44  ;;  %1013 = vst.msk [vmem:[#allocation2 + $0x40] sm:$0xff] %vm1004_vm4, %v925_v45 }
 0x157   : > { %1300 = vrot.lane.b32.xlu1 %v3259_v42, %s3695_s25  ;;  %1298 = vrot.lane.b32.xlu0 %v3258_v43, %s3695_s25  ;;  %v4338_v42 = vld [vmem:[%s3747_s19 + $0x23] sm:$0xff]  ;;  %v4341_v43 = vld [vmem:[%s3747_s19 + $0x1b] sm:$0xff] }
 0x159   : > { %v931_v48 = vpop.permute.xlu1 %930  ;;  %v929_v49 = vpop.permute.xlu0 %928 }
 0x15a   : > { %1016 = vst.msk [vmem:[#allocation2 + $0x58] sm:$0xff] %vm1004_vm4, %v931_v48  ;;  %1015 = vst.msk [vmem:[#allocation2 + $0x50] sm:$0xff] %vm1004_vm4, %v929_v49 }
 0x15b   : > { %1304 = vrot.lane.b32.xlu1 %v3261_v46, %s3695_s25  ;;  %1302 = vrot.lane.b32.xlu0 %v3260_v47, %s3695_s25  ;;  %v4350_v46 = vld [vmem:[%s3747_s19 + $0x3b] sm:$0xff]  ;;  %v4353_v47 = vld [vmem:[%s3747_s19 + $0x33] sm:$0xff] }
 0x15d   : > { %v935_v52 = vpop.permute.xlu1 %934  ;;  %v933_v53 = vpop.permute.xlu0 %932 }
 0x15e   : > { %1018 = vst.msk [vmem:[#allocation2 + $0x68] sm:$0xff] %vm1004_vm4, %v935_v52  ;;  %1017 = vst.msk [vmem:[#allocation2 + $0x60] sm:$0xff] %vm1004_vm4, %v933_v53 }
 0x15f   : > { %1308 = vrot.lane.b32.xlu1 %v3263_v50, %s3695_s25  ;;  %1306 = vrot.lane.b32.xlu0 %v3262_v51, %s3695_s25  ;;  %v4362_v50 = vld [vmem:[%s3747_s19 + $0x53] sm:$0xff]  ;;  %v4365_v51 = vld [vmem:[%s3747_s19 + $0x4b] sm:$0xff] }
 0x161   : > { %v939_v56 = vpop.permute.xlu1 %938  ;;  %v937_v57 = vpop.permute.xlu0 %936 }
 0x162   : > { %1020 = vst.msk [vmem:[#allocation2 + $0x78] sm:$0xff] %vm1004_vm4, %v939_v56  ;;  %1019 = vst.msk [vmem:[#allocation2 + $0x70] sm:$0xff] %vm1004_vm4, %v937_v57 }
 0x163   : > { %1312 = vrot.lane.b32.xlu1 %v3265_v54, %s3695_s25  ;;  %1310 = vrot.lane.b32.xlu0 %v3264_v55, %s3695_s25  ;;  %v4374_v54 = vld [vmem:[%s3747_s19 + $0x6b] sm:$0xff]  ;;  %v4377_v55 = vld [vmem:[%s3747_s19 + $0x63] sm:$0xff] }
 0x165   : > { %v943_v60 = vpop.permute.xlu1 %942  ;;  %v941_v61 = vpop.permute.xlu0 %940 }
 0x166   : > { %1022 = vst.msk [vmem:[#allocation2 + $0x88] sm:$0xff] %vm1004_vm4, %v943_v60  ;;  %1021 = vst.msk [vmem:[#allocation2 + $0x80] sm:$0xff] %vm1004_vm4, %v941_v61 }
 0x167   : > { %1316 = vrot.lane.b32.xlu1 %v3267_v58, %s3695_s25  ;;  %1314 = vrot.lane.b32.xlu0 %v3266_v59, %s3695_s25  ;;  %v4386_v58 = vld [vmem:[%s3747_s19 + $0x83] sm:$0xff]  ;;  %v4389_v59 = vld [vmem:[%s3747_s19 + $0x7b] sm:$0xff] }
 0x169   : > { %v947_v0 = vpop.permute.xlu1 %946  ;;  %v945_v1 = vpop.permute.xlu0 %944 }
 0x16a   : > { %1024 = vst.msk [vmem:[#allocation2 + $0x98] sm:$0xff] %vm1004_vm4, %v947_v0  ;;  %1023 = vst.msk [vmem:[#allocation2 + $0x90] sm:$0xff] %vm1004_vm4, %v945_v1 }
 0x16b   : > { %1320 = vrot.lane.b32.xlu1 %v3269_v62, %s3695_s25  ;;  %1318 = vrot.lane.b32.xlu0 %v3268_v63, %s3695_s25  ;;  %v4398_v62 = vld [vmem:[%s3747_s19 + $0x9b] sm:$0xff]  ;;  %v4401_v63 = vld [vmem:[%s3747_s19 + $0x93] sm:$0xff] }
 0x16d   : > { %v951_v4 = vpop.permute.xlu1 %950  ;;  %v949_v5 = vpop.permute.xlu0 %948 }
 0x16e   : > { %1026 = vst.msk [vmem:[#allocation2 + $0xa8] sm:$0xff] %vm1004_vm4, %v951_v4  ;;  %1025 = vst.msk [vmem:[#allocation2 + $0xa0] sm:$0xff] %vm1004_vm4, %v949_v5 }
 0x16f   : > { %1324 = vrot.lane.b32.xlu1 %v3271_v2, %s3695_s25  ;;  %1322 = vrot.lane.b32.xlu0 %v3270_v3, %s3695_s25  ;;  %v4410_v2 = vld [vmem:[%s3747_s19 + $0xb3] sm:$0xff]  ;;  %v4413_v3 = vld [vmem:[%s3747_s19 + $0xab] sm:$0xff] }
 0x171   : > { %v955_v8 = vpop.permute.xlu1 %954  ;;  %v953_v9 = vpop.permute.xlu0 %952 }
 0x172   : > { %1028 = vst.msk [vmem:[#allocation2 + $0xb8] sm:$0xff] %vm1004_vm4, %v955_v8  ;;  %1027 = vst.msk [vmem:[#allocation2 + $0xb0] sm:$0xff] %vm1004_vm4, %v953_v9 }
 0x173   : > { %1328 = vrot.lane.b32.xlu1 %v3273_v6, %s3695_s25  ;;  %1326 = vrot.lane.b32.xlu0 %v3272_v7, %s3695_s25  ;;  %v4422_v6 = vld [vmem:[%s3747_s19 + $0xcb] sm:$0xff]  ;;  %v4425_v7 = vld [vmem:[%s3747_s19 + $0xc3] sm:$0xff] }
 0x175   : > { %v959_v12 = vpop.permute.xlu1 %958  ;;  %v957_v13 = vpop.permute.xlu0 %956 }
 0x176   : > { %1030 = vst.msk [vmem:[#allocation2 + $0xc8] sm:$0xff] %vm1004_vm4, %v959_v12  ;;  %1029 = vst.msk [vmem:[#allocation2 + $0xc0] sm:$0xff] %vm1004_vm4, %v957_v13 }
 0x177   : > { %1332 = vrot.lane.b32.xlu1 %v3275_v10, %s3695_s25  ;;  %1330 = vrot.lane.b32.xlu0 %v3274_v11, %s3695_s25  ;;  %v4434_v10 = vld [vmem:[%s3747_s19 + $0xe3] sm:$0xff]  ;;  %v4437_v11 = vld [vmem:[%s3747_s19 + $0xdb] sm:$0xff] }
 0x179   : > { %v963_v16 = vpop.permute.xlu1 %962  ;;  %v961_v17 = vpop.permute.xlu0 %960 }
 0x17a   : > { %1032 = vst.msk [vmem:[#allocation2 + $0xd8] sm:$0xff] %vm1004_vm4, %v963_v16  ;;  %1031 = vst.msk [vmem:[#allocation2 + $0xd0] sm:$0xff] %vm1004_vm4, %v961_v17 }
 0x17b   : > { %1336 = vrot.lane.b32.xlu1 %v3277_v14, %s3695_s25  ;;  %1334 = vrot.lane.b32.xlu0 %v3276_v15, %s3695_s25  ;;  %v4446_v14 = vld [vmem:[%s3747_s19 + $0xfb] sm:$0xff]  ;;  %v4449_v15 = vld [vmem:[%s3747_s19 + $0xf3] sm:$0xff] }
 0x17d   : > { %v967_v20 = vpop.permute.xlu1 %966  ;;  %v965_v21 = vpop.permute.xlu0 %964 }
 0x17e   : > { %1034 = vst.msk [vmem:[#allocation2 + $0xe8] sm:$0xff] %vm1004_vm4, %v967_v20  ;;  %1033 = vst.msk [vmem:[#allocation2 + $0xe0] sm:$0xff] %vm1004_vm4, %v965_v21 }
 0x17f   : > { %1340 = vrot.lane.b32.xlu1 %v3279_v18, %s3695_s25  ;;  %1338 = vrot.lane.b32.xlu0 %v3278_v19, %s3695_s25  ;;  %v4458_v18 = vld [vmem:[%s3747_s19 + $0x113] sm:$0xff]  ;;  %v4461_v19 = vld [vmem:[%s3747_s19 + $0x10b] sm:$0xff] }
 0x181   : > { %v971_v24 = vpop.permute.xlu1 %970  ;;  %v969_v25 = vpop.permute.xlu0 %968 }
 0x182   : > { %1036 = vst.msk [vmem:[#allocation2 + $0xf8] sm:$0xff] %vm1004_vm4, %v971_v24  ;;  %1035 = vst.msk [vmem:[#allocation2 + $0xf0] sm:$0xff] %vm1004_vm4, %v969_v25 }
 0x183   : > { %1344 = vrot.lane.b32.xlu1 %v3281_v22, %s3695_s25  ;;  %1342 = vrot.lane.b32.xlu0 %v3280_v23, %s3695_s25  ;;  %v4470_v22 = vld [vmem:[%s3747_s19 + $0x12b] sm:$0xff]  ;;  %v4473_v23 = vld [vmem:[%s3747_s19 + $0x123] sm:$0xff] }
 0x185   : > { %v1104_v28 = vpop.permute.xlu1 %1103  ;;  %v1102_v29 = vpop.permute.xlu0 %1101 }
 0x186   : > { %1199 = vst.msk [vmem:[#allocation2 + $0x8] sm:$0xff] %vm1197_vm5, %v1104_v28  ;;  %1198 = vst.msk [vmem:[#allocation2] sm:$0xff] %vm1197_vm5, %v1102_v29 }
 0x187   : > { %1348 = vrot.lane.b32.xlu1 %v3283_v26, %s3695_s25  ;;  %1346 = vrot.lane.b32.xlu0 %v3282_v27, %s3695_s25  ;;  %v4482_v26 = vld [vmem:[%s3747_s19 + $0x143] sm:$0xff]  ;;  %v4485_v27 = vld [vmem:[%s3747_s19 + $0x13b] sm:$0xff] }
 0x189   : > { %v1108_v32 = vpop.permute.xlu1 %1107  ;;  %v1106_v33 = vpop.permute.xlu0 %1105 }
 0x18a   : > { %1201 = vst.msk [vmem:[#allocation2 + $0x18] sm:$0xff] %vm1197_vm5, %v1108_v32  ;;  %1200 = vst.msk [vmem:[#allocation2 + $0x10] sm:$0xff] %vm1197_vm5, %v1106_v33 }
 0x18b   : > { %1352 = vrot.lane.b32.xlu1 %v3285_v30, %s3695_s25  ;;  %1350 = vrot.lane.b32.xlu0 %v3284_v31, %s3695_s25  ;;  %v4494_v30 = vld [vmem:[%s3747_s19 + $0x15b] sm:$0xff]  ;;  %v4497_v31 = vld [vmem:[%s3747_s19 + $0x153] sm:$0xff] }
 0x18d   : > { %v1112_v36 = vpop.permute.xlu1 %1111  ;;  %v1110_v37 = vpop.permute.xlu0 %1109 }
 0x18e   : > { %1203 = vst.msk [vmem:[#allocation2 + $0x28] sm:$0xff] %vm1197_vm5, %v1112_v36  ;;  %1202 = vst.msk [vmem:[#allocation2 + $0x20] sm:$0xff] %vm1197_vm5, %v1110_v37 }
 0x18f   : > { %1356 = vrot.lane.b32.xlu1 %v3287_v34, %s3695_s25  ;;  %1354 = vrot.lane.b32.xlu0 %v3286_v35, %s3695_s25  ;;  %v4506_v34 = vld [vmem:[%s3747_s19 + $0x173] sm:$0xff]  ;;  %v4509_v35 = vld [vmem:[%s3747_s19 + $0x16b] sm:$0xff] }
 0x191   : > { %v1116_v40 = vpop.permute.xlu1 %1115  ;;  %v1114_v41 = vpop.permute.xlu0 %1113 }
 0x192   : > { %1205 = vst.msk [vmem:[#allocation2 + $0x38] sm:$0xff] %vm1197_vm5, %v1116_v40  ;;  %1204 = vst.msk [vmem:[#allocation2 + $0x30] sm:$0xff] %vm1197_vm5, %v1114_v41 }
 0x193   : > { %1491 = vrot.lane.b32.xlu1 %v1426_v38, %s3696_s26  ;;  %1489 = vrot.lane.b32.xlu0 %v1425_v39, %s3696_s26 }
 0x195   : > { %v1120_v44 = vpop.permute.xlu1 %1119  ;;  %v1118_v45 = vpop.permute.xlu0 %1117 }
 0x196   : > { %1207 = vst.msk [vmem:[#allocation2 + $0x48] sm:$0xff] %vm1197_vm5, %v1120_v44  ;;  %1206 = vst.msk [vmem:[#allocation2 + $0x40] sm:$0xff] %vm1197_vm5, %v1118_v45 }
 0x197   : > { %1495 = vrot.lane.b32.xlu1 %v4338_v42, %s3696_s26  ;;  %1493 = vrot.lane.b32.xlu0 %v4341_v43, %s3696_s26 }
 0x199   : > { %v1124_v48 = vpop.permute.xlu1 %1123  ;;  %v1122_v49 = vpop.permute.xlu0 %1121 }
 0x19a   : > { %1209 = vst.msk [vmem:[#allocation2 + $0x58] sm:$0xff] %vm1197_vm5, %v1124_v48  ;;  %1208 = vst.msk [vmem:[#allocation2 + $0x50] sm:$0xff] %vm1197_vm5, %v1122_v49 }
 0x19b   : > { %1499 = vrot.lane.b32.xlu1 %v4350_v46, %s3696_s26  ;;  %1497 = vrot.lane.b32.xlu0 %v4353_v47, %s3696_s26 }
 0x19d   : > { %v1128_v52 = vpop.permute.xlu1 %1127  ;;  %v1126_v53 = vpop.permute.xlu0 %1125 }
 0x19e   : > { %1211 = vst.msk [vmem:[#allocation2 + $0x68] sm:$0xff] %vm1197_vm5, %v1128_v52  ;;  %1210 = vst.msk [vmem:[#allocation2 + $0x60] sm:$0xff] %vm1197_vm5, %v1126_v53 }
 0x19f   : > { %1503 = vrot.lane.b32.xlu1 %v4362_v50, %s3696_s26  ;;  %1501 = vrot.lane.b32.xlu0 %v4365_v51, %s3696_s26 }
 0x1a1   : > { %v1132_v56 = vpop.permute.xlu1 %1131  ;;  %v1130_v57 = vpop.permute.xlu0 %1129 }
 0x1a2   : > { %1213 = vst.msk [vmem:[#allocation2 + $0x78] sm:$0xff] %vm1197_vm5, %v1132_v56  ;;  %1212 = vst.msk [vmem:[#allocation2 + $0x70] sm:$0xff] %vm1197_vm5, %v1130_v57 }
 0x1a3   : > { %1507 = vrot.lane.b32.xlu1 %v4374_v54, %s3696_s26  ;;  %1505 = vrot.lane.b32.xlu0 %v4377_v55, %s3696_s26 }
 0x1a5   : > { %v1136_v60 = vpop.permute.xlu1 %1135  ;;  %v1134_v61 = vpop.permute.xlu0 %1133 }
 0x1a6   : > { %1215 = vst.msk [vmem:[#allocation2 + $0x88] sm:$0xff] %vm1197_vm5, %v1136_v60  ;;  %1214 = vst.msk [vmem:[#allocation2 + $0x80] sm:$0xff] %vm1197_vm5, %v1134_v61 }
 0x1a7   : > { %1511 = vrot.lane.b32.xlu1 %v4386_v58, %s3696_s26  ;;  %1509 = vrot.lane.b32.xlu0 %v4389_v59, %s3696_s26 }
 0x1a9   : > { %v1140_v0 = vpop.permute.xlu1 %1139  ;;  %v1138_v1 = vpop.permute.xlu0 %1137 }
 0x1aa   : > { %1217 = vst.msk [vmem:[#allocation2 + $0x98] sm:$0xff] %vm1197_vm5, %v1140_v0  ;;  %1216 = vst.msk [vmem:[#allocation2 + $0x90] sm:$0xff] %vm1197_vm5, %v1138_v1 }
 0x1ab   : > { %1515 = vrot.lane.b32.xlu1 %v4398_v62, %s3696_s26  ;;  %1513 = vrot.lane.b32.xlu0 %v4401_v63, %s3696_s26 }
 0x1ad   : > { %v1144_v4 = vpop.permute.xlu1 %1143  ;;  %v1142_v5 = vpop.permute.xlu0 %1141 }
 0x1ae   : > { %1219 = vst.msk [vmem:[#allocation2 + $0xa8] sm:$0xff] %vm1197_vm5, %v1144_v4  ;;  %1218 = vst.msk [vmem:[#allocation2 + $0xa0] sm:$0xff] %vm1197_vm5, %v1142_v5 }
 0x1af   : > { %1519 = vrot.lane.b32.xlu1 %v4410_v2, %s3696_s26  ;;  %1517 = vrot.lane.b32.xlu0 %v4413_v3, %s3696_s26 }
 0x1b1   : > { %v1148_v8 = vpop.permute.xlu1 %1147  ;;  %v1146_v9 = vpop.permute.xlu0 %1145 }
 0x1b2   : > { %1221 = vst.msk [vmem:[#allocation2 + $0xb8] sm:$0xff] %vm1197_vm5, %v1148_v8  ;;  %1220 = vst.msk [vmem:[#allocation2 + $0xb0] sm:$0xff] %vm1197_vm5, %v1146_v9 }
 0x1b3   : > { %1523 = vrot.lane.b32.xlu1 %v4422_v6, %s3696_s26  ;;  %1521 = vrot.lane.b32.xlu0 %v4425_v7, %s3696_s26 }
 0x1b5   : > { %v1152_v12 = vpop.permute.xlu1 %1151  ;;  %v1150_v13 = vpop.permute.xlu0 %1149 }
 0x1b6   : > { %1223 = vst.msk [vmem:[#allocation2 + $0xc8] sm:$0xff] %vm1197_vm5, %v1152_v12  ;;  %1222 = vst.msk [vmem:[#allocation2 + $0xc0] sm:$0xff] %vm1197_vm5, %v1150_v13 }
 0x1b7   : > { %1527 = vrot.lane.b32.xlu1 %v4434_v10, %s3696_s26  ;;  %1525 = vrot.lane.b32.xlu0 %v4437_v11, %s3696_s26 }
 0x1b9   : > { %v1156_v16 = vpop.permute.xlu1 %1155  ;;  %v1154_v17 = vpop.permute.xlu0 %1153 }
 0x1ba   : > { %1225 = vst.msk [vmem:[#allocation2 + $0xd8] sm:$0xff] %vm1197_vm5, %v1156_v16  ;;  %1224 = vst.msk [vmem:[#allocation2 + $0xd0] sm:$0xff] %vm1197_vm5, %v1154_v17 }
 0x1bb   : > { %1531 = vrot.lane.b32.xlu1 %v4446_v14, %s3696_s26  ;;  %1529 = vrot.lane.b32.xlu0 %v4449_v15, %s3696_s26 }
 0x1bd   : > { %v1160_v20 = vpop.permute.xlu1 %1159  ;;  %v1158_v21 = vpop.permute.xlu0 %1157 }
 0x1be   : > { %1227 = vst.msk [vmem:[#allocation2 + $0xe8] sm:$0xff] %vm1197_vm5, %v1160_v20  ;;  %1226 = vst.msk [vmem:[#allocation2 + $0xe0] sm:$0xff] %vm1197_vm5, %v1158_v21 }
 0x1bf   : > { %1535 = vrot.lane.b32.xlu1 %v4458_v18, %s3696_s26  ;;  %1533 = vrot.lane.b32.xlu0 %v4461_v19, %s3696_s26 }
 0x1c1   : > { %v1164_v24 = vpop.permute.xlu1 %1163  ;;  %v1162_v25 = vpop.permute.xlu0 %1161 }
 0x1c2   : > { %1229 = vst.msk [vmem:[#allocation2 + $0xf8] sm:$0xff] %vm1197_vm5, %v1164_v24  ;;  %1228 = vst.msk [vmem:[#allocation2 + $0xf0] sm:$0xff] %vm1197_vm5, %v1162_v25 }
 0x1c3   : > { %1539 = vrot.lane.b32.xlu1 %v4470_v22, %s3696_s26  ;;  %1537 = vrot.lane.b32.xlu0 %v4473_v23, %s3696_s26 }
 0x1c5   : > { %v1297_v28 = vpop.permute.xlu1 %1296  ;;  %v1295_v29 = vpop.permute.xlu0 %1294 }
 0x1c6   : > { %1392 = vst.msk [vmem:[#allocation2 + $0x8] sm:$0xff] %vm1390_vm6, %v1297_v28  ;;  %1391 = vst.msk [vmem:[#allocation2] sm:$0xff] %vm1390_vm6, %v1295_v29 }
 0x1c7   : > { %1543 = vrot.lane.b32.xlu1 %v4482_v26, %s3696_s26  ;;  %1541 = vrot.lane.b32.xlu0 %v4485_v27, %s3696_s26 }
 0x1c9   : > { %v1301_v32 = vpop.permute.xlu1 %1300  ;;  %v1299_v33 = vpop.permute.xlu0 %1298 }
 0x1ca   : > { %1394 = vst.msk [vmem:[#allocation2 + $0x18] sm:$0xff] %vm1390_vm6, %v1301_v32  ;;  %1393 = vst.msk [vmem:[#allocation2 + $0x10] sm:$0xff] %vm1390_vm6, %v1299_v33 }
 0x1cb   : > { %1547 = vrot.lane.b32.xlu1 %v4494_v30, %s3696_s26  ;;  %1545 = vrot.lane.b32.xlu0 %v4497_v31, %s3696_s26 }
 0x1cd   : > { %v1305_v36 = vpop.permute.xlu1 %1304  ;;  %v1303_v37 = vpop.permute.xlu0 %1302 }
 0x1ce   : > { %1396 = vst.msk [vmem:[#allocation2 + $0x28] sm:$0xff] %vm1390_vm6, %v1305_v36  ;;  %1395 = vst.msk [vmem:[#allocation2 + $0x20] sm:$0xff] %vm1390_vm6, %v1303_v37 }
 0x1cf   : > { %1551 = vrot.lane.b32.xlu1 %v4506_v34, %s3696_s26  ;;  %1549 = vrot.lane.b32.xlu0 %v4509_v35, %s3696_s26 }
 0x1d1   : > { %v1309_v38 = vpop.permute.xlu1 %1308  ;;  %v1307_v39 = vpop.permute.xlu0 %1306 }
 0x1d2   : > { %1398 = vst.msk [vmem:[#allocation2 + $0x38] sm:$0xff] %vm1390_vm6, %v1309_v38  ;;  %1397 = vst.msk [vmem:[#allocation2 + $0x30] sm:$0xff] %vm1390_vm6, %v1307_v39 }
 0x1d3   : > { %1687 = vrot.lane.b32.xlu1 %v4338_v42, %s3697_s27  ;;  %1685 = vrot.lane.b32.xlu0 %v4341_v43, %s3697_s27 }
 0x1d5   : > { %v1313_v40 = vpop.permute.xlu1 %1312  ;;  %v1311_v41 = vpop.permute.xlu0 %1310 }
 0x1d6   : > { %1400 = vst.msk [vmem:[#allocation2 + $0x48] sm:$0xff] %vm1390_vm6, %v1313_v40  ;;  %1399 = vst.msk [vmem:[#allocation2 + $0x40] sm:$0xff] %vm1390_vm6, %v1311_v41 }
 0x1d7   : > { %1717 = vrot.lane.b32.xlu1 %v4437_v11, %s3697_s27  ;;  %1689 = vrot.lane.b32.xlu0 %v4353_v47, %s3697_s27 }
 0x1d9   : > { %v1317_v44 = vpop.permute.xlu1 %1316  ;;  %v1315_v45 = vpop.permute.xlu0 %1314 }
 0x1da   : > { %1402 = vst.msk [vmem:[#allocation2 + $0x58] sm:$0xff] %vm1390_vm6, %v1317_v44  ;;  %1401 = vst.msk [vmem:[#allocation2 + $0x50] sm:$0xff] %vm1390_vm6, %v1315_v45 }
 0x1db   : > { %1881 = vrot.lane.b32.xlu1 %v4353_v47, %s3698_s28  ;;  %1719 = vrot.lane.b32.xlu0 %v4434_v10, %s3697_s27 }
 0x1dd   : > { %v1321_v42 = vpop.permute.xlu1 %1320  ;;  %v1319_v43 = vpop.permute.xlu0 %1318 }
 0x1de   : > { %1404 = vst.msk [vmem:[#allocation2 + $0x68] sm:$0xff] %vm1390_vm6, %v1321_v42  ;;  %1403 = vst.msk [vmem:[#allocation2 + $0x60] sm:$0xff] %vm1390_vm6, %v1319_v43 }
 0x1df   : > { %1883 = vrot.lane.b32.xlu1 %v4350_v46, %s3698_s28  ;;  %1913 = vrot.lane.b32.xlu0 %v4449_v15, %s3698_s28 }
 0x1e1   : > { %v1325_v48 = vpop.permute.xlu1 %1324  ;;  %v1323_v49 = vpop.permute.xlu0 %1322 }
 0x1e2   : > { %1406 = vst.msk [vmem:[#allocation2 + $0x78] sm:$0xff] %vm1390_vm6, %v1325_v48  ;;  %1405 = vst.msk [vmem:[#allocation2 + $0x70] sm:$0xff] %vm1390_vm6, %v1323_v49 }
 0x1e3   : > { %2077 = vrot.lane.b32.xlu1 %v4377_v55, %s3699_s29  ;;  %1915 = vrot.lane.b32.xlu0 %v4446_v14, %s3698_s28 }
 0x1e5   : > { %v1329_v47 = vpop.permute.xlu1 %1328  ;;  %v1327_v52 = vpop.permute.xlu0 %1326 }
 0x1e6   : > { %1408 = vst.msk [vmem:[#allocation2 + $0x88] sm:$0xff] %vm1390_vm6, %v1329_v47  ;;  %1407 = vst.msk [vmem:[#allocation2 + $0x80] sm:$0xff] %vm1390_vm6, %v1327_v52 }
 0x1e7   : > { %2079 = vrot.lane.b32.xlu1 %v4374_v54, %s3699_s29  ;;  %2109 = vrot.lane.b32.xlu0 %v4473_v23, %s3699_s29 }
 0x1e9   : > { %v1333_v53 = vpop.permute.xlu1 %1332  ;;  %v1331_v56 = vpop.permute.xlu0 %1330 }
 0x1ea   : > { %1410 = vst.msk [vmem:[#allocation2 + $0x98] sm:$0xff] %vm1390_vm6, %v1333_v53  ;;  %1409 = vst.msk [vmem:[#allocation2 + $0x90] sm:$0xff] %vm1390_vm6, %v1331_v56 }
 0x1eb   : > { %2273 = vrot.lane.b32.xlu1 %v4389_v59, %s3700_s30  ;;  %2111 = vrot.lane.b32.xlu0 %v4470_v22, %s3699_s29 }
 0x1ed   : > { %v1337_v57 = vpop.permute.xlu1 %1336  ;;  %v1335_v60 = vpop.permute.xlu0 %1334 }
 0x1ee   : > { %1412 = vst.msk [vmem:[#allocation2 + $0xa8] sm:$0xff] %vm1390_vm6, %v1337_v57  ;;  %1411 = vst.msk [vmem:[#allocation2 + $0xa0] sm:$0xff] %vm1390_vm6, %v1335_v60 }
 0x1ef   : > { %1721 = vrot.lane.b32.xlu1 %v4449_v15, %s3697_s27  ;;  %2305 = vrot.lane.b32.xlu0 %v4485_v27, %s3700_s30 }
 0x1f1   : > { %v1341_v61 = vpop.permute.xlu1 %1340  ;;  %v1339_v0 = vpop.permute.xlu0 %1338 }
 0x1f2   : > { %1414 = vst.msk [vmem:[#allocation2 + $0xb8] sm:$0xff] %vm1390_vm6, %v1341_v61  ;;  %1413 = vst.msk [vmem:[#allocation2 + $0xb0] sm:$0xff] %vm1390_vm6, %v1339_v0  ;;  %v4692_v61 = vld [vmem:[%s3747_s19 + $0x183] sm:$0xff] }
 0x1f3   : > { %2307 = vrot.lane.b32.xlu1 %v4482_v26, %s3700_s30  ;;  %2275 = vrot.lane.b32.xlu0 %v4386_v58, %s3700_s30 }
 0x1f5   : > { %v1345_v1 = vpop.permute.xlu1 %1344  ;;  %v1343_v4 = vpop.permute.xlu0 %1342 }
 0x1f6   : > { %1416 = vst.msk [vmem:[#allocation2 + $0xc8] sm:$0xff] %vm1390_vm6, %v1345_v1  ;;  %1415 = vst.msk [vmem:[#allocation2 + $0xc0] sm:$0xff] %vm1390_vm6, %v1343_v4 }
 0x1f7   : > { %2501 = vrot.lane.b32.xlu1 %v4497_v31, %s3701_s4  ;;  %2469 = vrot.lane.b32.xlu0 %v4401_v63, %s3701_s4 }
 0x1f9   : > { %v1349_v5 = vpop.permute.xlu1 %1348  ;;  %v1347_v8 = vpop.permute.xlu0 %1346 }
 0x1fa   : > { %1418 = vst.msk [vmem:[#allocation2 + $0xd8] sm:$0xff] %vm1390_vm6, %v1349_v5  ;;  %1417 = vst.msk [vmem:[#allocation2 + $0xd0] sm:$0xff] %vm1390_vm6, %v1347_v8  ;;  %v4713_v8 = vld [vmem:[%s3747_s19 + $0x18b] sm:$0xff] }
 0x1fb   : > { %1723 = vrot.lane.b32.xlu1 %v4446_v14, %s3697_s27  ;;  %1691 = vrot.lane.b32.xlu0 %v4350_v46, %s3697_s27 }
 0x1fd   : > { %v1353_v9 = vpop.permute.xlu1 %1352  ;;  %v1351_v12 = vpop.permute.xlu0 %1350 }
 0x1fe   : > { %1420 = vst.msk [vmem:[#allocation2 + $0xe8] sm:$0xff] %vm1390_vm6, %v1353_v9  ;;  %1419 = vst.msk [vmem:[#allocation2 + $0xe0] sm:$0xff] %vm1390_vm6, %v1351_v12 }
 0x1ff   : > { %1917 = vrot.lane.b32.xlu1 %v4461_v19, %s3698_s28  ;;  %1885 = vrot.lane.b32.xlu0 %v4365_v51, %s3698_s28 }
 0x201   : > { %v1357_v13 = vpop.permute.xlu1 %1356  ;;  %v1355_v16 = vpop.permute.xlu0 %1354 }
 0x202   : > { %1422 = vst.msk [vmem:[#allocation2 + $0xf8] sm:$0xff] %vm1390_vm6, %v1357_v13  ;;  %1421 = vst.msk [vmem:[#allocation2 + $0xf0] sm:$0xff] %vm1390_vm6, %v1355_v16 }
 0x203   : > { %2503 = vrot.lane.b32.xlu1 %v4494_v30, %s3701_s4  ;;  %2471 = vrot.lane.b32.xlu0 %v4398_v62, %s3701_s4 }
 0x205   : > { %v1492_v46 = vpop.permute.xlu1 %1491  ;;  %v1490_v17 = vpop.permute.xlu0 %1489 }
 0x206   : > { %1587 = vst.msk [vmem:[#allocation2 + $0x8] sm:$0xff] %vm1585_vm7, %v1492_v46  ;;  %1586 = vst.msk [vmem:[#allocation2] sm:$0xff] %vm1585_vm7, %v1490_v17 }
 0x207   : > { %1919 = vrot.lane.b32.xlu1 %v4458_v18, %s3698_s28  ;;  %1887 = vrot.lane.b32.xlu0 %v4362_v50, %s3698_s28 }
 0x209   : > { %v1496_v20 = vpop.permute.xlu1 %1495  ;;  %v1494_v21 = vpop.permute.xlu0 %1493 }
 0x20a   : > { %1589 = vst.msk [vmem:[#allocation2 + $0x18] sm:$0xff] %vm1585_vm7, %v1496_v20  ;;  %1588 = vst.msk [vmem:[#allocation2 + $0x10] sm:$0xff] %vm1585_vm7, %v1494_v21 }
 0x20b   : > { %2113 = vrot.lane.b32.xlu1 %v4485_v27, %s3699_s29  ;;  %2081 = vrot.lane.b32.xlu0 %v4389_v59, %s3699_s29 }
 0x20d   : > { %v1500_v24 = vpop.permute.xlu1 %1499  ;;  %v1498_v25 = vpop.permute.xlu0 %1497 }
 0x20e   : > { %1591 = vst.msk [vmem:[#allocation2 + $0x28] sm:$0xff] %vm1585_vm7, %v1500_v24  ;;  %1590 = vst.msk [vmem:[#allocation2 + $0x20] sm:$0xff] %vm1585_vm7, %v1498_v25 }
 0x20f   : > { %2115 = vrot.lane.b32.xlu1 %v4482_v26, %s3699_s29  ;;  %2083 = vrot.lane.b32.xlu0 %v4386_v58, %s3699_s29 }
 0x211   : > { %v1504_v28 = vpop.permute.xlu1 %1503  ;;  %v1502_v29 = vpop.permute.xlu0 %1501 }
 0x212   : > { %1593 = vst.msk [vmem:[#allocation2 + $0x38] sm:$0xff] %vm1585_vm7, %v1504_v28  ;;  %1592 = vst.msk [vmem:[#allocation2 + $0x30] sm:$0xff] %vm1585_vm7, %v1502_v29  ;;  %v3702_v29 = vmov 0.0  }
 0x213   : > { %2309 = vrot.lane.b32.xlu1 %v4497_v31, %s3700_s30  ;;  %2277 = vrot.lane.b32.xlu0 %v4401_v63, %s3700_s30 }
 0x215   : > { %v1508_v32 = vpop.permute.xlu1 %1507  ;;  %v1506_v33 = vpop.permute.xlu0 %1505 }
 0x216   : > { %1595 = vst.msk [vmem:[#allocation2 + $0x48] sm:$0xff] %vm1585_vm7, %v1508_v32  ;;  %1594 = vst.msk [vmem:[#allocation2 + $0x40] sm:$0xff] %vm1585_vm7, %v1506_v33 }
 0x217   : > { %1725 = vrot.lane.b32.xlu1 %v4461_v19, %s3697_s27  ;;  %1693 = vrot.lane.b32.xlu0 %v4365_v51, %s3697_s27 }
 0x219   : > { %v1512_v36 = vpop.permute.xlu1 %1511  ;;  %v1510_v37 = vpop.permute.xlu0 %1509 }
 0x21a   : > { %1597 = vst.msk [vmem:[#allocation2 + $0x58] sm:$0xff] %vm1585_vm7, %v1512_v36  ;;  %1596 = vst.msk [vmem:[#allocation2 + $0x50] sm:$0xff] %vm1585_vm7, %v1510_v37 }
 0x21b   : > { %2311 = vrot.lane.b32.xlu1 %v4494_v30, %s3700_s30  ;;  %2279 = vrot.lane.b32.xlu0 %v4398_v62, %s3700_s30 }
 0x21d   : > { %v1516_v38 = vpop.permute.xlu1 %1515  ;;  %v1514_v39 = vpop.permute.xlu0 %1513 }
 0x21e   : > { %1599 = vst.msk [vmem:[#allocation2 + $0x68] sm:$0xff] %vm1585_vm7, %v1516_v38  ;;  %1598 = vst.msk [vmem:[#allocation2 + $0x60] sm:$0xff] %vm1585_vm7, %v1514_v39 }
 0x21f   : > { %2505 = vrot.lane.b32.xlu1 %v4509_v35, %s3701_s4  ;;  %2473 = vrot.lane.b32.xlu0 %v4413_v3, %s3701_s4 }
 0x221   : > { %v1520_v51 = vpop.permute.xlu1 %1519  ;;  %v1518_v19 = vpop.permute.xlu0 %1517 }
 0x222   : > { %1601 = vst.msk [vmem:[#allocation2 + $0x78] sm:$0xff] %vm1585_vm7, %v1520_v51  ;;  %1600 = vst.msk [vmem:[#allocation2 + $0x70] sm:$0xff] %vm1585_vm7, %v1518_v19 }
 0x223   : > { %1727 = vrot.lane.b32.xlu1 %v4458_v18, %s3697_s27  ;;  %1695 = vrot.lane.b32.xlu0 %v4362_v50, %s3697_s27 }
 0x225   : > { %v1524_v40 = vpop.permute.xlu1 %1523  ;;  %v1522_v41 = vpop.permute.xlu0 %1521 }
 0x226   : > { %1603 = vst.msk [vmem:[#allocation2 + $0x88] sm:$0xff] %vm1585_vm7, %v1524_v40  ;;  %1602 = vst.msk [vmem:[#allocation2 + $0x80] sm:$0xff] %vm1585_vm7, %v1522_v41 }
 0x227   : > { %1921 = vrot.lane.b32.xlu1 %v4473_v23, %s3698_s28  ;;  %1889 = vrot.lane.b32.xlu0 %v4377_v55, %s3698_s28 }
 0x229   : > { %v1528_v44 = vpop.permute.xlu1 %1527  ;;  %v1526_v45 = vpop.permute.xlu0 %1525 }
 0x22a   : > { %1605 = vst.msk [vmem:[#allocation2 + $0x98] sm:$0xff] %vm1585_vm7, %v1528_v44  ;;  %1604 = vst.msk [vmem:[#allocation2 + $0x90] sm:$0xff] %vm1585_vm7, %v1526_v45 }
 0x22b   : > { %2507 = vrot.lane.b32.xlu1 %v4506_v34, %s3701_s4  ;;  %2475 = vrot.lane.b32.xlu0 %v4410_v2, %s3701_s4 }
 0x22d   : > { %v1532_v50 = vpop.permute.xlu1 %1531  ;;  %v1530_v18 = vpop.permute.xlu0 %1529 }
 0x22e   : > { %1607 = vst.msk [vmem:[#allocation2 + $0xa8] sm:$0xff] %vm1585_vm7, %v1532_v50  ;;  %1606 = vst.msk [vmem:[#allocation2 + $0xa0] sm:$0xff] %vm1585_vm7, %v1530_v18 }
 0x22f   : > { %1923 = vrot.lane.b32.xlu1 %v4470_v22, %s3698_s28  ;;  %1891 = vrot.lane.b32.xlu0 %v4374_v54, %s3698_s28 }
 0x231   : > { %v1536_v42 = vpop.permute.xlu1 %1535  ;;  %v1534_v43 = vpop.permute.xlu0 %1533 }
 0x232   : > { %1609 = vst.msk [vmem:[#allocation2 + $0xb8] sm:$0xff] %vm1585_vm7, %v1536_v42  ;;  %1608 = vst.msk [vmem:[#allocation2 + $0xb0] sm:$0xff] %vm1585_vm7, %v1534_v43 }
 0x233   : > { %2117 = vrot.lane.b32.xlu1 %v4497_v31, %s3699_s29  ;;  %2085 = vrot.lane.b32.xlu0 %v4401_v63, %s3699_s29 }
 0x235   : > { %v1540_v48 = vpop.permute.xlu1 %1539  ;;  %v1538_v49 = vpop.permute.xlu0 %1537 }
 0x236   : > { %1611 = vst.msk [vmem:[#allocation2 + $0xc8] sm:$0xff] %vm1585_vm7, %v1540_v48  ;;  %1610 = vst.msk [vmem:[#allocation2 + $0xc0] sm:$0xff] %vm1585_vm7, %v1538_v49 }
 0x237   : > { %2119 = vrot.lane.b32.xlu1 %v4494_v30, %s3699_s29  ;;  %2087 = vrot.lane.b32.xlu0 %v4398_v62, %s3699_s29 }
 0x239   : > { %v1544_v47 = vpop.permute.xlu1 %1543  ;;  %v1542_v52 = vpop.permute.xlu0 %1541 }
 0x23a   : > { %1613 = vst.msk [vmem:[#allocation2 + $0xd8] sm:$0xff] %vm1585_vm7, %v1544_v47  ;;  %1612 = vst.msk [vmem:[#allocation2 + $0xd0] sm:$0xff] %vm1585_vm7, %v1542_v52 }
 0x23b   : > { %2313 = vrot.lane.b32.xlu1 %v4509_v35, %s3700_s30  ;;  %2281 = vrot.lane.b32.xlu0 %v4413_v3, %s3700_s30 }
 0x23d   : > { %v1548_v53 = vpop.permute.xlu1 %1547  ;;  %v1546_v56 = vpop.permute.xlu0 %1545 }
 0x23e   : > { %1615 = vst.msk [vmem:[#allocation2 + $0xe8] sm:$0xff] %vm1585_vm7, %v1548_v53  ;;  %1614 = vst.msk [vmem:[#allocation2 + $0xe0] sm:$0xff] %vm1585_vm7, %v1546_v56  ;;  %v3331_v53 = vld [vmem:[%s3747_s19 + $0xb3] sm:$0xff] }
 0x23f   : > { %1729 = vrot.lane.b32.xlu1 %v4473_v23, %s3697_s27  ;;  %1697 = vrot.lane.b32.xlu0 %v4377_v55, %s3697_s27 }
 0x241   : > { %v1552_v57 = vpop.permute.xlu1 %1551  ;;  %v1550_v60 = vpop.permute.xlu0 %1549 }
 0x242   : > { %1617 = vst.msk [vmem:[#allocation2 + $0xf8] sm:$0xff] %vm1585_vm7, %v1552_v57  ;;  %1616 = vst.msk [vmem:[#allocation2 + $0xf0] sm:$0xff] %vm1585_vm7, %v1550_v60 }
 0x243   : > { %2315 = vrot.lane.b32.xlu1 %v4506_v34, %s3700_s30  ;;  %2283 = vrot.lane.b32.xlu0 %v4410_v2, %s3700_s30 }
 0x245   : > { %v1688_v0 = vpop.permute.xlu1 %1687  ;;  %v1686_v23 = vpop.permute.xlu0 %1685 }
 0x246   : > { %1783 = vst.msk [vmem:[#allocation2 + $0x8] sm:$0xff] %vm1781_vm8, %v1688_v0  ;;  %1782 = vst.msk [vmem:[#allocation2] sm:$0xff] %vm1781_vm8, %v1686_v23 }
 0x247   : > { %2509 = vrot.lane.b32.xlu1 %v4692_v61, %s3701_s4  ;;  %2477 = vrot.lane.b32.xlu0 %v4425_v7, %s3701_s4 }
 0x249   : > { %v1718_v55 = vpop.permute.xlu1 %1717  ;;  %v1690_v1 = vpop.permute.xlu0 %1689 }
 0x24a   : > { %1798 = vst.msk [vmem:[#allocation2 + $0x80] sm:$0xff] %vm1781_vm8, %v1718_v55  ;;  %1784 = vst.msk [vmem:[#allocation2 + $0x10] sm:$0xff] %vm1781_vm8, %v1690_v1  ;;  %v4891_v55 = vld [vmem:[%s3747_s19 + $0xf3] sm:$0xff] }
 0x24b   : > { %1731 = vrot.lane.b32.xlu1 %v4470_v22, %s3697_s27  ;;  %1699 = vrot.lane.b32.xlu0 %v4374_v54, %s3697_s27 }
 0x24d   : > { %v1882_v4 = vpop.permute.xlu1 %1881  ;;  %v1720_v5 = vpop.permute.xlu0 %1719 }
 0x24e   : > { %1978 = vst.msk [vmem:[#allocation2] sm:$0xff] %vm1977_vm9, %v1882_v4 }
 0x24f   : > { %1799 = vst.msk [vmem:[#allocation2 + $0x88] sm:$0xff] %vm1781_vm8, %v1720_v5  ;;  %1925 = vrot.lane.b32.xlu1 %v4485_v27, %s3698_s28  ;;  %1893 = vrot.lane.b32.xlu0 %v4389_v59, %s3698_s28 }
 0x251   : > { %v1884_v9 = vpop.permute.xlu1 %1883  ;;  %v1914_v22 = vpop.permute.xlu0 %1913 }
 0x252   : > { %1979 = vst.msk [vmem:[#allocation2 + $0x8] sm:$0xff] %vm1977_vm9, %v1884_v9  ;;  %1994 = vst.msk [vmem:[#allocation2 + $0x80] sm:$0xff] %vm1977_vm9, %v1914_v22  ;;  %v4906_v22 = vld [vmem:[%s3747_s19 + $0xfb] sm:$0xff] }
 0x253   : > { %2511 = vrot.lane.b32.xlu1 %v4713_v8, %s3701_s4  ;;  %2479 = vrot.lane.b32.xlu0 %v4422_v6, %s3701_s4 }
 0x255   : > { %v2078_v54 = vpop.permute.xlu1 %2077  ;;  %v1916_v12 = vpop.permute.xlu0 %1915 }
 0x256   : > { %2174 = vst.msk [vmem:[#allocation2] sm:$0xff] %vm2173_vm10, %v2078_v54 }
 0x257   : > { %1995 = vst.msk [vmem:[#allocation2 + $0x88] sm:$0xff] %vm1977_vm9, %v1916_v12  ;;  %1927 = vrot.lane.b32.xlu1 %v4482_v26, %s3698_s28  ;;  %1895 = vrot.lane.b32.xlu0 %v4386_v58, %s3698_s28 }
 0x259   : > { %v2080_v13 = vpop.permute.xlu1 %2079  ;;  %v2110_v16 = vpop.permute.xlu0 %2109 }
 0x25a   : > { %2175 = vst.msk [vmem:[#allocation2 + $0x8] sm:$0xff] %vm2173_vm10, %v2080_v13  ;;  %2190 = vst.msk [vmem:[#allocation2 + $0x80] sm:$0xff] %vm2173_vm10, %v2110_v16  ;;  %v4922_v13 = vld [vmem:[%s3747_s19 + $0x10b] sm:$0xff] }
 0x25b   : > { %2121 = vrot.lane.b32.xlu1 %v4509_v35, %s3699_s29  ;;  %2089 = vrot.lane.b32.xlu0 %v4413_v3, %s3699_s29 }
 0x25d   : > { %v2274_v46 = vpop.permute.xlu1 %2273  ;;  %v2112_v17 = vpop.permute.xlu0 %2111 }
 0x25e   : > { %2370 = vst.msk [vmem:[#allocation2] sm:$0xff] %vm2369_vm11, %v2274_v46 }
 0x25f   : > { %2191 = vst.msk [vmem:[#allocation2 + $0x88] sm:$0xff] %vm2173_vm10, %v2112_v17  ;;  %2123 = vrot.lane.b32.xlu1 %v4506_v34, %s3699_s29  ;;  %2091 = vrot.lane.b32.xlu0 %v4410_v2, %s3699_s29 }
 0x261   : > { %v1722_v20 = vpop.permute.xlu1 %1721  ;;  %v2306_v21 = vpop.permute.xlu0 %2305 }
 0x262   : > { %1800 = vst.msk [vmem:[#allocation2 + $0x90] sm:$0xff] %vm1781_vm8, %v1722_v20 }
 0x263   : > { %2386 = vst.msk [vmem:[#allocation2 + $0x80] sm:$0xff] %vm2369_vm11, %v2306_v21  ;;  %2317 = vrot.lane.b32.xlu1 %v4692_v61, %s3700_s30  ;;  %2285 = vrot.lane.b32.xlu0 %v4425_v7, %s3700_s30  ;;  %v4936_v21 = vld [vmem:[%s3747_s19 + $0xc3] sm:$0xff] }
 0x265   : > { %v2308_v24 = vpop.permute.xlu1 %2307  ;;  %v2276_v25 = vpop.permute.xlu0 %2275 }
 0x266   : > { %2387 = vst.msk [vmem:[#allocation2 + $0x88] sm:$0xff] %vm2369_vm11, %v2308_v24  ;;  %2371 = vst.msk [vmem:[#allocation2 + $0x8] sm:$0xff] %vm2369_vm11, %v2276_v25 }
 0x267   : > { %1733 = vrot.lane.b32.xlu1 %v4485_v27, %s3697_s27  ;;  %1701 = vrot.lane.b32.xlu0 %v4389_v59, %s3697_s27  ;;  %v4762_v59 = vld [vmem:[%s3747_s19 + $0x19b] sm:$0xff] }
 0x269   : > { %v2502_v2 = vpop.permute.xlu1 %2501  ;;  %v2470_v28 = vpop.permute.xlu0 %2469 }
 0x26a   : > { %2582 = vst.msk [vmem:[#allocation2 + $0x80] sm:$0xff] %vm2565_vm12, %v2502_v2  ;;  %2566 = vst.msk [vmem:[#allocation2] sm:$0xff] %vm2565_vm12, %v2470_v28  ;;  %v4952_v2 = vld [vmem:[%s3747_s19 + $0x113] sm:$0xff] }
 0x26b   : > { %2615 = vst.msk [vmem:[#allocation2 + $0x80] sm:$0xff] %vm2598_vm13, %v3702_v29  ;;  %2599 = vst.msk [vmem:[#allocation2] sm:$0xff] %vm2598_vm13, %v3702_v29  ;;  %2319 = vrot.lane.b32.xlu1 %v4713_v8, %s3700_s30  ;;  %2287 = vrot.lane.b32.xlu0 %v4422_v6, %s3700_s30 }
 0x26d   : > { %v1724_v27 = vpop.permute.xlu1 %1723  ;;  %v1692_v32 = vpop.permute.xlu0 %1691 }
 0x26e   : > { %1801 = vst.msk [vmem:[#allocation2 + $0x98] sm:$0xff] %vm1781_vm8, %v1724_v27  ;;  %1785 = vst.msk [vmem:[#allocation2 + $0x18] sm:$0xff] %vm1781_vm8, %v1692_v32  ;;  %v2663_v32 = vld [vmem:[%s5332_s1] sm:$0xff] }
 0x26f   : > { %2513 = vrot.lane.b32.xlu1 %v4762_v59, %s3701_s4  ;;  %2481 = vrot.lane.b32.xlu0 %v4437_v11, %s3701_s4 }
 0x271   : > { %v1918_v33 = vpop.permute.xlu1 %1917  ;;  %v1886_v36 = vpop.permute.xlu0 %1885 }
 0x272   : > { %1996 = vst.msk [vmem:[#allocation2 + $0x90] sm:$0xff] %vm1977_vm9, %v1918_v33  ;;  %1980 = vst.msk [vmem:[#allocation2 + $0x10] sm:$0xff] %vm1977_vm9, %v1886_v36  ;;  %v2664_v33 = vld [vmem:[%s5332_s1 + $0x8] sm:$0xff] }
 0x273   : > { %1735 = vrot.lane.b32.xlu1 %v4482_v26, %s3697_s27  ;;  %1703 = vrot.lane.b32.xlu0 %v4386_v58, %s3697_s27  ;;  %v4787_v26 = vld [vmem:[%s3747_s19 + $0x1a3] sm:$0xff]  ;;  %v4967_v36 = vld [vmem:[%s3747_s19 + $0xcb] sm:$0xff] }
 0x275   : > { %v2504_v37 = vpop.permute.xlu1 %2503  ;;  %v2472_v38 = vpop.permute.xlu0 %2471 }
 0x276   : > { %2583 = vst.msk [vmem:[#allocation2 + $0x88] sm:$0xff] %vm2565_vm12, %v2504_v37  ;;  %2567 = vst.msk [vmem:[#allocation2 + $0x8] sm:$0xff] %vm2565_vm12, %v2472_v38  ;;  %v3580_v37 = vpack.c.bf16 %v2664_v33, %v2663_v32 }
 0x277   : > { %2616 = vst.msk [vmem:[#allocation2 + $0x88] sm:$0xff] %vm2598_vm13, %v3702_v29  ;;  %2600 = vst.msk [vmem:[#allocation2 + $0x8] sm:$0xff] %vm2598_vm13, %v3702_v29  ;;  %1929 = vrot.lane.b32.xlu1 %v4497_v31, %s3698_s28  ;;  %1897 = vrot.lane.b32.xlu0 %v4401_v63, %s3698_s28 }
 0x278   : > { %3581 = vmatprep.subr.bf16.mxu0 %v3580_v37  ;;  %3612 = vmatprep.subr.bf16.mxu1 %v3580_v37 }
 0x279   : > { %v1920_v58 = vpop.permute.xlu1 %1919  ;;  %v1888_v39 = vpop.permute.xlu0 %1887  ;;  %3583 = vmatpush3.bf16.msra.mxu0 %v3580_v37  ;;  %3620 = vmatpush3.bf16.msra.mxu1 %v3580_v37 }
 0x27a   : > { %1997 = vst.msk [vmem:[#allocation2 + $0x98] sm:$0xff] %vm1977_vm9, %v1920_v58  ;;  %1981 = vst.msk [vmem:[#allocation2 + $0x18] sm:$0xff] %vm1977_vm9, %v1888_v39  ;;  %v2665_v39 = vld [vmem:[%s5332_s1 + $0x10] sm:$0xff] }
 0x27b   : > { %2515 = vrot.lane.b32.xlu1 %v4787_v26, %s3701_s4  ;;  %2483 = vrot.lane.b32.xlu0 %v4434_v10, %s3701_s4 }
 0x27d   : > { %v2114_v51 = vpop.permute.xlu1 %2113  ;;  %v2082_v19 = vpop.permute.xlu0 %2081 }
 0x27e   : > { %2192 = vst.msk [vmem:[#allocation2 + $0x90] sm:$0xff] %vm2173_vm10, %v2114_v51  ;;  %2176 = vst.msk [vmem:[#allocation2 + $0x10] sm:$0xff] %vm2173_vm10, %v2082_v19  ;;  %v2666_v51 = vld [vmem:[%s5332_s1 + $0x18] sm:$0xff] }
 0x27f   : > { %1931 = vrot.lane.b32.xlu1 %v4494_v30, %s3698_s28  ;;  %1899 = vrot.lane.b32.xlu0 %v4398_v62, %s3698_s28  ;;  %v3584_v19 = vpack.c.bf16 %v2666_v51, %v2665_v39 }
 0x281   : > { %v2116_v40 = vpop.permute.xlu1 %2115  ;;  %v2084_v41 = vpop.permute.xlu0 %2083  ;;  %3585 = vmatprep.subr.bf16.mxu0 %v3584_v19  ;;  %3613 = vmatprep.subr.bf16.mxu1 %v3584_v19 }
 0x282   : > { %2193 = vst.msk [vmem:[#allocation2 + $0x98] sm:$0xff] %vm2173_vm10, %v2116_v40  ;;  %2177 = vst.msk [vmem:[#allocation2 + $0x18] sm:$0xff] %vm2173_vm10, %v2084_v41  ;;  %3587 = vmatpush3.bf16.msra.mxu0 %v3584_v19  ;;  %3621 = vmatpush3.bf16.msra.mxu1 %v3584_v19 }
 0x283   : > { %2125 = vrot.lane.b32.xlu1 %v4692_v61, %s3699_s29  ;;  %2093 = vrot.lane.b32.xlu0 %v4425_v7, %s3699_s29 }
 0x285   : > { %v2310_v44 = vpop.permute.xlu1 %2309  ;;  %v2278_v45 = vpop.permute.xlu0 %2277 }
 0x286   : > { %2388 = vst.msk [vmem:[#allocation2 + $0x90] sm:$0xff] %vm2369_vm11, %v2310_v44  ;;  %2372 = vst.msk [vmem:[#allocation2 + $0x10] sm:$0xff] %vm2369_vm11, %v2278_v45  ;;  %v2667_v44 = vld [vmem:[%s5332_s1 + $0x20] sm:$0xff]  ;;  %v2668_v45 = vld [vmem:[%s5332_s1 + $0x28] sm:$0xff] }
 0x287   : > { %2127 = vrot.lane.b32.xlu1 %v4713_v8, %s3699_s29  ;;  %2095 = vrot.lane.b32.xlu0 %v4422_v6, %s3699_s29 }
 0x289   : > { %v1726_v50 = vpop.permute.xlu1 %1725  ;;  %v1694_v18 = vpop.permute.xlu0 %1693 }
 0x28a   : > { %1802 = vst.msk [vmem:[#allocation2 + $0xa0] sm:$0xff] %vm1781_vm8, %v1726_v50  ;;  %1786 = vst.msk [vmem:[#allocation2 + $0x20] sm:$0xff] %vm1781_vm8, %v1694_v18  ;;  %v3588_v50 = vpack.c.bf16 %v2668_v45, %v2667_v44 }
 0x28b   : > { %2321 = vrot.lane.b32.xlu1 %v4762_v59, %s3700_s30  ;;  %2289 = vrot.lane.b32.xlu0 %v4437_v11, %s3700_s30 }
 0x28c   : > { %3589 = vmatprep.subr.bf16.mxu0 %v3588_v50  ;;  %3614 = vmatprep.subr.bf16.mxu1 %v3588_v50 }
 0x28d   : > { %v2312_v7 = vpop.permute.xlu1 %2311  ;;  %v2280_v42 = vpop.permute.xlu0 %2279  ;;  %3591 = vmatpush3.bf16.msra.mxu0 %v3588_v50  ;;  %3622 = vmatpush3.bf16.msra.mxu1 %v3588_v50 }
 0x28e   : > { %2389 = vst.msk [vmem:[#allocation2 + $0x98] sm:$0xff] %vm2369_vm11, %v2312_v7  ;;  %2373 = vst.msk [vmem:[#allocation2 + $0x18] sm:$0xff] %vm2369_vm11, %v2280_v42  ;;  %v2669_v42 = vld [vmem:[%s5332_s1 + $0x30] sm:$0xff] }
 0x28f   : > { %1737 = vrot.lane.b32.xlu1 %v4497_v31, %s3697_s27  ;;  %1705 = vrot.lane.b32.xlu0 %v4401_v63, %s3697_s27  ;;  %v4836_v31 = vld [vmem:[%s3747_s19 + $0x1b3] sm:$0xff] }
 0x291   : > { %v2506_v6 = vpop.permute.xlu1 %2505  ;;  %v2474_v43 = vpop.permute.xlu0 %2473 }
 0x292   : > { %2584 = vst.msk [vmem:[#allocation2 + $0x90] sm:$0xff] %vm2565_vm12, %v2506_v6  ;;  %2568 = vst.msk [vmem:[#allocation2 + $0x10] sm:$0xff] %vm2565_vm12, %v2474_v43  ;;  %v2670_v6 = vld [vmem:[%s5332_s1 + $0x38] sm:$0xff] }
 0x293   : > { %2617 = vst.msk [vmem:[#allocation2 + $0x90] sm:$0xff] %vm2598_vm13, %v3702_v29  ;;  %2601 = vst.msk [vmem:[#allocation2 + $0x10] sm:$0xff] %vm2598_vm13, %v3702_v29  ;;  %2323 = vrot.lane.b32.xlu1 %v4787_v26, %s3700_s30  ;;  %2291 = vrot.lane.b32.xlu0 %v4434_v10, %s3700_s30  ;;  %v3592_v43 = vpack.c.bf16 %v2670_v6, %v2669_v42  ;;  %v3447_v6 = vld [vmem:[%s3747_s19 + $0x203] sm:$0xff] }
 0x295   : > { %v1728_v63 = vpop.permute.xlu1 %1727  ;;  %v1696_v48 = vpop.permute.xlu0 %1695  ;;  %3593 = vmatprep.subr.bf16.mxu0 %v3592_v43  ;;  %3615 = vmatprep.subr.bf16.mxu1 %v3592_v43 }
 0x296   : > { %1803 = vst.msk [vmem:[#allocation2 + $0xa8] sm:$0xff] %vm1781_vm8, %v1728_v63  ;;  %1787 = vst.msk [vmem:[#allocation2 + $0x28] sm:$0xff] %vm1781_vm8, %v1696_v48  ;;  %v2671_v48 = vld [vmem:[%s5332_s1 + $0x40] sm:$0xff]  ;;  %3595 = vmatpush3.bf16.msra.mxu0 %v3592_v43  ;;  %3623 = vmatpush3.bf16.msra.mxu1 %v3592_v43 }
 0x297   : > { %2517 = vrot.lane.b32.xlu1 %v4836_v31, %s3701_s4  ;;  %2485 = vrot.lane.b32.xlu0 %v4449_v15, %s3701_s4  ;;  %v3431_v43 = vld [vmem:[%s3747_s19 + $0x143] sm:$0xff] }
 0x299   : > { %v1922_v49 = vpop.permute.xlu1 %1921  ;;  %v1890_v47 = vpop.permute.xlu0 %1889 }
 0x29a   : > { %1998 = vst.msk [vmem:[#allocation2 + $0xa0] sm:$0xff] %vm1977_vm9, %v1922_v49  ;;  %1982 = vst.msk [vmem:[#allocation2 + $0x20] sm:$0xff] %vm1977_vm9, %v1890_v47  ;;  %v2672_v49 = vld [vmem:[%s5332_s1 + $0x48] sm:$0xff] }
 0x29b   : > { %1739 = vrot.lane.b32.xlu1 %v4494_v30, %s3697_s27  ;;  %1707 = vrot.lane.b32.xlu0 %v4398_v62, %s3697_s27  ;;  %v4861_v62 = vld [vmem:[%s3747_s19 + $0x1bb] sm:$0xff]  ;;  %v3596_v47 = vpack.c.bf16 %v2672_v49, %v2671_v48 }
 0x29d   : > { %v2508_v10 = vpop.permute.xlu1 %2507  ;;  %v2476_v52 = vpop.permute.xlu0 %2475  ;;  %3597 = vmatprep.subr.bf16.mxu0 %v3596_v47  ;;  %3616 = vmatprep.subr.bf16.mxu1 %v3596_v47 }
 0x29e   : > { %2585 = vst.msk [vmem:[#allocation2 + $0x98] sm:$0xff] %vm2565_vm12, %v2508_v10  ;;  %2569 = vst.msk [vmem:[#allocation2 + $0x18] sm:$0xff] %vm2565_vm12, %v2476_v52  ;;  %3599 = vmatpush3.bf16.msra.mxu0 %v3596_v47  ;;  %3624 = vmatpush3.bf16.msra.mxu1 %v3596_v47 }
 0x29f   : > { %2618 = vst.msk [vmem:[#allocation2 + $0x98] sm:$0xff] %vm2598_vm13, %v3702_v29  ;;  %2602 = vst.msk [vmem:[#allocation2 + $0x18] sm:$0xff] %vm2598_vm13, %v3702_v29  ;;  %1933 = vrot.lane.b32.xlu1 %v4509_v35, %s3698_s28  ;;  %1901 = vrot.lane.b32.xlu0 %v4413_v3, %s3698_s28 }
 0x2a1   : > { %v1924_v15 = vpop.permute.xlu1 %1923  ;;  %v1892_v30 = vpop.permute.xlu0 %1891 }
 0x2a2   : > { %1999 = vst.msk [vmem:[#allocation2 + $0xa8] sm:$0xff] %vm1977_vm9, %v1924_v15  ;;  %1983 = vst.msk [vmem:[#allocation2 + $0x28] sm:$0xff] %vm1977_vm9, %v1892_v30  ;;  %v2674_v15 = vld [vmem:[%s5332_s1 + $0x58] sm:$0xff] }
 0x2a3   : > { %2519 = vrot.lane.b32.xlu1 %v4861_v62, %s3701_s4  ;;  %2487 = vrot.lane.b32.xlu0 %v4446_v14, %s3701_s4  ;;  %v4882_v14 = vld [vmem:[%s3747_s19 + $0xe3] sm:$0xff] }
 0x2a5   : > { %v2118_v56 = vpop.permute.xlu1 %2117  ;;  %v2086_v57 = vpop.permute.xlu0 %2085 }
 0x2a6   : > { %2194 = vst.msk [vmem:[#allocation2 + $0xa0] sm:$0xff] %vm2173_vm10, %v2118_v56  ;;  %2178 = vst.msk [vmem:[#allocation2 + $0x20] sm:$0xff] %vm2173_vm10, %v2086_v57  ;;  %v2676_v57 = vld [vmem:[%s5332_s1 + $0x68] sm:$0xff]  ;;  %v2634_v32 = vld [vmem:[#allocation2 + $0x18] sm:$0xff] }
 0x2a7   : > { %1935 = vrot.lane.b32.xlu1 %v4506_v34, %s3698_s28  ;;  %1903 = vrot.lane.b32.xlu0 %v3331_v53, %s3698_s28  ;;  %v2650_v33 = vld [vmem:[#allocation2 + $0x98] sm:$0xff] }
 0x2a9   : > { %v2120_v3 = vpop.permute.xlu1 %2119  ;;  %v2088_v60 = vpop.permute.xlu0 %2087 }
 0x2aa   : > { %2195 = vst.msk [vmem:[#allocation2 + $0xa8] sm:$0xff] %vm2173_vm10, %v2120_v3  ;;  %2179 = vst.msk [vmem:[#allocation2 + $0x28] sm:$0xff] %vm2173_vm10, %v2088_v60  ;;  %v5046_v3 = vld [vmem:[%s3747_s19 + $0x1e3] sm:$0xff] }
 0x2ab   : > { %2129 = vrot.lane.b32.xlu1 %v4762_v59, %s3699_s29  ;;  %2097 = vrot.lane.b32.xlu0 %v4437_v11, %s3699_s29  ;;  %v3300_v11 = vld [vmem:[%s3747_s19 + $0xab] sm:$0xff]  ;;  %v5049_v60 = vld [vmem:[%s3747_s19 + $0x123] sm:$0xff] }
 0x2ad   : > { %v2314_v0 = vpop.permute.xlu1 %2313  ;;  %v2282_v23 = vpop.permute.xlu0 %2281 }
 0x2ae   : > { %2390 = vst.msk [vmem:[#allocation2 + $0xa0] sm:$0xff] %vm2369_vm11, %v2314_v0  ;;  %2374 = vst.msk [vmem:[#allocation2 + $0x20] sm:$0xff] %vm2369_vm11, %v2282_v23 }
 0x2af   : > { %2131 = vrot.lane.b32.xlu1 %v4787_v26, %s3699_s29  ;;  %2099 = vrot.lane.b32.xlu0 %v4882_v14, %s3699_s29 }
 0x2b1   : > { %v1730_v1 = vpop.permute.xlu1 %1729  ;;  %v1698_v4 = vpop.permute.xlu0 %1697 }
 0x2b2   : > { %1804 = vst.msk [vmem:[#allocation2 + $0xb0] sm:$0xff] %vm1781_vm8, %v1730_v1  ;;  %1788 = vst.msk [vmem:[#allocation2 + $0x30] sm:$0xff] %vm1781_vm8, %v1698_v4  ;;  %v2677_v1 = vld [vmem:[%s5332_s1 + $0x70] sm:$0xff]  ;;  %v2678_v4 = vld [vmem:[%s5332_s1 + $0x78] sm:$0xff] }
 0x2b3   : > { %2325 = vrot.lane.b32.xlu1 %v4836_v31, %s3700_s30  ;;  %2293 = vrot.lane.b32.xlu0 %v4891_v55, %s3700_s30 }
 0x2b5   : > { %v2316_v5 = vpop.permute.xlu1 %2315  ;;  %v2284_v9 = vpop.permute.xlu0 %2283 }
 0x2b6   : > { %2391 = vst.msk [vmem:[#allocation2 + $0xa8] sm:$0xff] %vm2369_vm11, %v2316_v5  ;;  %2375 = vst.msk [vmem:[#allocation2 + $0x28] sm:$0xff] %vm2369_vm11, %v2284_v9 }
 0x2b7   : > { %1741 = vrot.lane.b32.xlu1 %v4509_v35, %s3697_s27  ;;  %1709 = vrot.lane.b32.xlu0 %v3300_v11, %s3697_s27  ;;  %v4919_v35 = vld [vmem:[%s3747_s19 + $0x1cb] sm:$0xff]  ;;  %v3608_v11 = vpack.c.bf16 %v2678_v4, %v2677_v1 }
 0x2b9   : > { %v2510_v54 = vpop.permute.xlu1 %2509  ;;  %v2478_v12 = vpop.permute.xlu0 %2477 }
 0x2ba   : > { %2586 = vst.msk [vmem:[#allocation2 + $0xa0] sm:$0xff] %vm2565_vm12, %v2510_v54  ;;  %2570 = vst.msk [vmem:[#allocation2 + $0x20] sm:$0xff] %vm2565_vm12, %v2478_v12  ;;  %v2631_v54 = vld [vmem:[#allocation2] sm:$0xff] }
 0x2bb   : > { %2619 = vst.msk [vmem:[#allocation2 + $0xa0] sm:$0xff] %vm2598_vm13, %v3702_v29  ;;  %2603 = vst.msk [vmem:[#allocation2 + $0x20] sm:$0xff] %vm2598_vm13, %v3702_v29  ;;  %2327 = vrot.lane.b32.xlu1 %v4861_v62, %s3700_s30  ;;  %2295 = vrot.lane.b32.xlu0 %v4906_v22, %s3700_s30  ;;  %v2647_v12 = vld [vmem:[#allocation2 + $0x80] sm:$0xff] }
 0x2bc   : > { %3532 = vmatprep.mubr.f32.mxu0 %v2631_v54  ;;  %3556 = vmatprep.mubr.f32.mxu1 %v2647_v12 }
 0x2bd   : > { %v1732_v16 = vpop.permute.xlu1 %1731  ;;  %v1700_v46 = vpop.permute.xlu0 %1699 }
 0x2be   : > { %1805 = vst.msk [vmem:[#allocation2 + $0xb8] sm:$0xff] %vm1781_vm8, %v1732_v16  ;;  %1789 = vst.msk [vmem:[#allocation2 + $0x38] sm:$0xff] %vm1781_vm8, %v1700_v46 }
 0x2bf   : > { %2521 = vrot.lane.b32.xlu1 %v4919_v35, %s3701_s4  ;;  %2489 = vrot.lane.b32.xlu0 %v4922_v13, %s3701_s4 }
 0x2c1   : > { %v1926_v17 = vpop.permute.xlu1 %1925  ;;  %v1894_v20 = vpop.permute.xlu0 %1893 }
 0x2c2   : > { %2000 = vst.msk [vmem:[#allocation2 + $0xb0] sm:$0xff] %vm1977_vm9, %v1926_v17  ;;  %1984 = vst.msk [vmem:[#allocation2 + $0x30] sm:$0xff] %vm1977_vm9, %v1894_v20  ;;  %v2632_v17 = vld [vmem:[#allocation2 + $0x8] sm:$0xff] }
 0x2c3   : > { %1743 = vrot.lane.b32.xlu1 %v4506_v34, %s3697_s27  ;;  %1711 = vrot.lane.b32.xlu0 %v3331_v53, %s3697_s27  ;;  %v4949_v34 = vld [vmem:[%s3747_s19 + $0x1d3] sm:$0xff]  ;;  %v2648_v20 = vld [vmem:[#allocation2 + $0x88] sm:$0xff] }
 0x2c5   : > { %v2512_v24 = vpop.permute.xlu1 %2511  ;;  %v2480_v25 = vpop.permute.xlu0 %2479 }
 0x2c6   : > { %2587 = vst.msk [vmem:[#allocation2 + $0xa8] sm:$0xff] %vm2565_vm12, %v2512_v24  ;;  %2571 = vst.msk [vmem:[#allocation2 + $0x28] sm:$0xff] %vm2565_vm12, %v2480_v25  ;;  %v2633_v24 = vld [vmem:[#allocation2 + $0x10] sm:$0xff] }
 0x2c7   : > { %2620 = vst.msk [vmem:[#allocation2 + $0xa8] sm:$0xff] %vm2598_vm13, %v3702_v29  ;;  %2604 = vst.msk [vmem:[#allocation2 + $0x28] sm:$0xff] %vm2598_vm13, %v3702_v29  ;;  %1937 = vrot.lane.b32.xlu1 %v4692_v61, %s3698_s28  ;;  %1905 = vrot.lane.b32.xlu0 %v4936_v21, %s3698_s28  ;;  %v2649_v25 = vld [vmem:[#allocation2 + $0x90] sm:$0xff] }
 0x2c9   : > { %v1928_v28 = vpop.permute.xlu1 %1927  ;;  %v1896_v27 = vpop.permute.xlu0 %1895 }
 0x2ca   : > { %2001 = vst.msk [vmem:[#allocation2 + $0xb8] sm:$0xff] %vm1977_vm9, %v1928_v28  ;;  %1985 = vst.msk [vmem:[#allocation2 + $0x38] sm:$0xff] %vm1977_vm9, %v1896_v27 }
 0x2cb   : > { %2523 = vrot.lane.b32.xlu1 %v4949_v34, %s3701_s4  ;;  %2491 = vrot.lane.b32.xlu0 %v4952_v2, %s3701_s4 }
 0x2cd   : > { %v2122_v38 = vpop.permute.xlu1 %2121  ;;  %v2090_v58 = vpop.permute.xlu0 %2089 }
 0x2ce   : > { %2196 = vst.msk [vmem:[#allocation2 + $0xb0] sm:$0xff] %vm2173_vm10, %v2122_v38  ;;  %2180 = vst.msk [vmem:[#allocation2 + $0x30] sm:$0xff] %vm2173_vm10, %v2090_v58  ;;  %v2636_v58 = vld [vmem:[#allocation2 + $0x28] sm:$0xff] }
 0x2cf   : > { %1939 = vrot.lane.b32.xlu1 %v4713_v8, %s3698_s28  ;;  %1907 = vrot.lane.b32.xlu0 %v4967_v36, %s3698_s28  ;;  %v2652_v39 = vld [vmem:[#allocation2 + $0xa8] sm:$0xff] }
 0x2d1   : > { %v2124_v40 = vpop.permute.xlu1 %2123  ;;  %v2092_v41 = vpop.permute.xlu0 %2091 }
 0x2d2   : > { %2197 = vst.msk [vmem:[#allocation2 + $0xb8] sm:$0xff] %vm2173_vm10, %v2124_v40  ;;  %2181 = vst.msk [vmem:[#allocation2 + $0x38] sm:$0xff] %vm2173_vm10, %v2092_v41 }
 0x2d3   : > { %2133 = vrot.lane.b32.xlu1 %v4836_v31, %s3699_s29  ;;  %2101 = vrot.lane.b32.xlu0 %v4891_v55, %s3699_s29 }
 0x2d5   : > { %v2318_v18 = vpop.permute.xlu1 %2317  ;;  %v2286_v7 = vpop.permute.xlu0 %2285 }
 0x2d6   : > { %2392 = vst.msk [vmem:[#allocation2 + $0xb0] sm:$0xff] %vm2369_vm11, %v2318_v18  ;;  %2376 = vst.msk [vmem:[#allocation2 + $0x30] sm:$0xff] %vm2369_vm11, %v2286_v7 }
 0x2d7   : > { %2135 = vrot.lane.b32.xlu1 %v4861_v62, %s3699_s29  ;;  %2103 = vrot.lane.b32.xlu0 %v4906_v22, %s3699_s29  ;;  %v2673_v62 = vld [vmem:[%s5332_s1 + $0x50] sm:$0xff]  ;;  %v3334_v22 = vld [vmem:[%s3747_s19 + $0xdb] sm:$0xff] }
 0x2d8   : > { %v3600_v30 = vpack.c.bf16 %v2674_v15, %v2673_v62 }
 0x2d9   : > { %v1734_v31 = vpop.permute.xlu1 %1733  ;;  %v1702_v63 = vpop.permute.xlu0 %1701 }
 0x2da   : > { %1806 = vst.msk [vmem:[#allocation2 + $0xc0] sm:$0xff] %vm1781_vm8, %v1734_v31  ;;  %1790 = vst.msk [vmem:[#allocation2 + $0x40] sm:$0xff] %vm1781_vm8, %v1702_v63  ;;  %3601 = vmatprep.subr.bf16.mxu0 %v3600_v30  ;;  %3617 = vmatprep.subr.bf16.mxu1 %v3600_v30 }
 0x2db   : > { %2329 = vrot.lane.b32.xlu1 %v4919_v35, %s3700_s30  ;;  %2297 = vrot.lane.b32.xlu0 %v4922_v13, %s3700_s30 }
 0x2dc   : > { %3603 = vmatpush3.bf16.msra.mxu0 %v3600_v30  ;;  %3625 = vmatpush3.bf16.msra.mxu1 %v3600_v30 }
 0x2dd   : > { %v2320_v10 = vpop.permute.xlu1 %2319  ;;  %v2288_v52 = vpop.permute.xlu0 %2287 }
 0x2de   : > { %2393 = vst.msk [vmem:[#allocation2 + $0xb8] sm:$0xff] %vm2369_vm11, %v2320_v10  ;;  %2377 = vst.msk [vmem:[#allocation2 + $0x38] sm:$0xff] %vm2369_vm11, %v2288_v52 }
 0x2df   : > { %1745 = vrot.lane.b32.xlu1 %v4692_v61, %s3697_s27  ;;  %1713 = vrot.lane.b32.xlu0 %v4936_v21, %s3697_s27  ;;  %v2675_v61 = vld [vmem:[%s5332_s1 + $0x60] sm:$0xff]  ;;  %v3429_v21 = vld [vmem:[%s3747_s19 + $0x12b] sm:$0xff] }
 0x2e0   : > { %v3604_v0 = vpack.c.bf16 %v2676_v57, %v2675_v61 }
 0x2e1   : > { %v2514_v53 = vpop.permute.xlu1 %2513  ;;  %v2482_v56 = vpop.permute.xlu0 %2481 }
 0x2e2   : > { %2588 = vst.msk [vmem:[#allocation2 + $0xb0] sm:$0xff] %vm2565_vm12, %v2514_v53  ;;  %2572 = vst.msk [vmem:[#allocation2 + $0x30] sm:$0xff] %vm2565_vm12, %v2482_v56  ;;  %3605 = vmatprep.subr.bf16.mxu0 %v3604_v0  ;;  %3618 = vmatprep.subr.bf16.mxu1 %v3604_v0 }
 0x2e3   : > { %2621 = vst.msk [vmem:[#allocation2 + $0xb0] sm:$0xff] %vm2598_vm13, %v3702_v29  ;;  %2605 = vst.msk [vmem:[#allocation2 + $0x30] sm:$0xff] %vm2598_vm13, %v3702_v29  ;;  %2331 = vrot.lane.b32.xlu1 %v4949_v34, %s3700_s30  ;;  %2299 = vrot.lane.b32.xlu0 %v4952_v2, %s3700_s30 }
 0x2e4   : > { %3607 = vmatpush3.bf16.msra.mxu0 %v3604_v0  ;;  %3626 = vmatpush3.bf16.msra.mxu1 %v3604_v0 }
 0x2e5   : > { %v1736_v23 = vpop.permute.xlu1 %1735  ;;  %v1704_v55 = vpop.permute.xlu0 %1703  ;;  %3609 = vmatprep.subr.bf16.mxu0 %v3608_v11  ;;  %3619 = vmatprep.subr.bf16.mxu1 %v3608_v11 }
 0x2e6   : > { %1807 = vst.msk [vmem:[#allocation2 + $0xc8] sm:$0xff] %vm1781_vm8, %v1736_v23  ;;  %1791 = vst.msk [vmem:[#allocation2 + $0x48] sm:$0xff] %vm1781_vm8, %v1704_v55 }
 0x2e7   : > { %2525 = vrot.lane.b32.xlu1 %v5046_v3, %s3701_s4  ;;  %2493 = vrot.lane.b32.xlu0 %v5049_v60, %s3701_s4 }
 0x2e8   : > { %3611 = vmatpush3.bf16.msra.mxu0 %v3608_v11  ;;  %3627 = vmatpush3.bf16.msra.mxu1 %v3608_v11 }
 0x2e9   : > { %v1930_v5 = vpop.permute.xlu1 %1929  ;;  %v1898_v9 = vpop.permute.xlu0 %1897 }
 0x2ea   : > { %2002 = vst.msk [vmem:[#allocation2 + $0xc0] sm:$0xff] %vm1977_vm9, %v1930_v5  ;;  %1986 = vst.msk [vmem:[#allocation2 + $0x40] sm:$0xff] %vm1977_vm9, %v1898_v9  ;;  %v2637_v51 = vld [vmem:[#allocation2 + $0x30] sm:$0xff] }
 0x2eb   : > { %1747 = vrot.lane.b32.xlu1 %v4713_v8, %s3697_s27  ;;  %1715 = vrot.lane.b32.xlu0 %v4967_v36, %s3697_s27  ;;  %v3445_v8 = vld [vmem:[%s3747_s19 + $0x1eb] sm:$0xff]  ;;  %v2651_v36 = vld [vmem:[#allocation2 + $0xa0] sm:$0xff] }
 0x2ec   : > { %3533 = vmatmul.mubr.f32.vlgmr.msra.gmra.mrb[0].mxu0 %v2632_v17  ;;  %3557 = vmatmul.mubr.f32.vlgmr.msra.gmra.mrb[0].mxu1 %v2648_v20  ;;  %v2653_v19 = vld [vmem:[#allocation2 + $0xb0] sm:$0xff] }
 0x2ed   : > { %v2516_v16 = vpop.permute.xlu1 %2515  ;;  %v2484_v46 = vpop.permute.xlu0 %2483  ;;  %3535 = vmatprep.mubr.f32.mxu0 %v2633_v24  ;;  %3559 = vmatprep.mubr.f32.mxu1 %v2649_v25 }
 0x2ee   : > { %2589 = vst.msk [vmem:[#allocation2 + $0xb8] sm:$0xff] %vm2565_vm12, %v2516_v16  ;;  %2573 = vst.msk [vmem:[#allocation2 + $0x38] sm:$0xff] %vm2565_vm12, %v2484_v46 }
 0x2ef   : > { %2622 = vst.msk [vmem:[#allocation2 + $0xb8] sm:$0xff] %vm2598_vm13, %v3702_v29  ;;  %2606 = vst.msk [vmem:[#allocation2 + $0x38] sm:$0xff] %vm2598_vm13, %v3702_v29  ;;  %1941 = vrot.lane.b32.xlu1 %v4762_v59, %s3698_s28  ;;  %1909 = vrot.lane.b32.xlu0 %v3334_v22, %s3698_s28  ;;  %v2635_v59 = vld [vmem:[#allocation2 + $0x20] sm:$0xff] }
 0x2f0   : > { %3536 = vmatmul.mubr.f32.gmra.mrb[2].mxu0 %v2634_v32  ;;  %3560 = vmatmul.mubr.f32.gmra.mrb[2].mxu1 %v2650_v33 }
 0x2f1   : > { %v1932_v28 = vpop.permute.xlu1 %1931  ;;  %v1900_v27 = vpop.permute.xlu0 %1899  ;;  %3538 = vmatprep.mubr.f32.mxu0 %v2635_v59  ;;  %3562 = vmatprep.mubr.f32.mxu1 %v2651_v36 }
 0x2f2   : > { %2003 = vst.msk [vmem:[#allocation2 + $0xc8] sm:$0xff] %vm1977_vm9, %v1932_v28  ;;  %1987 = vst.msk [vmem:[#allocation2 + $0x48] sm:$0xff] %vm1977_vm9, %v1900_v27 }
 0x2f3   : > { %2527 = vrot.lane.b32.xlu1 %v3445_v8, %s3701_s4  ;;  %2495 = vrot.lane.b32.xlu0 %v3429_v21, %s3701_s4 }
 0x2f4   : > { %3539 = vmatmul.mubr.f32.gmra.mrb[4].mxu0 %v2636_v58  ;;  %3563 = vmatmul.mubr.f32.gmra.mrb[4].mxu1 %v2652_v39 }
 0x2f5   : > { %v2126_v37 = vpop.permute.xlu1 %2125  ;;  %v2094_v38 = vpop.permute.xlu0 %2093  ;;  %3541 = vmatprep.mubr.f32.mxu0 %v2637_v51  ;;  %3565 = vmatprep.mubr.f32.mxu1 %v2653_v19 }
 0x2f6   : > { %2198 = vst.msk [vmem:[#allocation2 + $0xc0] sm:$0xff] %vm2173_vm10, %v2126_v37  ;;  %2182 = vst.msk [vmem:[#allocation2 + $0x40] sm:$0xff] %vm2173_vm10, %v2094_v38  ;;  %v2638_v44 = vld [vmem:[#allocation2 + $0x38] sm:$0xff] }
 0x2f7   : > { %1943 = vrot.lane.b32.xlu1 %v4787_v26, %s3698_s28  ;;  %1911 = vrot.lane.b32.xlu0 %v4882_v14, %s3698_s28  ;;  %v2654_v45 = vld [vmem:[#allocation2 + $0xb8] sm:$0xff] }
 0x2f8   : > { %3542 = vmatmul.mubr.f32.gmra.mrb[6].mxu0 %v2638_v44  ;;  %3566 = vmatmul.mubr.f32.gmra.mrb[6].mxu1 %v2654_v45 }
 0x2f9   : > { %v2128_v40 = vpop.permute.xlu1 %2127  ;;  %v2096_v41 = vpop.permute.xlu0 %2095 }
 0x2fa   : > { %2199 = vst.msk [vmem:[#allocation2 + $0xc8] sm:$0xff] %vm2173_vm10, %v2128_v40  ;;  %2183 = vst.msk [vmem:[#allocation2 + $0x48] sm:$0xff] %vm2173_vm10, %v2096_v41 }
 0x2fb   : > { %2137 = vrot.lane.b32.xlu1 %v4919_v35, %s3699_s29  ;;  %2105 = vrot.lane.b32.xlu0 %v4922_v13, %s3699_s29 }
 0x2fd   : > { %v2322_v26 = vpop.permute.xlu1 %2321  ;;  %v2290_v14 = vpop.permute.xlu0 %2289 }
 0x2fe   : > { %2394 = vst.msk [vmem:[#allocation2 + $0xc0] sm:$0xff] %vm2369_vm11, %v2322_v26  ;;  %2378 = vst.msk [vmem:[#allocation2 + $0x40] sm:$0xff] %vm2369_vm11, %v2290_v14 }
 0x2ff   : > { %2139 = vrot.lane.b32.xlu1 %v4949_v34, %s3699_s29  ;;  %2107 = vrot.lane.b32.xlu0 %v4952_v2, %s3699_s29  ;;  %v3446_v34 = vld [vmem:[%s3747_s19 + $0x1fb] sm:$0xff] }
 0x300   : > { %v3430_v2 = vld [vmem:[%s3747_s19 + $0x13b] sm:$0xff]  ;;  %s3451_s19 = sshll.u32 %s5340_s12, 8 }
 0x301   : > { %v1738_v35 = vpop.permute.xlu1 %1737  ;;  %v1706_v50 = vpop.permute.xlu0 %1705 }
 0x302   : > { %1808 = vst.msk [vmem:[#allocation2 + $0xd0] sm:$0xff] %vm1781_vm8, %v1738_v35  ;;  %1792 = vst.msk [vmem:[#allocation2 + $0x50] sm:$0xff] %vm1781_vm8, %v1706_v50 }
 0x303   : > { %2333 = vrot.lane.b32.xlu1 %v5046_v3, %s3700_s30  ;;  %2301 = vrot.lane.b32.xlu0 %v5049_v60, %s3700_s30 }
 0x305   : > { %v2324_v13 = vpop.permute.xlu1 %2323  ;;  %v2292_v18 = vpop.permute.xlu0 %2291 }
 0x306   : > { %2395 = vst.msk [vmem:[#allocation2 + $0xc8] sm:$0xff] %vm2369_vm11, %v2324_v13  ;;  %2379 = vst.msk [vmem:[#allocation2 + $0x48] sm:$0xff] %vm2369_vm11, %v2292_v18 }
 0x307   : > { %2335 = vrot.lane.b32.xlu1 %v3445_v8, %s3700_s30  ;;  %2303 = vrot.lane.b32.xlu0 %v3429_v21, %s3700_s30 }
 0x309   : > { %v2518_v7 = vpop.permute.xlu1 %2517  ;;  %v2486_v42 = vpop.permute.xlu0 %2485 }
 0x30a   : > { %2590 = vst.msk [vmem:[#allocation2 + $0xc0] sm:$0xff] %vm2565_vm12, %v2518_v7  ;;  %2574 = vst.msk [vmem:[#allocation2 + $0x40] sm:$0xff] %vm2565_vm12, %v2486_v42 }
 0x30b   : > { %2623 = vst.msk [vmem:[#allocation2 + $0xc0] sm:$0xff] %vm2598_vm13, %v3702_v29  ;;  %2607 = vst.msk [vmem:[#allocation2 + $0x40] sm:$0xff] %vm2598_vm13, %v3702_v29  ;;  %2529 = vrot.lane.b32.xlu1 %v3446_v34, %s3701_s4  ;;  %2497 = vrot.lane.b32.xlu0 %v3430_v2, %s3701_s4 }
 0x30d   : > { %v1740_v31 = vpop.permute.xlu1 %1739  ;;  %v1708_v63 = vpop.permute.xlu0 %1707 }
 0x30e   : > { %1809 = vst.msk [vmem:[#allocation2 + $0xd8] sm:$0xff] %vm1781_vm8, %v1740_v31  ;;  %1793 = vst.msk [vmem:[#allocation2 + $0x58] sm:$0xff] %vm1781_vm8, %v1708_v63 }
 0x30f   : > { %2531 = vrot.lane.b32.xlu1 %v3447_v6, %s3701_s4  ;;  %2499 = vrot.lane.b32.xlu0 %v3431_v43, %s3701_s4  ;;  %s5224_s4 = scalar_lea.vmem %s5334_s3, %s3451_s19 }
 0x311   : > { %v1934_v48 = vpop.permute.xlu1 %1933  ;;  %v1902_v49 = vpop.permute.xlu0 %1901 }
 0x312   : > { %2004 = vst.msk [vmem:[#allocation2 + $0xd0] sm:$0xff] %vm1977_vm9, %v1934_v48  ;;  %1988 = vst.msk [vmem:[#allocation2 + $0x50] sm:$0xff] %vm1977_vm9, %v1902_v49  ;;  %v2639_v47 = vld [vmem:[#allocation2 + $0x40] sm:$0xff] }
 0x313   : > { %v2655_v10 = vld [vmem:[#allocation2 + $0xc0] sm:$0xff]  ;;  %3544 = vmatprep.mubr.f32.mxu0 %v2639_v47 }
 0x314   : > { %3568 = vmatprep.mubr.f32.mxu1 %v2655_v10 }
 0x315   : > { %v2520_v52 = vpop.permute.xlu1 %2519  ;;  %v2488_v62 = vpop.permute.xlu0 %2487 }
 0x316   : > { %2591 = vst.msk [vmem:[#allocation2 + $0xc8] sm:$0xff] %vm2565_vm12, %v2520_v52  ;;  %2575 = vst.msk [vmem:[#allocation2 + $0x48] sm:$0xff] %vm2565_vm12, %v2488_v62 }
 0x317   : > { %2624 = vst.msk [vmem:[#allocation2 + $0xc8] sm:$0xff] %vm2598_vm13, %v3702_v29  ;;  %2608 = vst.msk [vmem:[#allocation2 + $0x48] sm:$0xff] %vm2598_vm13, %v3702_v29 }
 0x319   : > { %v1936_v15 = vpop.permute.xlu1 %1935  ;;  %v1904_v30 = vpop.permute.xlu0 %1903 }
 0x31a   : > { %2005 = vst.msk [vmem:[#allocation2 + $0xd8] sm:$0xff] %vm1977_vm9, %v1936_v15  ;;  %1989 = vst.msk [vmem:[#allocation2 + $0x58] sm:$0xff] %vm1977_vm9, %v1904_v30 }
 0x31d   : > { %v2130_v53 = vpop.permute.xlu1 %2129  ;;  %v2098_v56 = vpop.permute.xlu0 %2097 }
 0x31e   : > { %2200 = vst.msk [vmem:[#allocation2 + $0xd0] sm:$0xff] %vm2173_vm10, %v2130_v53  ;;  %2184 = vst.msk [vmem:[#allocation2 + $0x50] sm:$0xff] %vm2173_vm10, %v2098_v56  ;;  %v2640_v61 = vld [vmem:[#allocation2 + $0x48] sm:$0xff] }
 0x31f   : > { %v2656_v57 = vld [vmem:[#allocation2 + $0xc8] sm:$0xff]  ;;  %3545 = vmatmul.mubr.f32.gmra.mrb[8].mxu0 %v2640_v61 }
 0x320   : > { %3569 = vmatmul.mubr.f32.gmra.mrb[8].mxu1 %v2656_v57  ;;  %v5219_v57 = vld [vmem:[%s5333_s2] ss:$0 sm:$0xff] }
 0x321   : > { %v2132_v3 = vpop.permute.xlu1 %2131  ;;  %v2100_v60 = vpop.permute.xlu0 %2099 }
 0x322   : > { %2201 = vst.msk [vmem:[#allocation2 + $0xd8] sm:$0xff] %vm2173_vm10, %v2132_v3  ;;  %2185 = vst.msk [vmem:[#allocation2 + $0x58] sm:$0xff] %vm2173_vm10, %v2100_v60 }
 0x325   : > { %v2326_v0 = vpop.permute.xlu1 %2325  ;;  %v2294_v23 = vpop.permute.xlu0 %2293 }
 0x326   : > { %2396 = vst.msk [vmem:[#allocation2 + $0xd0] sm:$0xff] %vm2369_vm11, %v2326_v0  ;;  %2380 = vst.msk [vmem:[#allocation2 + $0x50] sm:$0xff] %vm2369_vm11, %v2294_v23 }
 0x329   : > { %v1742_v55 = vpop.permute.xlu1 %1741  ;;  %v1710_v1 = vpop.permute.xlu0 %1709 }
 0x32a   : > { %1810 = vst.msk [vmem:[#allocation2 + $0xe0] sm:$0xff] %vm1781_vm8, %v1742_v55  ;;  %1794 = vst.msk [vmem:[#allocation2 + $0x60] sm:$0xff] %vm1781_vm8, %v1710_v1 }
 0x32d   : > { %v2328_v4 = vpop.permute.xlu1 %2327  ;;  %v2296_v11 = vpop.permute.xlu0 %2295 }
 0x32e   : > { %2397 = vst.msk [vmem:[#allocation2 + $0xd8] sm:$0xff] %vm2369_vm11, %v2328_v4  ;;  %2381 = vst.msk [vmem:[#allocation2 + $0x58] sm:$0xff] %vm2369_vm11, %v2296_v11 }
 0x331   : > { %v2522_v5 = vpop.permute.xlu1 %2521  ;;  %v2490_v9 = vpop.permute.xlu0 %2489 }
 0x332   : > { %2592 = vst.msk [vmem:[#allocation2 + $0xd0] sm:$0xff] %vm2565_vm12, %v2522_v5  ;;  %2576 = vst.msk [vmem:[#allocation2 + $0x50] sm:$0xff] %vm2565_vm12, %v2490_v9 }
 0x333   : > { %2625 = vst.msk [vmem:[#allocation2 + $0xd0] sm:$0xff] %vm2598_vm13, %v3702_v29  ;;  %2609 = vst.msk [vmem:[#allocation2 + $0x50] sm:$0xff] %vm2598_vm13, %v3702_v29 }
 0x335   : > { %v1744_v22 = vpop.permute.xlu1 %1743  ;;  %v1712_v54 = vpop.permute.xlu0 %1711 }
 0x336   : > { %1811 = vst.msk [vmem:[#allocation2 + $0xe8] sm:$0xff] %vm1781_vm8, %v1744_v22  ;;  %1795 = vst.msk [vmem:[#allocation2 + $0x68] sm:$0xff] %vm1781_vm8, %v1712_v54 }
 0x339   : > { %v1938_v12 = vpop.permute.xlu1 %1937  ;;  %v1906_v16 = vpop.permute.xlu0 %1905 }
 0x33a   : > { %2006 = vst.msk [vmem:[#allocation2 + $0xe0] sm:$0xff] %vm1977_vm9, %v1938_v12  ;;  %1990 = vst.msk [vmem:[#allocation2 + $0x60] sm:$0xff] %vm1977_vm9, %v1906_v16  ;;  %v2641_v46 = vld [vmem:[#allocation2 + $0x50] sm:$0xff] }
 0x33b   : > { %v2657_v17 = vld [vmem:[#allocation2 + $0xd0] sm:$0xff]  ;;  %3547 = vmatprep.mubr.f32.mxu0 %v2641_v46 }
 0x33c   : > { %3571 = vmatprep.mubr.f32.mxu1 %v2657_v17 }
 0x33d   : > { %v2524_v20 = vpop.permute.xlu1 %2523  ;;  %v2492_v8 = vpop.permute.xlu0 %2491 }
 0x33e   : > { %2593 = vst.msk [vmem:[#allocation2 + $0xd8] sm:$0xff] %vm2565_vm12, %v2524_v20  ;;  %2577 = vst.msk [vmem:[#allocation2 + $0x58] sm:$0xff] %vm2565_vm12, %v2492_v8 }
 0x33f   : > { %2626 = vst.msk [vmem:[#allocation2 + $0xd8] sm:$0xff] %vm2598_vm13, %v3702_v29  ;;  %2610 = vst.msk [vmem:[#allocation2 + $0x58] sm:$0xff] %vm2598_vm13, %v3702_v29 }
 0x341   : > { %v1940_v21 = vpop.permute.xlu1 %1939  ;;  %v1908_v24 = vpop.permute.xlu0 %1907 }
 0x342   : > { %2007 = vst.msk [vmem:[#allocation2 + $0xe8] sm:$0xff] %vm1977_vm9, %v1940_v21  ;;  %1991 = vst.msk [vmem:[#allocation2 + $0x68] sm:$0xff] %vm1977_vm9, %v1908_v24 }
 0x345   : > { %v2134_v25 = vpop.permute.xlu1 %2133  ;;  %v2102_v28 = vpop.permute.xlu0 %2101 }
 0x346   : > { %2202 = vst.msk [vmem:[#allocation2 + $0xe0] sm:$0xff] %vm2173_vm10, %v2134_v25  ;;  %2186 = vst.msk [vmem:[#allocation2 + $0x60] sm:$0xff] %vm2173_vm10, %v2102_v28  ;;  %v2642_v27 = vld [vmem:[#allocation2 + $0x58] sm:$0xff] }
 0x347   : > { %v2658_v32 = vld [vmem:[#allocation2 + $0xd8] sm:$0xff]  ;;  %3548 = vmatmul.mubr.f32.gmra.mrb[10].mxu0 %v2642_v27 }
 0x348   : > { %3572 = vmatmul.mubr.f32.gmra.mrb[10].mxu1 %v2658_v32 }
 0x349   : > { %v2136_v33 = vpop.permute.xlu1 %2135  ;;  %v2104_v59 = vpop.permute.xlu0 %2103 }
 0x34a   : > { %2203 = vst.msk [vmem:[#allocation2 + $0xe8] sm:$0xff] %vm2173_vm10, %v2136_v33  ;;  %2187 = vst.msk [vmem:[#allocation2 + $0x68] sm:$0xff] %vm2173_vm10, %v2104_v59 }
 0x34d   : > { %v2330_v36 = vpop.permute.xlu1 %2329  ;;  %v2298_v37 = vpop.permute.xlu0 %2297 }
 0x34e   : > { %2398 = vst.msk [vmem:[#allocation2 + $0xe0] sm:$0xff] %vm2369_vm11, %v2330_v36  ;;  %2382 = vst.msk [vmem:[#allocation2 + $0x60] sm:$0xff] %vm2369_vm11, %v2298_v37 }
 0x351   : > { %v1746_v38 = vpop.permute.xlu1 %1745  ;;  %v1714_v58 = vpop.permute.xlu0 %1713 }
 0x352   : > { %1812 = vst.msk [vmem:[#allocation2 + $0xf0] sm:$0xff] %vm1781_vm8, %v1746_v38  ;;  %1796 = vst.msk [vmem:[#allocation2 + $0x70] sm:$0xff] %vm1781_vm8, %v1714_v58 }
 0x355   : > { %v2332_v39 = vpop.permute.xlu1 %2331  ;;  %v2300_v51 = vpop.permute.xlu0 %2299 }
 0x356   : > { %2399 = vst.msk [vmem:[#allocation2 + $0xe8] sm:$0xff] %vm2369_vm11, %v2332_v39  ;;  %2383 = vst.msk [vmem:[#allocation2 + $0x68] sm:$0xff] %vm2369_vm11, %v2300_v51 }
 0x359   : > { %v2526_v19 = vpop.permute.xlu1 %2525  ;;  %v2494_v40 = vpop.permute.xlu0 %2493 }
 0x35a   : > { %2594 = vst.msk [vmem:[#allocation2 + $0xe0] sm:$0xff] %vm2565_vm12, %v2526_v19  ;;  %2578 = vst.msk [vmem:[#allocation2 + $0x60] sm:$0xff] %vm2565_vm12, %v2494_v40 }
 0x35b   : > { %2627 = vst.msk [vmem:[#allocation2 + $0xe0] sm:$0xff] %vm2598_vm13, %v3702_v29  ;;  %2611 = vst.msk [vmem:[#allocation2 + $0x60] sm:$0xff] %vm2598_vm13, %v3702_v29 }
 0x35d   : > { %v1748_v41 = vpop.permute.xlu1 %1747  ;;  %v1716_v44 = vpop.permute.xlu0 %1715 }
 0x35e   : > { %1813 = vst.msk [vmem:[#allocation2 + $0xf8] sm:$0xff] %vm1781_vm8, %v1748_v41  ;;  %1797 = vst.msk [vmem:[#allocation2 + $0x78] sm:$0xff] %vm1781_vm8, %v1716_v44 }
 0x361   : > { %v1942_v45 = vpop.permute.xlu1 %1941  ;;  %v1910_v26 = vpop.permute.xlu0 %1909 }
 0x362   : > { %2008 = vst.msk [vmem:[#allocation2 + $0xf0] sm:$0xff] %vm1977_vm9, %v1942_v45  ;;  %1992 = vst.msk [vmem:[#allocation2 + $0x70] sm:$0xff] %vm1977_vm9, %v1910_v26  ;;  %v2643_v14 = vld [vmem:[#allocation2 + $0x60] sm:$0xff] }
 0x363   : > { %v2659_v35 = vld [vmem:[#allocation2 + $0xe0] sm:$0xff]  ;;  %3550 = vmatprep.mubr.f32.mxu0 %v2643_v14 }
 0x364   : > { %3574 = vmatprep.mubr.f32.mxu1 %v2659_v35 }
 0x365   : > { %v2528_v50 = vpop.permute.xlu1 %2527  ;;  %v2496_v13 = vpop.permute.xlu0 %2495 }
 0x366   : > { %2595 = vst.msk [vmem:[#allocation2 + $0xe8] sm:$0xff] %vm2565_vm12, %v2528_v50  ;;  %2579 = vst.msk [vmem:[#allocation2 + $0x68] sm:$0xff] %vm2565_vm12, %v2496_v13 }
 0x367   : > { %2628 = vst.msk [vmem:[#allocation2 + $0xe8] sm:$0xff] %vm2598_vm13, %v3702_v29  ;;  %2612 = vst.msk [vmem:[#allocation2 + $0x68] sm:$0xff] %vm2598_vm13, %v3702_v29 }
 0x369   : > { %v1944_v18 = vpop.permute.xlu1 %1943  ;;  %v1912_v34 = vpop.permute.xlu0 %1911 }
 0x36a   : > { %2009 = vst.msk [vmem:[#allocation2 + $0xf8] sm:$0xff] %vm1977_vm9, %v1944_v18  ;;  %1993 = vst.msk [vmem:[#allocation2 + $0x78] sm:$0xff] %vm1977_vm9, %v1912_v34 }
 0x36d   : > { %v2138_v2 = vpop.permute.xlu1 %2137  ;;  %v2106_v7 = vpop.permute.xlu0 %2105 }
 0x36e   : > { %2204 = vst.msk [vmem:[#allocation2 + $0xf0] sm:$0xff] %vm2173_vm10, %v2138_v2  ;;  %2188 = vst.msk [vmem:[#allocation2 + $0x70] sm:$0xff] %vm2173_vm10, %v2106_v7  ;;  %v2644_v42 = vld [vmem:[#allocation2 + $0x68] sm:$0xff] }
 0x36f   : > { %v2660_v6 = vld [vmem:[#allocation2 + $0xe8] sm:$0xff]  ;;  %3551 = vmatmul.mubr.f32.gmra.mrb[12].mxu0 %v2644_v42 }
 0x370   : > { %3575 = vmatmul.mubr.f32.gmra.mrb[12].mxu1 %v2660_v6 }
 0x371   : > { %v2140_v43 = vpop.permute.xlu1 %2139  ;;  %v2108_v31 = vpop.permute.xlu0 %2107 }
 0x372   : > { %2205 = vst.msk [vmem:[#allocation2 + $0xf8] sm:$0xff] %vm2173_vm10, %v2140_v43  ;;  %2189 = vst.msk [vmem:[#allocation2 + $0x78] sm:$0xff] %vm2173_vm10, %v2108_v31 }
 0x375   : > { %v2334_v63 = vpop.permute.xlu1 %2333  ;;  %v2302_v48 = vpop.permute.xlu0 %2301 }
 0x376   : > { %2400 = vst.msk [vmem:[#allocation2 + $0xf0] sm:$0xff] %vm2369_vm11, %v2334_v63  ;;  %2384 = vst.msk [vmem:[#allocation2 + $0x70] sm:$0xff] %vm2369_vm11, %v2302_v48 }
 0x379   : > { %v2336_v49 = vpop.permute.xlu1 %2335  ;;  %v2304_v47 = vpop.permute.xlu0 %2303 }
 0x37a   : > { %2401 = vst.msk [vmem:[#allocation2 + $0xf8] sm:$0xff] %vm2369_vm11, %v2336_v49  ;;  %2385 = vst.msk [vmem:[#allocation2 + $0x78] sm:$0xff] %vm2369_vm11, %v2304_v47 }
 0x37d   : > { %v2530_v10 = vpop.permute.xlu1 %2529  ;;  %v2498_v52 = vpop.permute.xlu0 %2497 }
 0x37e   : > { %2596 = vst.msk [vmem:[#allocation2 + $0xf0] sm:$0xff] %vm2565_vm12, %v2530_v10  ;;  %2580 = vst.msk [vmem:[#allocation2 + $0x70] sm:$0xff] %vm2565_vm12, %v2498_v52 }
 0x37f   : > { %2629 = vst.msk [vmem:[#allocation2 + $0xf0] sm:$0xff] %vm2598_vm13, %v3702_v29  ;;  %2613 = vst.msk [vmem:[#allocation2 + $0x70] sm:$0xff] %vm2598_vm13, %v3702_v29 }
 0x381   : > { %v2532_v62 = vpop.permute.xlu1 %2531  ;;  %v2500_v15 = vpop.permute.xlu0 %2499 }
 0x382   : > { %2597 = vst.msk [vmem:[#allocation2 + $0xf8] sm:$0xff] %vm2565_vm12, %v2532_v62  ;;  %2581 = vst.msk [vmem:[#allocation2 + $0x78] sm:$0xff] %vm2565_vm12, %v2500_v15 }
 0x383   : > { %2630 = vst.msk [vmem:[#allocation2 + $0xf8] sm:$0xff] %vm2598_vm13, %v3702_v29  ;;  %2614 = vst.msk [vmem:[#allocation2 + $0x78] sm:$0xff] %vm2598_vm13, %v3702_v29 }
 0x386   : > { %v2645_v30 = vld [vmem:[#allocation2 + $0x70] sm:$0xff] }
 0x387   : > { %v2661_v53 = vld [vmem:[#allocation2 + $0xf0] sm:$0xff]  ;;  %3553 = vmatprep.mubr.f32.mxu0 %v2645_v30 }
 0x388   : > { %3577 = vmatprep.mubr.f32.mxu1 %v2661_v53 }
 0x38a   : > { %v2646_v56 = vld [vmem:[#allocation2 + $0x78] sm:$0xff] }
 0x38b   : > { %v2662_v61 = vld [vmem:[#allocation2 + $0xf8] sm:$0xff]  ;;  %3554 = vmatmul.mubr.f32.gmra.mrb[14].mxu0 %v2646_v56 }
 0x38c   : > { %3578 = vmatmul.mubr.f32.gmra.mrb[14].mxu1 %v2662_v61 }
 0x3bf   : > { %v3534_v29 = vpop.f32.mrb[0].mxu0  ;;  %v3558_v3 = vpop.f32.mrb[0].mxu1 }
 0x3c0   : > { %v2758_v60 = vadd.f32 %v3534_v29, %v5219_v57  ;;  %v2838_v0 = vadd.f32 %v3558_v3, %v5219_v57  ;;  %v2752_v23 = vpop.f32.mrb[1].mxu0  ;;  %v2832_v55 = vpop.f32.mrb[1].mxu1 }
 0x3c1   : > { %v2753_v1 = vadd.f32 %v5219_v57, %v2752_v23  ;;  %v2833_v4 = vadd.f32 %v5219_v57, %v2832_v55 }
 0x3c2   : > { %2912 = vst.msk [vmem:[%s5224_s4 + $0x8] sm:$0xff] %vm232_vm0, %v2758_v60  ;;  %2928 = vst.msk [vmem:[%s5224_s4 + $0x88] sm:$0xff] %vm232_vm0, %v2838_v0 }
 0x3c3   : > { %2911 = vst.msk [vmem:[%s5224_s4] sm:$0xff] %vm232_vm0, %v2753_v1  ;;  %2927 = vst.msk [vmem:[%s5224_s4 + $0x80] sm:$0xff] %vm232_vm0, %v2833_v4  ;;  %v3537_v11 = vpop.f32.mrb[2].mxu0  ;;  %v3561_v5 = vpop.f32.mrb[2].mxu1 }
 0x3c4   : > { %v2768_v9 = vadd.f32 %v3537_v11, %v5219_v57  ;;  %v2848_v22 = vadd.f32 %v3561_v5, %v5219_v57  ;;  %v2762_v54 = vpop.f32.mrb[3].mxu0  ;;  %v2842_v12 = vpop.f32.mrb[3].mxu1 }
 0x3c5   : > { %v2763_v16 = vadd.f32 %v5219_v57, %v2762_v54  ;;  %v2843_v46 = vadd.f32 %v5219_v57, %v2842_v12 }
 0x3c6   : > { %2914 = vst.msk [vmem:[%s5224_s4 + $0x18] sm:$0xff] %vm232_vm0, %v2768_v9  ;;  %2930 = vst.msk [vmem:[%s5224_s4 + $0x98] sm:$0xff] %vm232_vm0, %v2848_v22 }
 0x3c7   : > { %2913 = vst.msk [vmem:[%s5224_s4 + $0x10] sm:$0xff] %vm232_vm0, %v2763_v16  ;;  %2929 = vst.msk [vmem:[%s5224_s4 + $0x90] sm:$0xff] %vm232_vm0, %v2843_v46  ;;  %v3540_v17 = vpop.f32.mrb[4].mxu0  ;;  %v3564_v20 = vpop.f32.mrb[4].mxu1 }
 0x3c8   : > { %v2778_v8 = vadd.f32 %v3540_v17, %v5219_v57  ;;  %v2858_v21 = vadd.f32 %v3564_v20, %v5219_v57  ;;  %v2772_v24 = vpop.f32.mrb[5].mxu0  ;;  %v2852_v25 = vpop.f32.mrb[5].mxu1 }
 0x3c9   : > { %v2773_v28 = vadd.f32 %v5219_v57, %v2772_v24  ;;  %v2853_v27 = vadd.f32 %v5219_v57, %v2852_v25 }
 0x3ca   : > { %2916 = vst.msk [vmem:[%s5224_s4 + $0x28] sm:$0xff] %vm232_vm0, %v2778_v8  ;;  %2932 = vst.msk [vmem:[%s5224_s4 + $0xa8] sm:$0xff] %vm232_vm0, %v2858_v21 }
 0x3cb   : > { %2915 = vst.msk [vmem:[%s5224_s4 + $0x20] sm:$0xff] %vm232_vm0, %v2773_v28  ;;  %2931 = vst.msk [vmem:[%s5224_s4 + $0xa0] sm:$0xff] %vm232_vm0, %v2853_v27  ;;  %v3543_v32 = vpop.f32.mrb[6].mxu0  ;;  %v3567_v33 = vpop.f32.mrb[6].mxu1 }
 0x3cc   : > { %v2788_v59 = vadd.f32 %v3543_v32, %v5219_v57  ;;  %v2868_v36 = vadd.f32 %v3567_v33, %v5219_v57  ;;  %v2782_v37 = vpop.f32.mrb[7].mxu0  ;;  %v2862_v38 = vpop.f32.mrb[7].mxu1 }
 0x3cd   : > { %v2783_v58 = vadd.f32 %v5219_v57, %v2782_v37  ;;  %v2863_v39 = vadd.f32 %v5219_v57, %v2862_v38 }
 0x3ce   : > { %2918 = vst.msk [vmem:[%s5224_s4 + $0x38] sm:$0xff] %vm232_vm0, %v2788_v59  ;;  %2934 = vst.msk [vmem:[%s5224_s4 + $0xb8] sm:$0xff] %vm232_vm0, %v2868_v36 }
 0x3cf   : > { %2917 = vst.msk [vmem:[%s5224_s4 + $0x30] sm:$0xff] %vm232_vm0, %v2783_v58  ;;  %2933 = vst.msk [vmem:[%s5224_s4 + $0xb0] sm:$0xff] %vm232_vm0, %v2863_v39 }
 0x3f2   : > { %v3546_v51 = vpop.f32.mrb[8].mxu0 }
 0x3f3   : > { %v3570_v19 = vpop.f32.mrb[8].mxu1  ;;  %v2798_v40 = vadd.f32 %v3546_v51, %v5219_v57  ;;  %v2792_v44 = vpop.f32.mrb[9].mxu0 }
 0x3f4   : > { %v2878_v41 = vadd.f32 %v3570_v19, %v5219_v57  ;;  %v2872_v45 = vpop.f32.mrb[9].mxu1  ;;  %v2793_v26 = vadd.f32 %v5219_v57, %v2792_v44 }
 0x3f5   : > { %v2873_v14 = vadd.f32 %v5219_v57, %v2872_v45  ;;  %2920 = vst.msk [vmem:[%s5224_s4 + $0x48] sm:$0xff] %vm232_vm0, %v2798_v40 }
 0x3f6   : > { %2936 = vst.msk [vmem:[%s5224_s4 + $0xc8] sm:$0xff] %vm232_vm0, %v2878_v41  ;;  %2919 = vst.msk [vmem:[%s5224_s4 + $0x40] sm:$0xff] %vm232_vm0, %v2793_v26 }
 0x3f7   : > { %2935 = vst.msk [vmem:[%s5224_s4 + $0xc0] sm:$0xff] %vm232_vm0, %v2873_v14 }
 0x41a   : > { %v3549_v35 = vpop.f32.mrb[10].mxu0 }
 0x41b   : > { %v3573_v50 = vpop.f32.mrb[10].mxu1  ;;  %v2808_v13 = vadd.f32 %v3549_v35, %v5219_v57  ;;  %v2802_v34 = vpop.f32.mrb[11].mxu0 }
 0x41c   : > { %v2888_v18 = vadd.f32 %v3573_v50, %v5219_v57  ;;  %v2882_v2 = vpop.f32.mrb[11].mxu1  ;;  %v2803_v7 = vadd.f32 %v5219_v57, %v2802_v34 }
 0x41d   : > { %v2883_v42 = vadd.f32 %v5219_v57, %v2882_v2  ;;  %2922 = vst.msk [vmem:[%s5224_s4 + $0x58] sm:$0xff] %vm232_vm0, %v2808_v13 }
 0x41e   : > { %2938 = vst.msk [vmem:[%s5224_s4 + $0xd8] sm:$0xff] %vm232_vm0, %v2888_v18  ;;  %2921 = vst.msk [vmem:[%s5224_s4 + $0x50] sm:$0xff] %vm232_vm0, %v2803_v7 }
 0x41f   : > { %2937 = vst.msk [vmem:[%s5224_s4 + $0xd0] sm:$0xff] %vm232_vm0, %v2883_v42 }
 0x442   : > { %v3552_v6 = vpop.f32.mrb[12].mxu0 }
 0x443   : > { %v3576_v43 = vpop.f32.mrb[12].mxu1  ;;  %v2818_v31 = vadd.f32 %v3552_v6, %v5219_v57  ;;  %v2812_v48 = vpop.f32.mrb[13].mxu0 }
 0x444   : > { %v2898_v63 = vadd.f32 %v3576_v43, %v5219_v57  ;;  %v2892_v49 = vpop.f32.mrb[13].mxu1  ;;  %v2813_v47 = vadd.f32 %v5219_v57, %v2812_v48 }
 0x445   : > { %v2893_v10 = vadd.f32 %v5219_v57, %v2892_v49  ;;  %2924 = vst.msk [vmem:[%s5224_s4 + $0x68] sm:$0xff] %vm232_vm0, %v2818_v31 }
 0x446   : > { %2940 = vst.msk [vmem:[%s5224_s4 + $0xe8] sm:$0xff] %vm232_vm0, %v2898_v63  ;;  %2923 = vst.msk [vmem:[%s5224_s4 + $0x60] sm:$0xff] %vm232_vm0, %v2813_v47 }
 0x447   : > { %2939 = vst.msk [vmem:[%s5224_s4 + $0xe0] sm:$0xff] %vm232_vm0, %v2893_v10 }
 0x45e   : > { %v3555_v52 = vpop.f32.mrb[14].mxu0 }
 0x45f   : > { %v3579_v62 = vpop.f32.mrb[14].mxu1  ;;  %v2828_v15 = vadd.f32 %v3555_v52, %v5219_v57  ;;  %v2822_v53 = vpop.f32.mrb[15].mxu0 }
 0x460   : > { %v2908_v30 = vadd.f32 %v3579_v62, %v5219_v57  ;;  %v2902_v56 = vpop.f32.mrb[15].mxu1  ;;  %v2823_v61 = vadd.f32 %v5219_v57, %v2822_v53 }
 0x461   : > { %v2903_v29 = vadd.f32 %v5219_v57, %v2902_v56  ;;  %2926 = vst.msk [vmem:[%s5224_s4 + $0x78] sm:$0xff] %vm232_vm0, %v2828_v15 }
 0x462   : > { %2942 = vst.msk [vmem:[%s5224_s4 + $0xf8] sm:$0xff] %vm232_vm0, %v2908_v30  ;;  %2925 = vst.msk [vmem:[%s5224_s4 + $0x70] sm:$0xff] %vm232_vm0, %v2823_v61 }
 0x463   : > { %2941 = vst.msk [vmem:[%s5224_s4 + $0xf0] sm:$0xff] %vm232_vm0, %v2903_v29 }
 0x464 PF: > { %s13_s14 = sadd.s32 1, %s3688_s14   ;;  %s5335_s12 = smov %s3684_s13 }
 0x465   : > { %p10_p5 = scmp.ge.s32.totalorder %s13_s14, 4   ;;  %s5336_s13 = smov %s5338_s15 }
 0x467   :  { %12 = sbr.rel (!%p10_p5) target bundleno = 2 (0x2), region = 69 }

</bundles_post_ra>
